<compile_context>
chip_gen: v7x
topology: tpu7x:2x2x1
jax: 0.10.0
libtpu: 0.0.40
codegen_flags: <defaults>
</compile_context>

<pallas_src>
import math

import jax
import jax.numpy as jnp
from jax.experimental import pallas as pl
from jax.experimental.pallas import tpu as pltpu

LIKELIHOOD_MAP_DIM = 5 * 8          # 40
CONV_OUTDIM = 3200                  # 64 * 5 * 10

# Geometry fixed by the module (conv_outdim == 64 * 5 * 10):
H_IN, W_IN = 52, 92                 # input spatial size
H1, W1 = 12, 22                     # conv1 output spatial
H2, W2 = 5, 10                      # conv2 output spatial
C1, C2 = 32, 64                     # conv output channels
K1F = 3 * 8 * 8                     # 192  (conv1 patch features)
K2F = C1 * 4 * 4                    # 512  (conv2 patch features)
ROWS1 = H1 * W1                     # 264  (conv1 output rows)
ROWS1_PAD = ROWS1 + 8               # 272  (one extra zeroed sublane-tile)
ROWS2 = H2 * W2                     # 50   (conv2 output rows, valid)
W2P = W2 + 1                        # 11   (padded conv2 output width)
ROWS2_PAD = H2 * W2P                # 55   (conv2 rows incl. discarded pad col)
HALF = (H1 // 2) * (W1 // 2)        # 66   (rows per parity block of h1)
WHALF = W1 // 2                     # 11


# ---------------------------------------------------------------------------
# Fused kernel: conv1 mm -> conv2 im2col -> conv2 mm -> flatten -> FC+softmax
# (one grid step == one image; weights are fetched once, intermediates stay
#  in VMEM scratch)
# ---------------------------------------------------------------------------
def _fused_net_kernel(p1_ref, w1_ref, b1_ref, w2_ref, b2_ref, wf_ref, bf_ref,
                      out_ref, h1_ref, p2_ref, h2_ref, flat_ref):
    # ---- conv1: single MXU matmul over im2col patches + bias + relu --------
    a1 = jnp.dot(p1_ref[...], w1_ref[...], preferred_element_type=jnp.float32)
    h1_ref[0:ROWS1, :] = jnp.maximum(a1 + b1_ref[...], 0.0)     # (264, 32) f32
    # zero the pad tail so the padded im2col below never reads garbage
    h1_ref[ROWS1:ROWS1_PAD, :] = jnp.zeros((ROWS1_PAD - ROWS1, C1), jnp.float32)

    # ---- conv2 im2col, entirely in VMEM ------------------------------------
    # h1 rows were produced in the order
    #   R(h, w) = (h % 2) * 132 + (w % 2) * 66 + (h // 2) * 11 + (w // 2)
    # so for every conv2 tap (i, j) the h1 rows needed for the width-PADDED
    # 5 x 11 output grid form ONE contiguous unit-stride range of 55 rows:
    #   p2[a*11 + u, tap] = h1[start(tap) + a*11 + u]   (u = 10 is a discarded
    # pad column; it may read the zeroed h1 tail / a neighboring parity block).
    for i in range(4):
        qi, ri = i // 2, i % 2
        for j in range(4):
            qj, rj = j // 2, j % 2
            col = (i * 4 + j) * C1
            start = ri * 2 * HALF + rj * HALF + qi * WHALF + qj
            p2_ref[:, col:col + C1] = h1_ref[start:start + ROWS2_PAD, :]

    # ---- conv2: single MXU matmul + bias + relu -----------------------------
    a2 = jnp.dot(p2_ref[...].astype(jnp.bfloat16), w2_ref[...],
                 preferred_element_type=jnp.float32)
    h2_ref[...] = jnp.maximum(a2 + b2_ref[...], 0.0)             # (55, 64) f32

    # ---- flatten: (spatial, channel) order, skipping the pad column ---------
    # (the FC weight was pre-permuted to this order, so this IS x.view(-1,3200))
    for a in range(H2):
        for w in range(W2):
            p = a * W2 + w
            flat_ref[0, p * C2:(p + 1) * C2] = h2_ref[a * W2P + w, :]

    # ---- loca_fc1 + softmax(dim=1) ------------------------------------------
    logits = jnp.dot(flat_ref[...].astype(jnp.bfloat16), wf_ref[...],
                     preferred_element_type=jnp.float32) + bf_ref[...]
    logits = logits - jnp.max(logits, axis=-1, keepdims=True)
    e = jnp.exp(logits)
    out_ref[...] = (e / jnp.sum(e, axis=-1, keepdims=True)).astype(out_ref.dtype)


# ---------------------------------------------------------------------------
# conv1 patch extraction (single XLA rearrangement, feeds the fused kernel).
# Rows are in parity order R(h, w); features in PyTorch (c, kh, kw) order.
# ---------------------------------------------------------------------------
def _conv1_patches(x_nchw):
    n = x_nchw.shape[0]
    # H = 4*hb + hs ; window row 4*h + i with i = 4*qi + ri -> block h+qi
    xh = x_nchw.reshape(n, 3, 13, 4, W_IN)
    xh = jnp.stack([xh[:, :, 0:12], xh[:, :, 1:13]], axis=3)      # (n,3,12,2,4,92)
    # W = 4*wb + ws ; window col 4*w + j with j = 4*qj + rj -> block w+qj
    xw = xh.reshape(n, 3, 12, 2, 4, 23, 4)
    xw = jnp.stack([xw[..., 0:22, :], xw[..., 1:23, :]], axis=6)  # (n,3,12,2,4,22,2,4)
    # split h -> (hA, hP), w -> (wA, wP) and order rows (hP, wP, hA, wA),
    # features (c, qi, ri, qj, rj) == (c, kh, kw)
    xr = xw.reshape(n, 3, 6, 2, 2, 4, 11, 2, 2, 4)
    p1 = jnp.transpose(xr, (0, 3, 7, 2, 6, 1, 4, 5, 8, 9))
    return p1.reshape(n, ROWS1, K1F).astype(jnp.bfloat16)


# ---------------------------------------------------------------------------
# Parameter init (deterministic; xavier-normal weights like the module)
# ---------------------------------------------------------------------------
def init_params(key):
    def xavier(k, shape, fan_in, fan_out):
        std = math.sqrt(2.0 / (fan_in + fan_out))
        return std * jax.random.normal(k, shape, dtype=jnp.float32)

    def uniform_bias(k, shape, fan_in):
        bound = 1.0 / math.sqrt(fan_in)
        return jax.random.uniform(k, shape, jnp.float32, -bound, bound)

    ks = jax.random.split(key, 6)
    params = {
        "w1": xavier(ks[0], (C1, 3, 8, 8), 3 * 8 * 8, C1 * 8 * 8),
        "b1": uniform_bias(ks[1], (C1,), 3 * 8 * 8),
        "w2": xavier(ks[2], (C2, C1, 4, 4), C1 * 4 * 4, C2 * 4 * 4),
        "b2": uniform_bias(ks[3], (C2,), C1 * 4 * 4),
        "wf": xavier(ks[4], (LIKELIHOOD_MAP_DIM, CONV_OUTDIM),
                     CONV_OUTDIM, LIKELIHOOD_MAP_DIM),
        "bf": uniform_bias(ks[5], (LIKELIHOOD_MAP_DIM,), CONV_OUTDIM),
    }
    # TODO(synk): self.ang_fc1 and self.drop exist in __init__ but are unused
    # in forward(), so they are intentionally not instantiated here.
    return params


# ---------------------------------------------------------------------------
# Forward pass
# ---------------------------------------------------------------------------
@jax.jit
def net_forward(params, x_nchw):
    n, c, h, w = x_nchw.shape
    assert (c, h, w) == (3, H_IN, W_IN), "input must be (N, 3, 52, 92)"

    # One-time weight relayouts (tiny XLA ops on ~0.7 MB of weights):
    w1m = params["w1"].reshape(C1, K1F).T.astype(jnp.bfloat16)            # (192, 32)
    w2m = jnp.transpose(params["w2"], (2, 3, 1, 0)).reshape(K2F, C2) \
             .astype(jnp.bfloat16)                                        # (512, 64)
    # Fold the NCHW flatten into the FC weight: rows (c, h, w) -> (h*W2+w, c)
    wfm = jnp.transpose(params["wf"].reshape(LIKELIHOOD_MAP_DIM, C2, ROWS2),
                        (2, 1, 0)).reshape(CONV_OUTDIM, LIKELIHOOD_MAP_DIM) \
             .astype(jnp.bfloat16)                                        # (3200, 40)
    b1 = params["b1"].reshape(1, C1).astype(jnp.float32)
    b2 = params["b2"].reshape(1, C2).astype(jnp.float32)
    bf = params["bf"].reshape(1, LIKELIHOOD_MAP_DIM).astype(jnp.float32)

    p1 = _conv1_patches(x_nchw.astype(jnp.float32))                       # (N, 264, 192) bf16

    out = pl.pallas_call(
        _fused_net_kernel,
        out_shape=jax.ShapeDtypeStruct((n, 1, LIKELIHOOD_MAP_DIM), jnp.float32),
        grid_spec=pltpu.PrefetchScalarGridSpec(
            num_scalar_prefetch=0,
            grid=(n,),
            in_specs=[
                pl.BlockSpec((None, ROWS1, K1F), lambda i: (i, 0, 0)),    # p1 (per image)
                pl.BlockSpec((K1F, C1), lambda i: (0, 0)),                # w1m
                pl.BlockSpec((1, C1), lambda i: (0, 0)),                  # b1
                pl.BlockSpec((K2F, C2), lambda i: (0, 0)),                # w2m
                pl.BlockSpec((1, C2), lambda i: (0, 0)),                  # b2
                pl.BlockSpec((CONV_OUTDIM, LIKELIHOOD_MAP_DIM),
                             lambda i: (0, 0)),                           # wfm
                pl.BlockSpec((1, LIKELIHOOD_MAP_DIM), lambda i: (0, 0)),  # bf
            ],
            out_specs=pl.BlockSpec((None, 1, LIKELIHOOD_MAP_DIM),
                                   lambda i: (i, 0, 0)),
            scratch_shapes=[
                pltpu.VMEM((ROWS1_PAD, C1), jnp.float32),    # h1   (272, 32)
                pltpu.VMEM((ROWS2_PAD, K2F), jnp.float32),   # p2   (55, 512)
                pltpu.VMEM((ROWS2_PAD, C2), jnp.float32),    # h2   (55, 64)
                pltpu.VMEM((1, CONV_OUTDIM), jnp.float32),   # flat (1, 3200)
            ],
        ),
        compiler_params=pltpu.CompilerParams(
            dimension_semantics=("parallel",)),
    )(p1, w1m, b1, w2m, b2, wfm, bf)

    return out.reshape(n, LIKELIHOOD_MAP_DIM)


# ---------------------------------------------------------------------------
# Pure-JAX f32 reference of the same forward pass (correctness guard)
# ---------------------------------------------------------------------------
def net_forward_reference(params, x):
    hi = jax.lax.Precision.HIGHEST
    h = jax.lax.conv_general_dilated(
        x, params["w1"], (4, 4), "VALID",
        dimension_numbers=("NCHW", "OIHW", "NCHW"), precision=hi)
    h = jax.nn.relu(h + params["b1"][None, :, None, None])
    h = jax.lax.conv_general_dilated(
        h, params["w2"], (2, 2), "VALID",
        dimension_numbers=("NCHW", "OIHW", "NCHW"), precision=hi)
    h = jax.nn.relu(h + params["b2"][None, :, None, None])
    flat = h.reshape(x.shape[0], CONV_OUTDIM)
    logits = jnp.dot(flat, params["wf"].T, precision=hi) + params["bf"]
    return jax.nn.softmax(logits, axis=1)


if __name__ == "__main__":
    key = jax.random.PRNGKey(0)
    pkey, xkey = jax.random.split(key)
    params = init_params(pkey)

    # Spatial size chosen so the conv stack yields 64*5*10 = 3200 features,
    # consistent with conv_outdim in the module: (N, 3, 52, 92).
    x = 2.0 * jax.random.normal(xkey, (2, 3, H_IN, W_IN), dtype=jnp.float32)

    pos = net_forward(params, x)
    pos = jax.block_until_ready(pos)

    assert pos.shape == (2, LIKELIHOOD_MAP_DIM)
    assert bool(jnp.all(jnp.isfinite(pos)))
    assert bool(jnp.allclose(jnp.sum(pos, axis=-1), 1.0, atol=1e-5))

    # Compare against the f32 reference (kernel runs bf16 matmuls with f32
    # accumulation, so a small tolerance on the probabilities is expected).
    pos_ref = net_forward_reference(params, x)
    max_err = float(jnp.max(jnp.abs(pos - pos_ref)))
    assert max_err < 2.5e-3, f"mismatch vs f32 reference: max_err={max_err}"

    print("KERNEL_OK")
</pallas_src>

<mosaic_0001>
module attributes {stable_mosaic.version = 11 : i64} {
  func.func @_fused_net_kernel(%arg0: i32, %arg1: memref<1x264x192xbf16, #tpu.memory_space<vmem>>, %arg2: memref<192x32xbf16, #tpu.memory_space<vmem>>, %arg3: memref<1x32xf32, #tpu.memory_space<vmem>>, %arg4: memref<512x64xbf16, #tpu.memory_space<vmem>>, %arg5: memref<1x64xf32, #tpu.memory_space<vmem>>, %arg6: memref<3200x40xbf16, #tpu.memory_space<vmem>>, %arg7: memref<1x40xf32, #tpu.memory_space<vmem>>, %arg8: memref<1x1x40xf32, #tpu.memory_space<vmem>>, %arg9: memref<272x32xf32, #tpu.memory_space<vmem>>, %arg10: memref<55x512xf32, #tpu.memory_space<vmem>>, %arg11: memref<55x64xf32, #tpu.memory_space<vmem>>, %arg12: memref<1x3200xf32, #tpu.memory_space<vmem>>) attributes {dimension_semantics = [#tpu.dimension_semantics<parallel>], iteration_bounds = array<i64: 2>, scalar_prefetch = 0 : i64, scratch_operands = 4 : i64, tpu.core_type = #tpu.core_type<tc>, window_params = [{transform_indices = @transform_0, window_bounds = array<i64: 1, 264, 192>}, {pipeline_mode = #tpu.pipeline_mode<synchronous>, transform_indices = @transform_1, window_bounds = array<i64: 192, 32>}, {pipeline_mode = #tpu.pipeline_mode<synchronous>, transform_indices = @transform_2, window_bounds = array<i64: 1, 32>}, {pipeline_mode = #tpu.pipeline_mode<synchronous>, transform_indices = @transform_3, window_bounds = array<i64: 512, 64>}, {pipeline_mode = #tpu.pipeline_mode<synchronous>, transform_indices = @transform_4, window_bounds = array<i64: 1, 64>}, {pipeline_mode = #tpu.pipeline_mode<synchronous>, transform_indices = @transform_5, window_bounds = array<i64: 3200, 40>}, {pipeline_mode = #tpu.pipeline_mode<synchronous>, transform_indices = @transform_6, window_bounds = array<i64: 1, 40>}, {transform_indices = @transform_7, window_bounds = array<i64: 1, 1, 40>}]} {
    %c0 = arith.constant 0 : index
    %c0_0 = arith.constant 0 : index
    %c0_1 = arith.constant 0 : index
    %0 = vector.load %arg1[%c0, %c0_0, %c0_1] : memref<1x264x192xbf16, #tpu.memory_space<vmem>>, vector<1x264x192xbf16>
    %1 = vector.shape_cast %0 : vector<1x264x192xbf16> to vector<264x192xbf16>
    %c0_2 = arith.constant 0 : index
    %c0_3 = arith.constant 0 : index
    %2 = vector.load %arg2[%c0_2, %c0_3] : memref<192x32xbf16, #tpu.memory_space<vmem>>, vector<192x32xbf16>
    %cst = arith.constant dense<0.000000e+00> : vector<264x32xf32>
    %3 = tpu.matmul %1, %2, %cst {dimension_numbers = #tpu.dot_dimension_numbers<[1], [0], [0], [1], [0, 0, 1, 1], [], []>} : vector<264x192xbf16>, vector<192x32xbf16>, vector<264x32xf32> -> vector<264x32xf32>
    %c0_4 = arith.constant 0 : index
    %c0_5 = arith.constant 0 : index
    %4 = vector.load %arg3[%c0_4, %c0_5] : memref<1x32xf32, #tpu.memory_space<vmem>>, vector<1x32xf32>
    %5 = vector.broadcast %4 : vector<1x32xf32> to vector<264x32xf32>
    %6 = arith.addf %3, %5 : vector<264x32xf32>
    %cst_6 = arith.constant 0.000000e+00 : f32
    %7 = vector.broadcast %cst_6 : f32 to vector<264x32xf32>
    %8 = arith.maximumf %6, %7 : vector<264x32xf32>
    %c0_7 = arith.constant 0 : index
    %c0_8 = arith.constant 0 : index
    %9 = vector.load %arg9[%c0_7, %c0_8] : memref<272x32xf32, #tpu.memory_space<vmem>>, vector<264x32xf32>
    tpu.vector_store %arg9[%c0_7, %c0_8], %8 {strides = array<i32>} : memref<272x32xf32, #tpu.memory_space<vmem>>, vector<264x32xf32>,
    %cst_9 = arith.constant 0.000000e+00 : f32
    %10 = vector.broadcast %cst_9 : f32 to vector<8x32xf32>
    %c264 = arith.constant 264 : index
    %c0_10 = arith.constant 0 : index
    %11 = vector.load %arg9[%c264, %c0_10] : memref<272x32xf32, #tpu.memory_space<vmem>>, vector<8x32xf32>
    tpu.vector_store %arg9[%c264, %c0_10], %10 {strides = array<i32>} : memref<272x32xf32, #tpu.memory_space<vmem>>, vector<8x32xf32>,
    %c0_11 = arith.constant 0 : index
    %c0_12 = arith.constant 0 : index
    %12 = vector.load %arg9[%c0_11, %c0_12] : memref<272x32xf32, #tpu.memory_space<vmem>>, vector<55x32xf32>
    %c0_13 = arith.constant 0 : index
    %c0_14 = arith.constant 0 : index
    %13 = vector.load %arg10[%c0_13, %c0_14] : memref<55x512xf32, #tpu.memory_space<vmem>>, vector<55x32xf32>
    tpu.vector_store %arg10[%c0_13, %c0_14], %12 {strides = array<i32>} : memref<55x512xf32, #tpu.memory_space<vmem>>, vector<55x32xf32>,
    %c66 = arith.constant 66 : index
    %c0_15 = arith.constant 0 : index
    %14 = vector.load %arg9[%c66, %c0_15] : memref<272x32xf32, #tpu.memory_space<vmem>>, vector<55x32xf32>
    %c0_16 = arith.constant 0 : index
    %c32 = arith.constant 32 : index
    %15 = vector.load %arg10[%c0_16, %c32] : memref<55x512xf32, #tpu.memory_space<vmem>>, vector<55x32xf32>
    tpu.vector_store %arg10[%c0_16, %c32], %14 {strides = array<i32>} : memref<55x512xf32, #tpu.memory_space<vmem>>, vector<55x32xf32>,
    %c1 = arith.constant 1 : index
    %c0_17 = arith.constant 0 : index
    %16 = vector.load %arg9[%c1, %c0_17] : memref<272x32xf32, #tpu.memory_space<vmem>>, vector<55x32xf32>
    %c0_18 = arith.constant 0 : index
    %c64 = arith.constant 64 : index
    %17 = vector.load %arg10[%c0_18, %c64] : memref<55x512xf32, #tpu.memory_space<vmem>>, vector<55x32xf32>
    tpu.vector_store %arg10[%c0_18, %c64], %16 {strides = array<i32>} : memref<55x512xf32, #tpu.memory_space<vmem>>, vector<55x32xf32>,
    %c67 = arith.constant 67 : index
    %c0_19 = arith.constant 0 : index
    %18 = vector.load %arg9[%c67, %c0_19] : memref<272x32xf32, #tpu.memory_space<vmem>>, vector<55x32xf32>
    %c0_20 = arith.constant 0 : index
    %c96 = arith.constant 96 : index
    %19 = vector.load %arg10[%c0_20, %c96] : memref<55x512xf32, #tpu.memory_space<vmem>>, vector<55x32xf32>
    tpu.vector_store %arg10[%c0_20, %c96], %18 {strides = array<i32>} : memref<55x512xf32, #tpu.memory_space<vmem>>, vector<55x32xf32>,
    %c132 = arith.constant 132 : index
    %c0_21 = arith.constant 0 : index
    %20 = vector.load %arg9[%c132, %c0_21] : memref<272x32xf32, #tpu.memory_space<vmem>>, vector<55x32xf32>
    %c0_22 = arith.constant 0 : index
    %c128 = arith.constant 128 : index
    %21 = vector.load %arg10[%c0_22, %c128] : memref<55x512xf32, #tpu.memory_space<vmem>>, vector<55x32xf32>
    tpu.vector_store %arg10[%c0_22, %c128], %20 {strides = array<i32>} : memref<55x512xf32, #tpu.memory_space<vmem>>, vector<55x32xf32>,
    %c198 = arith.constant 198 : index
    %c0_23 = arith.constant 0 : index
    %22 = vector.load %arg9[%c198, %c0_23] : memref<272x32xf32, #tpu.memory_space<vmem>>, vector<55x32xf32>
    %c0_24 = arith.constant 0 : index
    %c160 = arith.constant 160 : index
    %23 = vector.load %arg10[%c0_24, %c160] : memref<55x512xf32, #tpu.memory_space<vmem>>, vector<55x32xf32>
    tpu.vector_store %arg10[%c0_24, %c160], %22 {strides = array<i32>} : memref<55x512xf32, #tpu.memory_space<vmem>>, vector<55x32xf32>,
    %c133 = arith.constant 133 : index
    %c0_25 = arith.constant 0 : index
    %24 = vector.load %arg9[%c133, %c0_25] : memref<272x32xf32, #tpu.memory_space<vmem>>, vector<55x32xf32>
    %c0_26 = arith.constant 0 : index
    %c192 = arith.constant 192 : index
    %25 = vector.load %arg10[%c0_26, %c192] : memref<55x512xf32, #tpu.memory_space<vmem>>, vector<55x32xf32>
    tpu.vector_store %arg10[%c0_26, %c192], %24 {strides = array<i32>} : memref<55x512xf32, #tpu.memory_space<vmem>>, vector<55x32xf32>,
    %c199 = arith.constant 199 : index
    %c0_27 = arith.constant 0 : index
    %26 = vector.load %arg9[%c199, %c0_27] : memref<272x32xf32, #tpu.memory_space<vmem>>, vector<55x32xf32>
    %c0_28 = arith.constant 0 : index
    %c224 = arith.constant 224 : index
    %27 = vector.load %arg10[%c0_28, %c224] : memref<55x512xf32, #tpu.memory_space<vmem>>, vector<55x32xf32>
    tpu.vector_store %arg10[%c0_28, %c224], %26 {strides = array<i32>} : memref<55x512xf32, #tpu.memory_space<vmem>>, vector<55x32xf32>,
    %c11 = arith.constant 11 : index
    %c0_29 = arith.constant 0 : index
    %28 = vector.load %arg9[%c11, %c0_29] : memref<272x32xf32, #tpu.memory_space<vmem>>, vector<55x32xf32>
    %c0_30 = arith.constant 0 : index
    %c256 = arith.constant 256 : index
    %29 = vector.load %arg10[%c0_30, %c256] : memref<55x512xf32, #tpu.memory_space<vmem>>, vector<55x32xf32>
    tpu.vector_store %arg10[%c0_30, %c256], %28 {strides = array<i32>} : memref<55x512xf32, #tpu.memory_space<vmem>>, vector<55x32xf32>,
    %c77 = arith.constant 77 : index
    %c0_31 = arith.constant 0 : index
    %30 = vector.load %arg9[%c77, %c0_31] : memref<272x32xf32, #tpu.memory_space<vmem>>, vector<55x32xf32>
    %c0_32 = arith.constant 0 : index
    %c288 = arith.constant 288 : index
    %31 = vector.load %arg10[%c0_32, %c288] : memref<55x512xf32, #tpu.memory_space<vmem>>, vector<55x32xf32>
    tpu.vector_store %arg10[%c0_32, %c288], %30 {strides = array<i32>} : memref<55x512xf32, #tpu.memory_space<vmem>>, vector<55x32xf32>,
    %c12 = arith.constant 12 : index
    %c0_33 = arith.constant 0 : index
    %32 = vector.load %arg9[%c12, %c0_33] : memref<272x32xf32, #tpu.memory_space<vmem>>, vector<55x32xf32>
    %c0_34 = arith.constant 0 : index
    %c320 = arith.constant 320 : index
    %33 = vector.load %arg10[%c0_34, %c320] : memref<55x512xf32, #tpu.memory_space<vmem>>, vector<55x32xf32>
    tpu.vector_store %arg10[%c0_34, %c320], %32 {strides = array<i32>} : memref<55x512xf32, #tpu.memory_space<vmem>>, vector<55x32xf32>,
    %c78 = arith.constant 78 : index
    %c0_35 = arith.constant 0 : index
    %34 = vector.load %arg9[%c78, %c0_35] : memref<272x32xf32, #tpu.memory_space<vmem>>, vector<55x32xf32>
    %c0_36 = arith.constant 0 : index
    %c352 = arith.constant 352 : index
    %35 = vector.load %arg10[%c0_36, %c352] : memref<55x512xf32, #tpu.memory_space<vmem>>, vector<55x32xf32>
    tpu.vector_store %arg10[%c0_36, %c352], %34 {strides = array<i32>} : memref<55x512xf32, #tpu.memory_space<vmem>>, vector<55x32xf32>,
    %c143 = arith.constant 143 : index
    %c0_37 = arith.constant 0 : index
    %36 = vector.load %arg9[%c143, %c0_37] : memref<272x32xf32, #tpu.memory_space<vmem>>, vector<55x32xf32>
    %c0_38 = arith.constant 0 : index
    %c384 = arith.constant 384 : index
    %37 = vector.load %arg10[%c0_38, %c384] : memref<55x512xf32, #tpu.memory_space<vmem>>, vector<55x32xf32>
    tpu.vector_store %arg10[%c0_38, %c384], %36 {strides = array<i32>} : memref<55x512xf32, #tpu.memory_space<vmem>>, vector<55x32xf32>,
    %c209 = arith.constant 209 : index
    %c0_39 = arith.constant 0 : index
    %38 = vector.load %arg9[%c209, %c0_39] : memref<272x32xf32, #tpu.memory_space<vmem>>, vector<55x32xf32>
    %c0_40 = arith.constant 0 : index
    %c416 = arith.constant 416 : index
    %39 = vector.load %arg10[%c0_40, %c416] : memref<55x512xf32, #tpu.memory_space<vmem>>, vector<55x32xf32>
    tpu.vector_store %arg10[%c0_40, %c416], %38 {strides = array<i32>} : memref<55x512xf32, #tpu.memory_space<vmem>>, vector<55x32xf32>,
    %c144 = arith.constant 144 : index
    %c0_41 = arith.constant 0 : index
    %40 = vector.load %arg9[%c144, %c0_41] : memref<272x32xf32, #tpu.memory_space<vmem>>, vector<55x32xf32>
    %c0_42 = arith.constant 0 : index
    %c448 = arith.constant 448 : index
    %41 = vector.load %arg10[%c0_42, %c448] : memref<55x512xf32, #tpu.memory_space<vmem>>, vector<55x32xf32>
    tpu.vector_store %arg10[%c0_42, %c448], %40 {strides = array<i32>} : memref<55x512xf32, #tpu.memory_space<vmem>>, vector<55x32xf32>,
    %c210 = arith.constant 210 : index
    %c0_43 = arith.constant 0 : index
    %42 = vector.load %arg9[%c210, %c0_43] : memref<272x32xf32, #tpu.memory_space<vmem>>, vector<55x32xf32>
    %c0_44 = arith.constant 0 : index
    %c480 = arith.constant 480 : index
    %43 = vector.load %arg10[%c0_44, %c480] : memref<55x512xf32, #tpu.memory_space<vmem>>, vector<55x32xf32>
    tpu.vector_store %arg10[%c0_44, %c480], %42 {strides = array<i32>} : memref<55x512xf32, #tpu.memory_space<vmem>>, vector<55x32xf32>,
    %c0_45 = arith.constant 0 : index
    %c0_46 = arith.constant 0 : index
    %44 = vector.load %arg10[%c0_45, %c0_46] : memref<55x512xf32, #tpu.memory_space<vmem>>, vector<55x512xf32>
    %45 = arith.truncf %44 : vector<55x512xf32> to vector<55x512xbf16>
    %c0_47 = arith.constant 0 : index
    %c0_48 = arith.constant 0 : index
    %46 = vector.load %arg4[%c0_47, %c0_48] : memref<512x64xbf16, #tpu.memory_space<vmem>>, vector<512x64xbf16>
    %cst_49 = arith.constant dense<0.000000e+00> : vector<55x64xf32>
    %47 = tpu.matmul %45, %46, %cst_49 {dimension_numbers = #tpu.dot_dimension_numbers<[1], [0], [0], [1], [0, 0, 1, 1], [], []>} : vector<55x512xbf16>, vector<512x64xbf16>, vector<55x64xf32> -> vector<55x64xf32>
    %c0_50 = arith.constant 0 : index
    %c0_51 = arith.constant 0 : index
    %48 = vector.load %arg5[%c0_50, %c0_51] : memref<1x64xf32, #tpu.memory_space<vmem>>, vector<1x64xf32>
    %49 = vector.broadcast %48 : vector<1x64xf32> to vector<55x64xf32>
    %50 = arith.addf %47, %49 : vector<55x64xf32>
    %cst_52 = arith.constant 0.000000e+00 : f32
    %51 = vector.broadcast %cst_52 : f32 to vector<55x64xf32>
    %52 = arith.maximumf %50, %51 : vector<55x64xf32>
    %c0_53 = arith.constant 0 : index
    %c0_54 = arith.constant 0 : index
    %53 = vector.load %arg11[%c0_53, %c0_54] : memref<55x64xf32, #tpu.memory_space<vmem>>, vector<55x64xf32>
    tpu.vector_store %arg11[%c0_53, %c0_54], %52 {strides = array<i32>} : memref<55x64xf32, #tpu.memory_space<vmem>>, vector<55x64xf32>,
    %c0_55 = arith.constant 0 : index
    %c0_56 = arith.constant 0 : index
    %54 = vector.load %arg11[%c0_55, %c0_56] : memref<55x64xf32, #tpu.memory_space<vmem>>, vector<1x64xf32>
    %55 = vector.shape_cast %54 : vector<1x64xf32> to vector<64xf32>
    %c0_57 = arith.constant 0 : index
    %c0_58 = arith.constant 0 : index
    %56 = vector.load %arg12[%c0_57, %c0_58] : memref<1x3200xf32, #tpu.memory_space<vmem>>, vector<1x64xf32>
    %57 = vector.shape_cast %56 : vector<1x64xf32> to vector<64xf32>
    %58 = vector.shape_cast %55 : vector<64xf32> to vector<1x64xf32>
    tpu.vector_store %arg12[%c0_57, %c0_58], %58 {strides = array<i32>} : memref<1x3200xf32, #tpu.memory_space<vmem>>, vector<1x64xf32>,
    %c1_59 = arith.constant 1 : index
    %c0_60 = arith.constant 0 : index
    %59 = vector.load %arg11[%c1_59, %c0_60] : memref<55x64xf32, #tpu.memory_space<vmem>>, vector<1x64xf32>
    %60 = vector.shape_cast %59 : vector<1x64xf32> to vector<64xf32>
    %c0_61 = arith.constant 0 : index
    %c64_62 = arith.constant 64 : index
    %61 = vector.load %arg12[%c0_61, %c64_62] : memref<1x3200xf32, #tpu.memory_space<vmem>>, vector<1x64xf32>
    %62 = vector.shape_cast %61 : vector<1x64xf32> to vector<64xf32>
    %63 = vector.shape_cast %60 : vector<64xf32> to vector<1x64xf32>
    tpu.vector_store %arg12[%c0_61, %c64_62], %63 {strides = array<i32>} : memref<1x3200xf32, #tpu.memory_space<vmem>>, vector<1x64xf32>,
    %c2 = arith.constant 2 : index
    %c0_63 = arith.constant 0 : index
    %64 = vector.load %arg11[%c2, %c0_63] : memref<55x64xf32, #tpu.memory_space<vmem>>, vector<1x64xf32>
    %65 = vector.shape_cast %64 : vector<1x64xf32> to vector<64xf32>
    %c0_64 = arith.constant 0 : index
    %c128_65 = arith.constant 128 : index
    %66 = vector.load %arg12[%c0_64, %c128_65] : memref<1x3200xf32, #tpu.memory_space<vmem>>, vector<1x64xf32>
    %67 = vector.shape_cast %66 : vector<1x64xf32> to vector<64xf32>
    %68 = vector.shape_cast %65 : vector<64xf32> to vector<1x64xf32>
    tpu.vector_store %arg12[%c0_64, %c128_65], %68 {strides = array<i32>} : memref<1x3200xf32, #tpu.memory_space<vmem>>, vector<1x64xf32>,
    %c3 = arith.constant 3 : index
    %c0_66 = arith.constant 0 : index
    %69 = vector.load %arg11[%c3, %c0_66] : memref<55x64xf32, #tpu.memory_space<vmem>>, vector<1x64xf32>
    %70 = vector.shape_cast %69 : vector<1x64xf32> to vector<64xf32>
    %c0_67 = arith.constant 0 : index
    %c192_68 = arith.constant 192 : index
    %71 = vector.load %arg12[%c0_67, %c192_68] : memref<1x3200xf32, #tpu.memory_space<vmem>>, vector<1x64xf32>
    %72 = vector.shape_cast %71 : vector<1x64xf32> to vector<64xf32>
    %73 = vector.shape_cast %70 : vector<64xf32> to vector<1x64xf32>
    tpu.vector_store %arg12[%c0_67, %c192_68], %73 {strides = array<i32>} : memref<1x3200xf32, #tpu.memory_space<vmem>>, vector<1x64xf32>,
    %c4 = arith.constant 4 : index
    %c0_69 = arith.constant 0 : index
    %74 = vector.load %arg11[%c4, %c0_69] : memref<55x64xf32, #tpu.memory_space<vmem>>, vector<1x64xf32>
    %75 = vector.shape_cast %74 : vector<1x64xf32> to vector<64xf32>
    %c0_70 = arith.constant 0 : index
    %c256_71 = arith.constant 256 : index
    %76 = vector.load %arg12[%c0_70, %c256_71] : memref<1x3200xf32, #tpu.memory_space<vmem>>, vector<1x64xf32>
    %77 = vector.shape_cast %76 : vector<1x64xf32> to vector<64xf32>
    %78 = vector.shape_cast %75 : vector<64xf32> to vector<1x64xf32>
    tpu.vector_store %arg12[%c0_70, %c256_71], %78 {strides = array<i32>} : memref<1x3200xf32, #tpu.memory_space<vmem>>, vector<1x64xf32>,
    %c5 = arith.constant 5 : index
    %c0_72 = arith.constant 0 : index
    %79 = vector.load %arg11[%c5, %c0_72] : memref<55x64xf32, #tpu.memory_space<vmem>>, vector<1x64xf32>
    %80 = vector.shape_cast %79 : vector<1x64xf32> to vector<64xf32>
    %c0_73 = arith.constant 0 : index
    %c320_74 = arith.constant 320 : index
    %81 = vector.load %arg12[%c0_73, %c320_74] : memref<1x3200xf32, #tpu.memory_space<vmem>>, vector<1x64xf32>
    %82 = vector.shape_cast %81 : vector<1x64xf32> to vector<64xf32>
    %83 = vector.shape_cast %80 : vector<64xf32> to vector<1x64xf32>
    tpu.vector_store %arg12[%c0_73, %c320_74], %83 {strides = array<i32>} : memref<1x3200xf32, #tpu.memory_space<vmem>>, vector<1x64xf32>,
    %c6 = arith.constant 6 : index
    %c0_75 = arith.constant 0 : index
    %84 = vector.load %arg11[%c6, %c0_75] : memref<55x64xf32, #tpu.memory_space<vmem>>, vector<1x64xf32>
    %85 = vector.shape_cast %84 : vector<1x64xf32> to vector<64xf32>
    %c0_76 = arith.constant 0 : index
    %c384_77 = arith.constant 384 : index
    %86 = vector.load %arg12[%c0_76, %c384_77] : memref<1x3200xf32, #tpu.memory_space<vmem>>, vector<1x64xf32>
    %87 = vector.shape_cast %86 : vector<1x64xf32> to vector<64xf32>
    %88 = vector.shape_cast %85 : vector<64xf32> to vector<1x64xf32>
    tpu.vector_store %arg12[%c0_76, %c384_77], %88 {strides = array<i32>} : memref<1x3200xf32, #tpu.memory_space<vmem>>, vector<1x64xf32>,
    %c7 = arith.constant 7 : index
    %c0_78 = arith.constant 0 : index
    %89 = vector.load %arg11[%c7, %c0_78] : memref<55x64xf32, #tpu.memory_space<vmem>>, vector<1x64xf32>
    %90 = vector.shape_cast %89 : vector<1x64xf32> to vector<64xf32>
    %c0_79 = arith.constant 0 : index
    %c448_80 = arith.constant 448 : index
    %91 = vector.load %arg12[%c0_79, %c448_80] : memref<1x3200xf32, #tpu.memory_space<vmem>>, vector<1x64xf32>
    %92 = vector.shape_cast %91 : vector<1x64xf32> to vector<64xf32>
    %93 = vector.shape_cast %90 : vector<64xf32> to vector<1x64xf32>
    tpu.vector_store %arg12[%c0_79, %c448_80], %93 {strides = array<i32>} : memref<1x3200xf32, #tpu.memory_space<vmem>>, vector<1x64xf32>,
    %c8 = arith.constant 8 : index
    %c0_81 = arith.constant 0 : index
    %94 = vector.load %arg11[%c8, %c0_81] : memref<55x64xf32, #tpu.memory_space<vmem>>, vector<1x64xf32>
    %95 = vector.shape_cast %94 : vector<1x64xf32> to vector<64xf32>
    %c0_82 = arith.constant 0 : index
    %c512 = arith.constant 512 : index
    %96 = vector.load %arg12[%c0_82, %c512] : memref<1x3200xf32, #tpu.memory_space<vmem>>, vector<1x64xf32>
    %97 = vector.shape_cast %96 : vector<1x64xf32> to vector<64xf32>
    %98 = vector.shape_cast %95 : vector<64xf32> to vector<1x64xf32>
    tpu.vector_store %arg12[%c0_82, %c512], %98 {strides = array<i32>} : memref<1x3200xf32, #tpu.memory_space<vmem>>, vector<1x64xf32>,
    %c9 = arith.constant 9 : index
    %c0_83 = arith.constant 0 : index
    %99 = vector.load %arg11[%c9, %c0_83] : memref<55x64xf32, #tpu.memory_space<vmem>>, vector<1x64xf32>
    %100 = vector.shape_cast %99 : vector<1x64xf32> to vector<64xf32>
    %c0_84 = arith.constant 0 : index
    %c576 = arith.constant 576 : index
    %101 = vector.load %arg12[%c0_84, %c576] : memref<1x3200xf32, #tpu.memory_space<vmem>>, vector<1x64xf32>
    %102 = vector.shape_cast %101 : vector<1x64xf32> to vector<64xf32>
    %103 = vector.shape_cast %100 : vector<64xf32> to vector<1x64xf32>
    tpu.vector_store %arg12[%c0_84, %c576], %103 {strides = array<i32>} : memref<1x3200xf32, #tpu.memory_space<vmem>>, vector<1x64xf32>,
    %c11_85 = arith.constant 11 : index
    %c0_86 = arith.constant 0 : index
    %104 = vector.load %arg11[%c11_85, %c0_86] : memref<55x64xf32, #tpu.memory_space<vmem>>, vector<1x64xf32>
    %105 = vector.shape_cast %104 : vector<1x64xf32> to vector<64xf32>
    %c0_87 = arith.constant 0 : index
    %c640 = arith.constant 640 : index
    %106 = vector.load %arg12[%c0_87, %c640] : memref<1x3200xf32, #tpu.memory_space<vmem>>, vector<1x64xf32>
    %107 = vector.shape_cast %106 : vector<1x64xf32> to vector<64xf32>
    %108 = vector.shape_cast %105 : vector<64xf32> to vector<1x64xf32>
    tpu.vector_store %arg12[%c0_87, %c640], %108 {strides = array<i32>} : memref<1x3200xf32, #tpu.memory_space<vmem>>, vector<1x64xf32>,
    %c12_88 = arith.constant 12 : index
    %c0_89 = arith.constant 0 : index
    %109 = vector.load %arg11[%c12_88, %c0_89] : memref<55x64xf32, #tpu.memory_space<vmem>>, vector<1x64xf32>
    %110 = vector.shape_cast %109 : vector<1x64xf32> to vector<64xf32>
    %c0_90 = arith.constant 0 : index
    %c704 = arith.constant 704 : index
    %111 = vector.load %arg12[%c0_90, %c704] : memref<1x3200xf32, #tpu.memory_space<vmem>>, vector<1x64xf32>
    %112 = vector.shape_cast %111 : vector<1x64xf32> to vector<64xf32>
    %113 = vector.shape_cast %110 : vector<64xf32> to vector<1x64xf32>
    tpu.vector_store %arg12[%c0_90, %c704], %113 {strides = array<i32>} : memref<1x3200xf32, #tpu.memory_space<vmem>>, vector<1x64xf32>,
    %c13 = arith.constant 13 : index
    %c0_91 = arith.constant 0 : index
    %114 = vector.load %arg11[%c13, %c0_91] : memref<55x64xf32, #tpu.memory_space<vmem>>, vector<1x64xf32>
    %115 = vector.shape_cast %114 : vector<1x64xf32> to vector<64xf32>
    %c0_92 = arith.constant 0 : index
    %c768 = arith.constant 768 : index
    %116 = vector.load %arg12[%c0_92, %c768] : memref<1x3200xf32, #tpu.memory_space<vmem>>, vector<1x64xf32>
    %117 = vector.shape_cast %116 : vector<1x64xf32> to vector<64xf32>
    %118 = vector.shape_cast %115 : vector<64xf32> to vector<1x64xf32>
    tpu.vector_store %arg12[%c0_92, %c768], %118 {strides = array<i32>} : memref<1x3200xf32, #tpu.memory_space<vmem>>, vector<1x64xf32>,
    %c14 = arith.constant 14 : index
    %c0_93 = arith.constant 0 : index
    %119 = vector.load %arg11[%c14, %c0_93] : memref<55x64xf32, #tpu.memory_space<vmem>>, vector<1x64xf32>
    %120 = vector.shape_cast %119 : vector<1x64xf32> to vector<64xf32>
    %c0_94 = arith.constant 0 : index
    %c832 = arith.constant 832 : index
    %121 = vector.load %arg12[%c0_94, %c832] : memref<1x3200xf32, #tpu.memory_space<vmem>>, vector<1x64xf32>
    %122 = vector.shape_cast %121 : vector<1x64xf32> to vector<64xf32>
    %123 = vector.shape_cast %120 : vector<64xf32> to vector<1x64xf32>
    tpu.vector_store %arg12[%c0_94, %c832], %123 {strides = array<i32>} : memref<1x3200xf32, #tpu.memory_space<vmem>>, vector<1x64xf32>,
    %c15 = arith.constant 15 : index
    %c0_95 = arith.constant 0 : index
    %124 = vector.load %arg11[%c15, %c0_95] : memref<55x64xf32, #tpu.memory_space<vmem>>, vector<1x64xf32>
    %125 = vector.shape_cast %124 : vector<1x64xf32> to vector<64xf32>
    %c0_96 = arith.constant 0 : index
    %c896 = arith.constant 896 : index
    %126 = vector.load %arg12[%c0_96, %c896] : memref<1x3200xf32, #tpu.memory_space<vmem>>, vector<1x64xf32>
    %127 = vector.shape_cast %126 : vector<1x64xf32> to vector<64xf32>
    %128 = vector.shape_cast %125 : vector<64xf32> to vector<1x64xf32>
    tpu.vector_store %arg12[%c0_96, %c896], %128 {strides = array<i32>} : memref<1x3200xf32, #tpu.memory_space<vmem>>, vector<1x64xf32>,
    %c16 = arith.constant 16 : index
    %c0_97 = arith.constant 0 : index
    %129 = vector.load %arg11[%c16, %c0_97] : memref<55x64xf32, #tpu.memory_space<vmem>>, vector<1x64xf32>
    %130 = vector.shape_cast %129 : vector<1x64xf32> to vector<64xf32>
    %c0_98 = arith.constant 0 : index
    %c960 = arith.constant 960 : index
    %131 = vector.load %arg12[%c0_98, %c960] : memref<1x3200xf32, #tpu.memory_space<vmem>>, vector<1x64xf32>
    %132 = vector.shape_cast %131 : vector<1x64xf32> to vector<64xf32>
    %133 = vector.shape_cast %130 : vector<64xf32> to vector<1x64xf32>
    tpu.vector_store %arg12[%c0_98, %c960], %133 {strides = array<i32>} : memref<1x3200xf32, #tpu.memory_space<vmem>>, vector<1x64xf32>,
    %c17 = arith.constant 17 : index
    %c0_99 = arith.constant 0 : index
    %134 = vector.load %arg11[%c17, %c0_99] : memref<55x64xf32, #tpu.memory_space<vmem>>, vector<1x64xf32>
    %135 = vector.shape_cast %134 : vector<1x64xf32> to vector<64xf32>
    %c0_100 = arith.constant 0 : index
    %c1024 = arith.constant 1024 : index
    %136 = vector.load %arg12[%c0_100, %c1024] : memref<1x3200xf32, #tpu.memory_space<vmem>>, vector<1x64xf32>
    %137 = vector.shape_cast %136 : vector<1x64xf32> to vector<64xf32>
    %138 = vector.shape_cast %135 : vector<64xf32> to vector<1x64xf32>
    tpu.vector_store %arg12[%c0_100, %c1024], %138 {strides = array<i32>} : memref<1x3200xf32, #tpu.memory_space<vmem>>, vector<1x64xf32>,
    %c18 = arith.constant 18 : index
    %c0_101 = arith.constant 0 : index
    %139 = vector.load %arg11[%c18, %c0_101] : memref<55x64xf32, #tpu.memory_space<vmem>>, vector<1x64xf32>
    %140 = vector.shape_cast %139 : vector<1x64xf32> to vector<64xf32>
    %c0_102 = arith.constant 0 : index
    %c1088 = arith.constant 1088 : index
    %141 = vector.load %arg12[%c0_102, %c1088] : memref<1x3200xf32, #tpu.memory_space<vmem>>, vector<1x64xf32>
    %142 = vector.shape_cast %141 : vector<1x64xf32> to vector<64xf32>
    %143 = vector.shape_cast %140 : vector<64xf32> to vector<1x64xf32>
    tpu.vector_store %arg12[%c0_102, %c1088], %143 {strides = array<i32>} : memref<1x3200xf32, #tpu.memory_space<vmem>>, vector<1x64xf32>,
    %c19 = arith.constant 19 : index
    %c0_103 = arith.constant 0 : index
    %144 = vector.load %arg11[%c19, %c0_103] : memref<55x64xf32, #tpu.memory_space<vmem>>, vector<1x64xf32>
    %145 = vector.shape_cast %144 : vector<1x64xf32> to vector<64xf32>
    %c0_104 = arith.constant 0 : index
    %c1152 = arith.constant 1152 : index
    %146 = vector.load %arg12[%c0_104, %c1152] : memref<1x3200xf32, #tpu.memory_space<vmem>>, vector<1x64xf32>
    %147 = vector.shape_cast %146 : vector<1x64xf32> to vector<64xf32>
    %148 = vector.shape_cast %145 : vector<64xf32> to vector<1x64xf32>
    tpu.vector_store %arg12[%c0_104, %c1152], %148 {strides = array<i32>} : memref<1x3200xf32, #tpu.memory_space<vmem>>, vector<1x64xf32>,
    %c20 = arith.constant 20 : index
    %c0_105 = arith.constant 0 : index
    %149 = vector.load %arg11[%c20, %c0_105] : memref<55x64xf32, #tpu.memory_space<vmem>>, vector<1x64xf32>
    %150 = vector.shape_cast %149 : vector<1x64xf32> to vector<64xf32>
    %c0_106 = arith.constant 0 : index
    %c1216 = arith.constant 1216 : index
    %151 = vector.load %arg12[%c0_106, %c1216] : memref<1x3200xf32, #tpu.memory_space<vmem>>, vector<1x64xf32>
    %152 = vector.shape_cast %151 : vector<1x64xf32> to vector<64xf32>
    %153 = vector.shape_cast %150 : vector<64xf32> to vector<1x64xf32>
    tpu.vector_store %arg12[%c0_106, %c1216], %153 {strides = array<i32>} : memref<1x3200xf32, #tpu.memory_space<vmem>>, vector<1x64xf32>,
    %c22 = arith.constant 22 : index
    %c0_107 = arith.constant 0 : index
    %154 = vector.load %arg11[%c22, %c0_107] : memref<55x64xf32, #tpu.memory_space<vmem>>, vector<1x64xf32>
    %155 = vector.shape_cast %154 : vector<1x64xf32> to vector<64xf32>
    %c0_108 = arith.constant 0 : index
    %c1280 = arith.constant 1280 : index
    %156 = vector.load %arg12[%c0_108, %c1280] : memref<1x3200xf32, #tpu.memory_space<vmem>>, vector<1x64xf32>
    %157 = vector.shape_cast %156 : vector<1x64xf32> to vector<64xf32>
    %158 = vector.shape_cast %155 : vector<64xf32> to vector<1x64xf32>
    tpu.vector_store %arg12[%c0_108, %c1280], %158 {strides = array<i32>} : memref<1x3200xf32, #tpu.memory_space<vmem>>, vector<1x64xf32>,
    %c23 = arith.constant 23 : index
    %c0_109 = arith.constant 0 : index
    %159 = vector.load %arg11[%c23, %c0_109] : memref<55x64xf32, #tpu.memory_space<vmem>>, vector<1x64xf32>
    %160 = vector.shape_cast %159 : vector<1x64xf32> to vector<64xf32>
    %c0_110 = arith.constant 0 : index
    %c1344 = arith.constant 1344 : index
    %161 = vector.load %arg12[%c0_110, %c1344] : memref<1x3200xf32, #tpu.memory_space<vmem>>, vector<1x64xf32>
    %162 = vector.shape_cast %161 : vector<1x64xf32> to vector<64xf32>
    %163 = vector.shape_cast %160 : vector<64xf32> to vector<1x64xf32>
    tpu.vector_store %arg12[%c0_110, %c1344], %163 {strides = array<i32>} : memref<1x3200xf32, #tpu.memory_space<vmem>>, vector<1x64xf32>,
    %c24 = arith.constant 24 : index
    %c0_111 = arith.constant 0 : index
    %164 = vector.load %arg11[%c24, %c0_111] : memref<55x64xf32, #tpu.memory_space<vmem>>, vector<1x64xf32>
    %165 = vector.shape_cast %164 : vector<1x64xf32> to vector<64xf32>
    %c0_112 = arith.constant 0 : index
    %c1408 = arith.constant 1408 : index
    %166 = vector.load %arg12[%c0_112, %c1408] : memref<1x3200xf32, #tpu.memory_space<vmem>>, vector<1x64xf32>
    %167 = vector.shape_cast %166 : vector<1x64xf32> to vector<64xf32>
    %168 = vector.shape_cast %165 : vector<64xf32> to vector<1x64xf32>
    tpu.vector_store %arg12[%c0_112, %c1408], %168 {strides = array<i32>} : memref<1x3200xf32, #tpu.memory_space<vmem>>, vector<1x64xf32>,
    %c25 = arith.constant 25 : index
    %c0_113 = arith.constant 0 : index
    %169 = vector.load %arg11[%c25, %c0_113] : memref<55x64xf32, #tpu.memory_space<vmem>>, vector<1x64xf32>
    %170 = vector.shape_cast %169 : vector<1x64xf32> to vector<64xf32>
    %c0_114 = arith.constant 0 : index
    %c1472 = arith.constant 1472 : index
    %171 = vector.load %arg12[%c0_114, %c1472] : memref<1x3200xf32, #tpu.memory_space<vmem>>, vector<1x64xf32>
    %172 = vector.shape_cast %171 : vector<1x64xf32> to vector<64xf32>
    %173 = vector.shape_cast %170 : vector<64xf32> to vector<1x64xf32>
    tpu.vector_store %arg12[%c0_114, %c1472], %173 {strides = array<i32>} : memref<1x3200xf32, #tpu.memory_space<vmem>>, vector<1x64xf32>,
    %c26 = arith.constant 26 : index
    %c0_115 = arith.constant 0 : index
    %174 = vector.load %arg11[%c26, %c0_115] : memref<55x64xf32, #tpu.memory_space<vmem>>, vector<1x64xf32>
    %175 = vector.shape_cast %174 : vector<1x64xf32> to vector<64xf32>
    %c0_116 = arith.constant 0 : index
    %c1536 = arith.constant 1536 : index
    %176 = vector.load %arg12[%c0_116, %c1536] : memref<1x3200xf32, #tpu.memory_space<vmem>>, vector<1x64xf32>
    %177 = vector.shape_cast %176 : vector<1x64xf32> to vector<64xf32>
    %178 = vector.shape_cast %175 : vector<64xf32> to vector<1x64xf32>
    tpu.vector_store %arg12[%c0_116, %c1536], %178 {strides = array<i32>} : memref<1x3200xf32, #tpu.memory_space<vmem>>, vector<1x64xf32>,
    %c27 = arith.constant 27 : index
    %c0_117 = arith.constant 0 : index
    %179 = vector.load %arg11[%c27, %c0_117] : memref<55x64xf32, #tpu.memory_space<vmem>>, vector<1x64xf32>
    %180 = vector.shape_cast %179 : vector<1x64xf32> to vector<64xf32>
    %c0_118 = arith.constant 0 : index
    %c1600 = arith.constant 1600 : index
    %181 = vector.load %arg12[%c0_118, %c1600] : memref<1x3200xf32, #tpu.memory_space<vmem>>, vector<1x64xf32>
    %182 = vector.shape_cast %181 : vector<1x64xf32> to vector<64xf32>
    %183 = vector.shape_cast %180 : vector<64xf32> to vector<1x64xf32>
    tpu.vector_store %arg12[%c0_118, %c1600], %183 {strides = array<i32>} : memref<1x3200xf32, #tpu.memory_space<vmem>>, vector<1x64xf32>,
    %c28 = arith.constant 28 : index
    %c0_119 = arith.constant 0 : index
    %184 = vector.load %arg11[%c28, %c0_119] : memref<55x64xf32, #tpu.memory_space<vmem>>, vector<1x64xf32>
    %185 = vector.shape_cast %184 : vector<1x64xf32> to vector<64xf32>
    %c0_120 = arith.constant 0 : index
    %c1664 = arith.constant 1664 : index
    %186 = vector.load %arg12[%c0_120, %c1664] : memref<1x3200xf32, #tpu.memory_space<vmem>>, vector<1x64xf32>
    %187 = vector.shape_cast %186 : vector<1x64xf32> to vector<64xf32>
    %188 = vector.shape_cast %185 : vector<64xf32> to vector<1x64xf32>
    tpu.vector_store %arg12[%c0_120, %c1664], %188 {strides = array<i32>} : memref<1x3200xf32, #tpu.memory_space<vmem>>, vector<1x64xf32>,
    %c29 = arith.constant 29 : index
    %c0_121 = arith.constant 0 : index
    %189 = vector.load %arg11[%c29, %c0_121] : memref<55x64xf32, #tpu.memory_space<vmem>>, vector<1x64xf32>
    %190 = vector.shape_cast %189 : vector<1x64xf32> to vector<64xf32>
    %c0_122 = arith.constant 0 : index
    %c1728 = arith.constant 1728 : index
    %191 = vector.load %arg12[%c0_122, %c1728] : memref<1x3200xf32, #tpu.memory_space<vmem>>, vector<1x64xf32>
    %192 = vector.shape_cast %191 : vector<1x64xf32> to vector<64xf32>
    %193 = vector.shape_cast %190 : vector<64xf32> to vector<1x64xf32>
    tpu.vector_store %arg12[%c0_122, %c1728], %193 {strides = array<i32>} : memref<1x3200xf32, #tpu.memory_space<vmem>>, vector<1x64xf32>,
    %c30 = arith.constant 30 : index
    %c0_123 = arith.constant 0 : index
    %194 = vector.load %arg11[%c30, %c0_123] : memref<55x64xf32, #tpu.memory_space<vmem>>, vector<1x64xf32>
    %195 = vector.shape_cast %194 : vector<1x64xf32> to vector<64xf32>
    %c0_124 = arith.constant 0 : index
    %c1792 = arith.constant 1792 : index
    %196 = vector.load %arg12[%c0_124, %c1792] : memref<1x3200xf32, #tpu.memory_space<vmem>>, vector<1x64xf32>
    %197 = vector.shape_cast %196 : vector<1x64xf32> to vector<64xf32>
    %198 = vector.shape_cast %195 : vector<64xf32> to vector<1x64xf32>
    tpu.vector_store %arg12[%c0_124, %c1792], %198 {strides = array<i32>} : memref<1x3200xf32, #tpu.memory_space<vmem>>, vector<1x64xf32>,
    %c31 = arith.constant 31 : index
    %c0_125 = arith.constant 0 : index
    %199 = vector.load %arg11[%c31, %c0_125] : memref<55x64xf32, #tpu.memory_space<vmem>>, vector<1x64xf32>
    %200 = vector.shape_cast %199 : vector<1x64xf32> to vector<64xf32>
    %c0_126 = arith.constant 0 : index
    %c1856 = arith.constant 1856 : index
    %201 = vector.load %arg12[%c0_126, %c1856] : memref<1x3200xf32, #tpu.memory_space<vmem>>, vector<1x64xf32>
    %202 = vector.shape_cast %201 : vector<1x64xf32> to vector<64xf32>
    %203 = vector.shape_cast %200 : vector<64xf32> to vector<1x64xf32>
    tpu.vector_store %arg12[%c0_126, %c1856], %203 {strides = array<i32>} : memref<1x3200xf32, #tpu.memory_space<vmem>>, vector<1x64xf32>,
    %c33 = arith.constant 33 : index
    %c0_127 = arith.constant 0 : index
    %204 = vector.load %arg11[%c33, %c0_127] : memref<55x64xf32, #tpu.memory_space<vmem>>, vector<1x64xf32>
    %205 = vector.shape_cast %204 : vector<1x64xf32> to vector<64xf32>
    %c0_128 = arith.constant 0 : index
    %c1920 = arith.constant 1920 : index
    %206 = vector.load %arg12[%c0_128, %c1920] : memref<1x3200xf32, #tpu.memory_space<vmem>>, vector<1x64xf32>
    %207 = vector.shape_cast %206 : vector<1x64xf32> to vector<64xf32>
    %208 = vector.shape_cast %205 : vector<64xf32> to vector<1x64xf32>
    tpu.vector_store %arg12[%c0_128, %c1920], %208 {strides = array<i32>} : memref<1x3200xf32, #tpu.memory_space<vmem>>, vector<1x64xf32>,
    %c34 = arith.constant 34 : index
    %c0_129 = arith.constant 0 : index
    %209 = vector.load %arg11[%c34, %c0_129] : memref<55x64xf32, #tpu.memory_space<vmem>>, vector<1x64xf32>
    %210 = vector.shape_cast %209 : vector<1x64xf32> to vector<64xf32>
    %c0_130 = arith.constant 0 : index
    %c1984 = arith.constant 1984 : index
    %211 = vector.load %arg12[%c0_130, %c1984] : memref<1x3200xf32, #tpu.memory_space<vmem>>, vector<1x64xf32>
    %212 = vector.shape_cast %211 : vector<1x64xf32> to vector<64xf32>
    %213 = vector.shape_cast %210 : vector<64xf32> to vector<1x64xf32>
    tpu.vector_store %arg12[%c0_130, %c1984], %213 {strides = array<i32>} : memref<1x3200xf32, #tpu.memory_space<vmem>>, vector<1x64xf32>,
    %c35 = arith.constant 35 : index
    %c0_131 = arith.constant 0 : index
    %214 = vector.load %arg11[%c35, %c0_131] : memref<55x64xf32, #tpu.memory_space<vmem>>, vector<1x64xf32>
    %215 = vector.shape_cast %214 : vector<1x64xf32> to vector<64xf32>
    %c0_132 = arith.constant 0 : index
    %c2048 = arith.constant 2048 : index
    %216 = vector.load %arg12[%c0_132, %c2048] : memref<1x3200xf32, #tpu.memory_space<vmem>>, vector<1x64xf32>
    %217 = vector.shape_cast %216 : vector<1x64xf32> to vector<64xf32>
    %218 = vector.shape_cast %215 : vector<64xf32> to vector<1x64xf32>
    tpu.vector_store %arg12[%c0_132, %c2048], %218 {strides = array<i32>} : memref<1x3200xf32, #tpu.memory_space<vmem>>, vector<1x64xf32>,
    %c36 = arith.constant 36 : index
    %c0_133 = arith.constant 0 : index
    %219 = vector.load %arg11[%c36, %c0_133] : memref<55x64xf32, #tpu.memory_space<vmem>>, vector<1x64xf32>
    %220 = vector.shape_cast %219 : vector<1x64xf32> to vector<64xf32>
    %c0_134 = arith.constant 0 : index
    %c2112 = arith.constant 2112 : index
    %221 = vector.load %arg12[%c0_134, %c2112] : memref<1x3200xf32, #tpu.memory_space<vmem>>, vector<1x64xf32>
    %222 = vector.shape_cast %221 : vector<1x64xf32> to vector<64xf32>
    %223 = vector.shape_cast %220 : vector<64xf32> to vector<1x64xf32>
    tpu.vector_store %arg12[%c0_134, %c2112], %223 {strides = array<i32>} : memref<1x3200xf32, #tpu.memory_space<vmem>>, vector<1x64xf32>,
    %c37 = arith.constant 37 : index
    %c0_135 = arith.constant 0 : index
    %224 = vector.load %arg11[%c37, %c0_135] : memref<55x64xf32, #tpu.memory_space<vmem>>, vector<1x64xf32>
    %225 = vector.shape_cast %224 : vector<1x64xf32> to vector<64xf32>
    %c0_136 = arith.constant 0 : index
    %c2176 = arith.constant 2176 : index
    %226 = vector.load %arg12[%c0_136, %c2176] : memref<1x3200xf32, #tpu.memory_space<vmem>>, vector<1x64xf32>
    %227 = vector.shape_cast %226 : vector<1x64xf32> to vector<64xf32>
    %228 = vector.shape_cast %225 : vector<64xf32> to vector<1x64xf32>
    tpu.vector_store %arg12[%c0_136, %c2176], %228 {strides = array<i32>} : memref<1x3200xf32, #tpu.memory_space<vmem>>, vector<1x64xf32>,
    %c38 = arith.constant 38 : index
    %c0_137 = arith.constant 0 : index
    %229 = vector.load %arg11[%c38, %c0_137] : memref<55x64xf32, #tpu.memory_space<vmem>>, vector<1x64xf32>
    %230 = vector.shape_cast %229 : vector<1x64xf32> to vector<64xf32>
    %c0_138 = arith.constant 0 : index
    %c2240 = arith.constant 2240 : index
    %231 = vector.load %arg12[%c0_138, %c2240] : memref<1x3200xf32, #tpu.memory_space<vmem>>, vector<1x64xf32>
    %232 = vector.shape_cast %231 : vector<1x64xf32> to vector<64xf32>
    %233 = vector.shape_cast %230 : vector<64xf32> to vector<1x64xf32>
    tpu.vector_store %arg12[%c0_138, %c2240], %233 {strides = array<i32>} : memref<1x3200xf32, #tpu.memory_space<vmem>>, vector<1x64xf32>,
    %c39 = arith.constant 39 : index
    %c0_139 = arith.constant 0 : index
    %234 = vector.load %arg11[%c39, %c0_139] : memref<55x64xf32, #tpu.memory_space<vmem>>, vector<1x64xf32>
    %235 = vector.shape_cast %234 : vector<1x64xf32> to vector<64xf32>
    %c0_140 = arith.constant 0 : index
    %c2304 = arith.constant 2304 : index
    %236 = vector.load %arg12[%c0_140, %c2304] : memref<1x3200xf32, #tpu.memory_space<vmem>>, vector<1x64xf32>
    %237 = vector.shape_cast %236 : vector<1x64xf32> to vector<64xf32>
    %238 = vector.shape_cast %235 : vector<64xf32> to vector<1x64xf32>
    tpu.vector_store %arg12[%c0_140, %c2304], %238 {strides = array<i32>} : memref<1x3200xf32, #tpu.memory_space<vmem>>, vector<1x64xf32>,
    %c40 = arith.constant 40 : index
    %c0_141 = arith.constant 0 : index
    %239 = vector.load %arg11[%c40, %c0_141] : memref<55x64xf32, #tpu.memory_space<vmem>>, vector<1x64xf32>
    %240 = vector.shape_cast %239 : vector<1x64xf32> to vector<64xf32>
    %c0_142 = arith.constant 0 : index
    %c2368 = arith.constant 2368 : index
    %241 = vector.load %arg12[%c0_142, %c2368] : memref<1x3200xf32, #tpu.memory_space<vmem>>, vector<1x64xf32>
    %242 = vector.shape_cast %241 : vector<1x64xf32> to vector<64xf32>
    %243 = vector.shape_cast %240 : vector<64xf32> to vector<1x64xf32>
    tpu.vector_store %arg12[%c0_142, %c2368], %243 {strides = array<i32>} : memref<1x3200xf32, #tpu.memory_space<vmem>>, vector<1x64xf32>,
    %c41 = arith.constant 41 : index
    %c0_143 = arith.constant 0 : index
    %244 = vector.load %arg11[%c41, %c0_143] : memref<55x64xf32, #tpu.memory_space<vmem>>, vector<1x64xf32>
    %245 = vector.shape_cast %244 : vector<1x64xf32> to vector<64xf32>
    %c0_144 = arith.constant 0 : index
    %c2432 = arith.constant 2432 : index
    %246 = vector.load %arg12[%c0_144, %c2432] : memref<1x3200xf32, #tpu.memory_space<vmem>>, vector<1x64xf32>
    %247 = vector.shape_cast %246 : vector<1x64xf32> to vector<64xf32>
    %248 = vector.shape_cast %245 : vector<64xf32> to vector<1x64xf32>
    tpu.vector_store %arg12[%c0_144, %c2432], %248 {strides = array<i32>} : memref<1x3200xf32, #tpu.memory_space<vmem>>, vector<1x64xf32>,
    %c42 = arith.constant 42 : index
    %c0_145 = arith.constant 0 : index
    %249 = vector.load %arg11[%c42, %c0_145] : memref<55x64xf32, #tpu.memory_space<vmem>>, vector<1x64xf32>
    %250 = vector.shape_cast %249 : vector<1x64xf32> to vector<64xf32>
    %c0_146 = arith.constant 0 : index
    %c2496 = arith.constant 2496 : index
    %251 = vector.load %arg12[%c0_146, %c2496] : memref<1x3200xf32, #tpu.memory_space<vmem>>, vector<1x64xf32>
    %252 = vector.shape_cast %251 : vector<1x64xf32> to vector<64xf32>
    %253 = vector.shape_cast %250 : vector<64xf32> to vector<1x64xf32>
    tpu.vector_store %arg12[%c0_146, %c2496], %253 {strides = array<i32>} : memref<1x3200xf32, #tpu.memory_space<vmem>>, vector<1x64xf32>,
    %c44 = arith.constant 44 : index
    %c0_147 = arith.constant 0 : index
    %254 = vector.load %arg11[%c44, %c0_147] : memref<55x64xf32, #tpu.memory_space<vmem>>, vector<1x64xf32>
    %255 = vector.shape_cast %254 : vector<1x64xf32> to vector<64xf32>
    %c0_148 = arith.constant 0 : index
    %c2560 = arith.constant 2560 : index
    %256 = vector.load %arg12[%c0_148, %c2560] : memref<1x3200xf32, #tpu.memory_space<vmem>>, vector<1x64xf32>
    %257 = vector.shape_cast %256 : vector<1x64xf32> to vector<64xf32>
    %258 = vector.shape_cast %255 : vector<64xf32> to vector<1x64xf32>
    tpu.vector_store %arg12[%c0_148, %c2560], %258 {strides = array<i32>} : memref<1x3200xf32, #tpu.memory_space<vmem>>, vector<1x64xf32>,
    %c45 = arith.constant 45 : index
    %c0_149 = arith.constant 0 : index
    %259 = vector.load %arg11[%c45, %c0_149] : memref<55x64xf32, #tpu.memory_space<vmem>>, vector<1x64xf32>
    %260 = vector.shape_cast %259 : vector<1x64xf32> to vector<64xf32>
    %c0_150 = arith.constant 0 : index
    %c2624 = arith.constant 2624 : index
    %261 = vector.load %arg12[%c0_150, %c2624] : memref<1x3200xf32, #tpu.memory_space<vmem>>, vector<1x64xf32>
    %262 = vector.shape_cast %261 : vector<1x64xf32> to vector<64xf32>
    %263 = vector.shape_cast %260 : vector<64xf32> to vector<1x64xf32>
    tpu.vector_store %arg12[%c0_150, %c2624], %263 {strides = array<i32>} : memref<1x3200xf32, #tpu.memory_space<vmem>>, vector<1x64xf32>,
    %c46 = arith.constant 46 : index
    %c0_151 = arith.constant 0 : index
    %264 = vector.load %arg11[%c46, %c0_151] : memref<55x64xf32, #tpu.memory_space<vmem>>, vector<1x64xf32>
    %265 = vector.shape_cast %264 : vector<1x64xf32> to vector<64xf32>
    %c0_152 = arith.constant 0 : index
    %c2688 = arith.constant 2688 : index
    %266 = vector.load %arg12[%c0_152, %c2688] : memref<1x3200xf32, #tpu.memory_space<vmem>>, vector<1x64xf32>
    %267 = vector.shape_cast %266 : vector<1x64xf32> to vector<64xf32>
    %268 = vector.shape_cast %265 : vector<64xf32> to vector<1x64xf32>
    tpu.vector_store %arg12[%c0_152, %c2688], %268 {strides = array<i32>} : memref<1x3200xf32, #tpu.memory_space<vmem>>, vector<1x64xf32>,
    %c47 = arith.constant 47 : index
    %c0_153 = arith.constant 0 : index
    %269 = vector.load %arg11[%c47, %c0_153] : memref<55x64xf32, #tpu.memory_space<vmem>>, vector<1x64xf32>
    %270 = vector.shape_cast %269 : vector<1x64xf32> to vector<64xf32>
    %c0_154 = arith.constant 0 : index
    %c2752 = arith.constant 2752 : index
    %271 = vector.load %arg12[%c0_154, %c2752] : memref<1x3200xf32, #tpu.memory_space<vmem>>, vector<1x64xf32>
    %272 = vector.shape_cast %271 : vector<1x64xf32> to vector<64xf32>
    %273 = vector.shape_cast %270 : vector<64xf32> to vector<1x64xf32>
    tpu.vector_store %arg12[%c0_154, %c2752], %273 {strides = array<i32>} : memref<1x3200xf32, #tpu.memory_space<vmem>>, vector<1x64xf32>,
    %c48 = arith.constant 48 : index
    %c0_155 = arith.constant 0 : index
    %274 = vector.load %arg11[%c48, %c0_155] : memref<55x64xf32, #tpu.memory_space<vmem>>, vector<1x64xf32>
    %275 = vector.shape_cast %274 : vector<1x64xf32> to vector<64xf32>
    %c0_156 = arith.constant 0 : index
    %c2816 = arith.constant 2816 : index
    %276 = vector.load %arg12[%c0_156, %c2816] : memref<1x3200xf32, #tpu.memory_space<vmem>>, vector<1x64xf32>
    %277 = vector.shape_cast %276 : vector<1x64xf32> to vector<64xf32>
    %278 = vector.shape_cast %275 : vector<64xf32> to vector<1x64xf32>
    tpu.vector_store %arg12[%c0_156, %c2816], %278 {strides = array<i32>} : memref<1x3200xf32, #tpu.memory_space<vmem>>, vector<1x64xf32>,
    %c49 = arith.constant 49 : index
    %c0_157 = arith.constant 0 : index
    %279 = vector.load %arg11[%c49, %c0_157] : memref<55x64xf32, #tpu.memory_space<vmem>>, vector<1x64xf32>
    %280 = vector.shape_cast %279 : vector<1x64xf32> to vector<64xf32>
    %c0_158 = arith.constant 0 : index
    %c2880 = arith.constant 2880 : index
    %281 = vector.load %arg12[%c0_158, %c2880] : memref<1x3200xf32, #tpu.memory_space<vmem>>, vector<1x64xf32>
    %282 = vector.shape_cast %281 : vector<1x64xf32> to vector<64xf32>
    %283 = vector.shape_cast %280 : vector<64xf32> to vector<1x64xf32>
    tpu.vector_store %arg12[%c0_158, %c2880], %283 {strides = array<i32>} : memref<1x3200xf32, #tpu.memory_space<vmem>>, vector<1x64xf32>,
    %c50 = arith.constant 50 : index
    %c0_159 = arith.constant 0 : index
    %284 = vector.load %arg11[%c50, %c0_159] : memref<55x64xf32, #tpu.memory_space<vmem>>, vector<1x64xf32>
    %285 = vector.shape_cast %284 : vector<1x64xf32> to vector<64xf32>
    %c0_160 = arith.constant 0 : index
    %c2944 = arith.constant 2944 : index
    %286 = vector.load %arg12[%c0_160, %c2944] : memref<1x3200xf32, #tpu.memory_space<vmem>>, vector<1x64xf32>
    %287 = vector.shape_cast %286 : vector<1x64xf32> to vector<64xf32>
    %288 = vector.shape_cast %285 : vector<64xf32> to vector<1x64xf32>
    tpu.vector_store %arg12[%c0_160, %c2944], %288 {strides = array<i32>} : memref<1x3200xf32, #tpu.memory_space<vmem>>, vector<1x64xf32>,
    %c51 = arith.constant 51 : index
    %c0_161 = arith.constant 0 : index
    %289 = vector.load %arg11[%c51, %c0_161] : memref<55x64xf32, #tpu.memory_space<vmem>>, vector<1x64xf32>
    %290 = vector.shape_cast %289 : vector<1x64xf32> to vector<64xf32>
    %c0_162 = arith.constant 0 : index
    %c3008 = arith.constant 3008 : index
    %291 = vector.load %arg12[%c0_162, %c3008] : memref<1x3200xf32, #tpu.memory_space<vmem>>, vector<1x64xf32>
    %292 = vector.shape_cast %291 : vector<1x64xf32> to vector<64xf32>
    %293 = vector.shape_cast %290 : vector<64xf32> to vector<1x64xf32>
    tpu.vector_store %arg12[%c0_162, %c3008], %293 {strides = array<i32>} : memref<1x3200xf32, #tpu.memory_space<vmem>>, vector<1x64xf32>,
    %c52 = arith.constant 52 : index
    %c0_163 = arith.constant 0 : index
    %294 = vector.load %arg11[%c52, %c0_163] : memref<55x64xf32, #tpu.memory_space<vmem>>, vector<1x64xf32>
    %295 = vector.shape_cast %294 : vector<1x64xf32> to vector<64xf32>
    %c0_164 = arith.constant 0 : index
    %c3072 = arith.constant 3072 : index
    %296 = vector.load %arg12[%c0_164, %c3072] : memref<1x3200xf32, #tpu.memory_space<vmem>>, vector<1x64xf32>
    %297 = vector.shape_cast %296 : vector<1x64xf32> to vector<64xf32>
    %298 = vector.shape_cast %295 : vector<64xf32> to vector<1x64xf32>
    tpu.vector_store %arg12[%c0_164, %c3072], %298 {strides = array<i32>} : memref<1x3200xf32, #tpu.memory_space<vmem>>, vector<1x64xf32>,
    %c53 = arith.constant 53 : index
    %c0_165 = arith.constant 0 : index
    %299 = vector.load %arg11[%c53, %c0_165] : memref<55x64xf32, #tpu.memory_space<vmem>>, vector<1x64xf32>
    %300 = vector.shape_cast %299 : vector<1x64xf32> to vector<64xf32>
    %c0_166 = arith.constant 0 : index
    %c3136 = arith.constant 3136 : index
    %301 = vector.load %arg12[%c0_166, %c3136] : memref<1x3200xf32, #tpu.memory_space<vmem>>, vector<1x64xf32>
    %302 = vector.shape_cast %301 : vector<1x64xf32> to vector<64xf32>
    %303 = vector.shape_cast %300 : vector<64xf32> to vector<1x64xf32>
    tpu.vector_store %arg12[%c0_166, %c3136], %303 {strides = array<i32>} : memref<1x3200xf32, #tpu.memory_space<vmem>>, vector<1x64xf32>,
    %c0_167 = arith.constant 0 : index
    %c0_168 = arith.constant 0 : index
    %304 = vector.load %arg12[%c0_167, %c0_168] : memref<1x3200xf32, #tpu.memory_space<vmem>>, vector<1x3200xf32>
    %305 = arith.truncf %304 : vector<1x3200xf32> to vector<1x3200xbf16>
    %c0_169 = arith.constant 0 : index
    %c0_170 = arith.constant 0 : index
    %306 = vector.load %arg6[%c0_169, %c0_170] : memref<3200x40xbf16, #tpu.memory_space<vmem>>, vector<3200x40xbf16>
    %cst_171 = arith.constant dense<0.000000e+00> : vector<1x40xf32>
    %307 = tpu.matmul %305, %306, %cst_171 {dimension_numbers = #tpu.dot_dimension_numbers<[1], [0], [0], [1], [0, 0, 1, 1], [], []>} : vector<1x3200xbf16>, vector<3200x40xbf16>, vector<1x40xf32> -> vector<1x40xf32>
    %c0_172 = arith.constant 0 : index
    %c0_173 = arith.constant 0 : index
    %308 = vector.load %arg7[%c0_172, %c0_173] : memref<1x40xf32, #tpu.memory_space<vmem>>, vector<1x40xf32>
    %309 = arith.addf %307, %308 : vector<1x40xf32>
    %cst_174 = arith.constant dense<0xFF800000> : vector<1xf32>
    %310 = vector.multi_reduction <maximumf>, %309, %cst_174 [1] : vector<1x40xf32> to vector<1xf32>
    %311 = vector.shape_cast %310 : vector<1xf32> to vector<1x1xf32>
    %312 = vector.broadcast %311 : vector<1x1xf32> to vector<1x40xf32>
    %313 = arith.subf %309, %312 : vector<1x40xf32>
    %314 = math.exp %313 : vector<1x40xf32>
    %cst_175 = arith.constant dense<0.000000e+00> : vector<1xf32>
    %315 = vector.multi_reduction <add>, %314, %cst_175 [1] : vector<1x40xf32> to vector<1xf32>
    %316 = vector.shape_cast %315 : vector<1xf32> to vector<1x1xf32>
    %317 = vector.broadcast %316 : vector<1x1xf32> to vector<1x40xf32>
    %318 = arith.divf %314, %317 : vector<1x40xf32>
    %c0_176 = arith.constant 0 : index
    %c0_177 = arith.constant 0 : index
    %c0_178 = arith.constant 0 : index
    %319 = vector.load %arg8[%c0_176, %c0_177, %c0_178] : memref<1x1x40xf32, #tpu.memory_space<vmem>>, vector<1x1x40xf32>
    %320 = vector.shape_cast %319 : vector<1x1x40xf32> to vector<1x40xf32>
    %321 = vector.shape_cast %318 : vector<1x40xf32> to vector<1x1x40xf32>
    tpu.vector_store %arg8[%c0_176, %c0_177, %c0_178], %321 {strides = array<i32>} : memref<1x1x40xf32, #tpu.memory_space<vmem>>, vector<1x1x40xf32>,
    return
  }
  func.func @transform_0(%arg0: i32) -> (i32, i32, i32) {
    %c0_i32 = arith.constant 0 : i32
    %c0_i32_0 = arith.constant 0 : i32
    %c0_i32_1 = arith.constant 0 : i32
    return %arg0, %c0_i32, %c0_i32_0 : i32, i32, i32
  }
  func.func @transform_1(%arg0: i32) -> (i32, i32) {
    %c0_i32 = arith.constant 0 : i32
    %c0_i32_0 = arith.constant 0 : i32
    %c0_i32_1 = arith.constant 0 : i32
    return %c0_i32, %c0_i32_0 : i32, i32
  }
  func.func @transform_2(%arg0: i32) -> (i32, i32) {
    %c0_i32 = arith.constant 0 : i32
    %c0_i32_0 = arith.constant 0 : i32
    %c0_i32_1 = arith.constant 0 : i32
    return %c0_i32, %c0_i32_0 : i32, i32
  }
  func.func @transform_3(%arg0: i32) -> (i32, i32) {
    %c0_i32 = arith.constant 0 : i32
    %c0_i32_0 = arith.constant 0 : i32
    %c0_i32_1 = arith.constant 0 : i32
    return %c0_i32, %c0_i32_0 : i32, i32
  }
  func.func @transform_4(%arg0: i32) -> (i32, i32) {
    %c0_i32 = arith.constant 0 : i32
    %c0_i32_0 = arith.constant 0 : i32
    %c0_i32_1 = arith.constant 0 : i32
    return %c0_i32, %c0_i32_0 : i32, i32
  }
  func.func @transform_5(%arg0: i32) -> (i32, i32) {
    %c0_i32 = arith.constant 0 : i32
    %c0_i32_0 = arith.constant 0 : i32
    %c0_i32_1 = arith.constant 0 : i32
    return %c0_i32, %c0_i32_0 : i32, i32
  }
  func.func @transform_6(%arg0: i32) -> (i32, i32) {
    %c0_i32 = arith.constant 0 : i32
    %c0_i32_0 = arith.constant 0 : i32
    %c0_i32_1 = arith.constant 0 : i32
    return %c0_i32, %c0_i32_0 : i32, i32
  }
  func.func @transform_7(%arg0: i32) -> (i32, i32, i32) {
    %c0_i32 = arith.constant 0 : i32
    %c0_i32_0 = arith.constant 0 : i32
    %c0_i32_1 = arith.constant 0 : i32
    return %arg0, %c0_i32, %c0_i32_0 : i32, i32, i32
  }
}

</mosaic_0001>

<bundles_post_ra>
// kernel: net_forward.1
= control target key start
LH: loop header
LB: loop body
LE: loop exit
PB: predicated region body
PF: predicated region fallthrough
CT: control target
= control target key end

     0   :  { %12 = vsyncpa [#allocation7], 0  ;;  %s7426_s0 = inlined_call_operand.vmem [shape: bf16[2,264,192], index: 0, kind: input, shape index: {}]   ;;  %s7427_s1 = inlined_call_operand.vmem [shape: bf16[192,32], index: 1, kind: input, shape index: {}]   ;;  %s7428_s2 = inlined_call_operand.vmem [shape: f32[1,32], index: 2, kind: input, shape index: {}]   ;;  %s7429_s3 = inlined_call_operand.vmem [shape: bf16[512,64], index: 3, kind: input, shape index: {}]   ;;  %s7430_s4 = inlined_call_operand.vmem [shape: f32[1,64], index: 4, kind: input, shape index: {}]   ;;  %s7431_s5 = inlined_call_operand.vmem [shape: bf16[3200,40], index: 5, kind: input, shape index: {}]   ;;  %s7432_s6 = inlined_call_operand.vmem [shape: f32[1,40], index: 6, kind: input, shape index: {}]   ;;  %s7433_s7 = inlined_call_operand.hbm [shape: f32[2,1,40], index: 7, kind: output, shape index: {}]  }
   0x1   :  { %14 = vsyncpa [#allocation7 + $0x1], 0  ;;  %s5946_s24 = smov 0   ;;  %s5948_s25 = smov 0  }
   0x2   :  { %s5950_s26 = smov 0   ;;  %s5952_s27 = smov 0  }
   0x3 LB: > { %s5967_s28 = sadd.s32 4294967295, %s5896_s27   ;;  %s4785_s29 = sadd.s32 4294967294, %s5896_s27   ;;  %s5896_s27 = sphi %s5952_s27, %s7443_s27   ;;  %s5892_s26 = sphi %s5950_s26, %s7442_s26   ;;  %s5888_s25 = sphi %s5948_s25, %s7441_s25   ;;  %s5884_s24 = sphi %s5946_s24, %s7440_s24  }
   0x4   : > { %s5971_s30 = sadd.s32 1, %s5896_s27   ;;  %s179_s8 = sadd.s32 1, %s5892_s26 }
   0x5   : > { %s176_s9 = ssub.s32 %s5896_s27, %s5971_s30  ;;  %p189_p0 = scmp.ne.s32.totalorder %s5892_s26, %s5888_s25 }
   0x6   : > { %p177_p1 = scmp.eq.s32.totalorder %s176_s9, 0  ;;  %p190_p2 = scmp.eq.s32.totalorder %s5967_s28, 1 }
   0x7   : > { %p195_p3 = scmp.ne.s32.totalorder %s5888_s25, %s5884_s24  ;;  %p196_p4 = scmp.eq.s32.totalorder %s4785_s29, 1 }
   0x8   : > { %s5982_s10 = scalar_select %p177_p1, %s5892_s26, %s179_s8  }
   0x9   : > { %p5984_p5 = por %p190_p2, %p189_p0  ;;  %p5988_p6 = por %p196_p4, %p195_p3 }
   0xa   : > { %p4788_p7 = scmp.ge.s32.totalorder %s5896_s27, 1  ;;  %p240_p8 = scmp.lt.s32.totalorder %s5896_s27, 3 }
   0xc   : > { %p241_p9 = pnand %p4788_p7, %p240_p8 }
   0xd   : > { %v5536_v0 = vld [vmem:[%s7427_s1] sm:$0xff] (!%p241_p9)   ;;  %v5898_v1 = vmov (!%p241_p9), 0   ;;  %p271_p10 = scmp.lt.s32.totalorder (!%p241_p9), %s5967_s28, 1  ;;  %v5537_v2 = vld [vmem:[%s7427_s1 + $0x8] sm:$0xff] (!%p241_p9)   ;;  %v5538_v3 = vld [vmem:[%s7427_s1 + $0x10] sm:$0xff] (!%p241_p9)   ;;  %vm563_vm0 = vcmask (!%p241_p9), 523264  }
   0xe   : > { %244 = sbr.rel (%p241_p9) target bundleno = 1698 (0x6a2), region = 48  ;;  %615 = vmatprep.subr.bf16.mxu0 (!%p241_p9), %v5898_v1  ;;  %v5539_v4 = vld [vmem:[%s7427_s1 + $0x18] sm:$0xff] (!%p241_p9)   ;;  %v5540_v6 = vld [vmem:[%s7427_s1 + $0x20] sm:$0xff] (!%p241_p9)   ;;  %v5541_v7 = vld [vmem:[%s7427_s1 + $0x28] sm:$0xff] (!%p241_p9)   ;;  %vm816_vm1 = vcmask (!%p241_p9), 261120   ;;  %vm864_vm2 = vcmask (!%p241_p9), 260096  }
   0xf   : > { %616 = vmatpush1.bf16.msra.mxu0 (!%p241_p9), %v5536_v0  ;;  %v5542_v8 = vld [vmem:[%s7427_s1 + $0x30] sm:$0xff] (!%p241_p9)   ;;  %v5543_v9 = vld [vmem:[%s7427_s1 + $0x38] sm:$0xff] (!%p241_p9)   ;;  %v5544_v10 = vld [vmem:[%s7427_s1 + $0x40] sm:$0xff] (!%p241_p9)   ;;  %s5901_s18 = smov (!%p241_p9), 96   ;;  %vm901_vm3 = vcmask (!%p241_p9), 523520   ;;  %vm945_vm4 = vcmask (!%p241_p9), 785920  }
  0x10   : > { %617 = vmatprep.subr.bf16.mxu0 (!%p241_p9), %v5898_v1  ;;  %v5545_v11 = vld [vmem:[%s7427_s1 + $0x48] sm:$0xff] (!%p241_p9)   ;;  %v5546_v12 = vld [vmem:[%s7427_s1 + $0x50] sm:$0xff] (!%p241_p9)   ;;  %v5547_v13 = vld [vmem:[%s7427_s1 + $0x58] sm:$0xff] (!%p241_p9)   ;;  %vm989_vm5 = vcmask (!%p241_p9), 1048320   ;;  %vm908_vm6 = vcmask (!%p241_p9), 522496   ;;  %vm952_vm7 = vcmask (!%p241_p9), 784896  }
  0x11   : > { %v6090_v48 = vld [vmem:[%s7428_s2] ss:$0 sm:$0xff] (!%p241_p9)  ;;  %vm996_vm8 = vcmask (!%p241_p9), 1047296   ;;  %vm1866_vm10 = vcmask (!%p241_p9), 522240   ;;  %vm5904_vm14 = vmmov (!%p241_p9), 0   ;;  %vm4704_vm15 = vcmask (!%p241_p9), 319488  }
  0x12   : > { %s269_s9 = sand.u32 (!%p241_p9), 1, %s5888_s25   ;;  %s5113_s13 = sshll.u32 (!%p241_p9), %s5967_s28, 4 }
  0x13   : > { %618 = vmatpush1.bf16.msra.mxu0 (!%p241_p9), %v5537_v2  ;;  %s7383_s19 = scalar_lea.hbm (!%p241_p9), %s7433_s7, %s5113_s13 }
  0x14   : > { %619 = vmatprep.subr.bf16.mxu0 (!%p241_p9), %v5898_v1 }
  0x15   : > { %s272_s17 = scalar_select %p271_p10, %s5967_s28, 1 }
  0x16   : > { %s5905_s28 = smov [#allocation6]  }
  0x17   : > { %s5489_s20 = smul.u32 264, %s272_s17  ;;  %620 = vmatpush1.bf16.msra.mxu0 %v5538_v3  ;;  %s5900_s17 = smov 32  }
  0x18   : > { %621 = vmatprep.subr.bf16.mxu0 %v5898_v1 }
  0x19   : > { %s6011_s8 = scalar_lea.vmem %s7426_s0, %s5489_s20  ;;  %s5838_s20 = sshll.u32 %s5905_s28, 4  ;;  %s5839_s20 = int_to_ptr.vmem [resolvable:$false] %s5838_s20 }
  0x1a   : > { %v5550_v5 = vld [vmem:[%s6011_s8 + $0x4] ss:$8 sps:$4 sm:$0xff]   ;;  %v5548_v14 = vld [vmem:[%s6011_s8] ss:$8 sps:$4 sm:$0xff]   ;;  %v5551_v15 = vld [vmem:[%s6011_s8 + $0x14] ss:$8 sps:$4 sm:$0xff]  }
  0x1b   : > { %622 = vmatpush1.bf16.msra.mxu0 %v5539_v4  ;;  %4837 = vmatprep.mubr.msk.bf16.mxu0 %vm563_vm0, %v5550_v5  ;;  %v5553_v16 = vld [vmem:[%s6011_s8 + $0x10] ss:$8 sps:$4 sm:$0xff]   ;;  %v5554_v17 = vld [vmem:[%s6011_s8 + $0x24] ss:$8 sps:$4 sm:$0xff]   ;;  %v5556_v18 = vld [vmem:[%s6011_s8 + $0x20] ss:$8 sps:$4 sm:$0xff]  }
  0x1c   : > { %623 = vmatprep.subr.bf16.mxu0 %v5898_v1  ;;  %v5557_v19 = vld [vmem:[%s6011_s8 + $0x34] ss:$8 sps:$4 sm:$0xff]   ;;  %v5559_v20 = vld [vmem:[%s6011_s8 + $0x30] ss:$8 sps:$4 sm:$0xff]   ;;  %v5560_v21 = vld [vmem:[%s6011_s8 + $0x44] ss:$8 sps:$4 sm:$0xff]  }
  0x1d   : > { %v5562_v22 = vld [vmem:[%s6011_s8 + $0x40] ss:$8 sps:$4 sm:$0xff]   ;;  %v5563_v23 = vld [vmem:[%s6011_s8 + $0x54] ss:$8 sps:$4 sm:$0xff]   ;;  %v5565_v24 = vld [vmem:[%s6011_s8 + $0x50] ss:$8 sps:$4 sm:$0xff]  }
  0x1e   : > { %v5566_v25 = vld [vmem:[%s6011_s8 + $0x64] ss:$8 sps:$4 sm:$0xff]   ;;  %v5568_v26 = vld [vmem:[%s6011_s8 + $0x60] ss:$8 sps:$4 sm:$0xff]   ;;  %v5569_v27 = vld [vmem:[%s6011_s8 + $0x74] ss:$8 sps:$4 sm:$0xff]  }
  0x1f   : > { %624 = vmatpush1.bf16.msra.mxu0 %v5540_v6  ;;  %v5571_v28 = vld [vmem:[%s6011_s8 + $0x70] ss:$8 sps:$4 sm:$0xff]   ;;  %v5572_v29 = vld [vmem:[%s6011_s8 + $0x84] ss:$8 sps:$4 sm:$0xff]   ;;  %v5574_v30 = vld [vmem:[%s6011_s8 + $0x80] ss:$8 sps:$4 sm:$0xff]  }
  0x20   : > { %625 = vmatprep.subr.bf16.mxu0 %v5898_v1  ;;  %v5575_v31 = vld [vmem:[%s6011_s8 + $0x94] ss:$8 sps:$4 sm:$0xff]   ;;  %v5577_v32 = vld [vmem:[%s6011_s8 + $0x90] ss:$8 sps:$4 sm:$0xff]   ;;  %v5578_v33 = vld [vmem:[%s6011_s8 + $0xa4] ss:$8 sps:$4 sm:$0xff]  }
  0x21   : > { %v5580_v34 = vld [vmem:[%s6011_s8 + $0xa0] ss:$8 sps:$4 sm:$0xff]   ;;  %v5581_v35 = vld [vmem:[%s6011_s8 + $0xb4] ss:$8 sps:$4 sm:$0xff]   ;;  %v5583_v36 = vld [vmem:[%s6011_s8 + $0xb0] ss:$8 sps:$4 sm:$0xff]  }
  0x22   : > { %v5584_v37 = vld [vmem:[%s6011_s8 + $0xc4] ss:$8 sps:$4 sm:$0xff]   ;;  %v5586_v38 = vld [vmem:[%s6011_s8 + $0xc0] ss:$8 sps:$4 sm:$0xff]   ;;  %v5587_v39 = vld [vmem:[%s6011_s8 + $0xd4] ss:$8 sps:$4 sm:$0xff]  }
  0x23   : > { %626 = vmatpush1.bf16.msra.mxu0 %v5541_v7  ;;  %v5589_v40 = vld [vmem:[%s6011_s8 + $0xd0] ss:$8 sps:$4 sm:$0xff]   ;;  %v5590_v41 = vld [vmem:[%s6011_s8 + $0xe4] ss:$8 sps:$4 sm:$0xff]   ;;  %v5592_v42 = vld [vmem:[%s6011_s8 + $0xe0] ss:$8 sps:$4 sm:$0xff]  }
  0x24   : > { %627 = vmatprep.subr.bf16.mxu0 %v5898_v1  ;;  %v5593_v43 = vld [vmem:[%s6011_s8 + $0xf4] ss:$8 sps:$4 sm:$0xff]   ;;  %v309_v44 = vld [vmem:[%s6011_s8 + $0x100] sm:$0xff]  ;;  %v5595_v45 = vld [vmem:[%s6011_s8 + $0xf0] ss:$8 sps:$4 sm:$0xff]   ;;  %s5899_s8 = smov 64  }
  0x25   : > { %v4824_v46 = vcombine.high %v309_v44, %v309_v44  ;;  %v4823_v47 = vcombine.low %v309_v44, %v309_v44  ;;  %s5840_s21 = scalar_lea.vmem %s5839_s20, 32 }
  0x27   : > { %628 = vmatpush1.bf16.msra.mxu0 %v5542_v8 }
  0x28   : > { %629 = vmatprep.subr.bf16.mxu0 %v5898_v1 }
  0x2b   : > { %630 = vmatpush1.bf16.msra.mxu0 %v5543_v9 }
  0x2c   : > { %631 = vmatprep.subr.bf16.mxu0 %v5898_v1 }
  0x2f   : > { %632 = vmatpush1.bf16.msra.mxu0 %v5544_v10 }
  0x30   : > { %633 = vmatprep.subr.bf16.mxu0 %v5898_v1 }
  0x33   : > { %634 = vmatpush1.bf16.msra.mxu0 %v5545_v11 }
  0x34   : > { %635 = vmatprep.subr.bf16.mxu0 %v5898_v1 }
  0x37   : > { %636 = vmatpush1.bf16.msra.mxu0 %v5546_v12 }
  0x38   : > { %637 = vmatprep.subr.bf16.mxu0 %v5898_v1 }
  0x3b   : > { %638 = vmatpush1.bf16.msra.mxu0 %v5547_v13 }
  0x3e   : > { %648 = vmatmul.mubr.bf16.vlgmr.msra.gmra.mrb[0].mxu0 %v5548_v14 }
  0x3f   : > { %4838 = vmatprep.mubr.msk.bf16.mxu0 %vm563_vm0, %v5551_v15 }
  0x46   : > { %656 = vmatmul.mubr.bf16.gmra.mrb[4].mxu0 %v5553_v16 }
  0x47   : > { %4839 = vmatprep.mubr.msk.bf16.mxu0 %vm563_vm0, %v5554_v17 }
  0x4e   : > { %664 = vmatmul.mubr.bf16.gmra.mrb[8].mxu0 %v5556_v18 }
  0x4f   : > { %4840 = vmatprep.mubr.msk.bf16.mxu0 %vm563_vm0, %v5557_v19 }
  0x56   : > { %672 = vmatmul.mubr.bf16.gmra.mrb[12].mxu0 %v5559_v20 }
  0x57   : > { %4841 = vmatprep.mubr.msk.bf16.mxu0 %vm563_vm0, %v5560_v21 }
  0x5e   : > { %680 = vmatmul.mubr.bf16.gmra.mrb[16].mxu0 %v5562_v22 }
  0x5f   : > { %4842 = vmatprep.mubr.msk.bf16.mxu0 %vm563_vm0, %v5563_v23 }
  0x66   : > { %688 = vmatmul.mubr.bf16.gmra.mrb[20].mxu0 %v5565_v24 }
  0x67   : > { %4843 = vmatprep.mubr.msk.bf16.mxu0 %vm563_vm0, %v5566_v25 }
  0x6e   : > { %696 = vmatmul.mubr.bf16.gmra.mrb[24].mxu0 %v5568_v26 }
  0x6f   : > { %4844 = vmatprep.mubr.msk.bf16.mxu0 %vm563_vm0, %v5569_v27 }
  0x76   : > { %704 = vmatmul.mubr.bf16.gmra.mrb[28].mxu0 %v5571_v28 }
  0x77   : > { %4845 = vmatprep.mubr.msk.bf16.mxu0 %vm563_vm0, %v5572_v29 }
  0x7e   : > { %712 = vmatmul.mubr.bf16.gmra.mrb[32].mxu0 %v5574_v30 }
  0x7f   : > { %4846 = vmatprep.mubr.msk.bf16.mxu0 %vm563_vm0, %v5575_v31 }
  0x86   : > { %720 = vmatmul.mubr.bf16.gmra.mrb[36].mxu0 %v5577_v32 }
  0x87   : > { %4847 = vmatprep.mubr.msk.bf16.mxu0 %vm563_vm0, %v5578_v33 }
  0x8e   : > { %728 = vmatmul.mubr.bf16.gmra.mrb[40].mxu0 %v5580_v34 }
  0x8f   : > { %4848 = vmatprep.mubr.msk.bf16.mxu0 %vm563_vm0, %v5581_v35 }
  0x96   : > { %736 = vmatmul.mubr.bf16.gmra.mrb[44].mxu0 %v5583_v36 }
  0x97   : > { %4849 = vmatprep.mubr.msk.bf16.mxu0 %vm563_vm0, %v5584_v37 }
  0x9e   : > { %744 = vmatmul.mubr.bf16.gmra.mrb[48].mxu0 %v5586_v38 }
  0x9f   : > { %4850 = vmatprep.mubr.msk.bf16.mxu0 %vm563_vm0, %v5587_v39 }
  0xa6   : > { %752 = vmatmul.mubr.bf16.gmra.mrb[52].mxu0 %v5589_v40 }
  0xa7   : > { %4851 = vmatprep.mubr.msk.bf16.mxu0 %vm563_vm0, %v5590_v41 }
  0xae   : > { %760 = vmatmul.mubr.bf16.gmra.mrb[56].mxu0 %v5592_v42 }
  0xaf   : > { %4852 = vmatprep.mubr.msk.bf16.mxu0 %vm563_vm0, %v5593_v43 }
  0xb6   : > { %768 = vmatmul.mubr.bf16.gmra.mrb[60].mxu0 %v5595_v45 }
  0xb7   : > { %4853 = vmatprep.mubr.msk.bf16.mxu0 %vm563_vm0, %v4824_v46 }
  0xbe   : > { %776 = vmatmul.mubr.bf16.gmra.mrb[64].mxu0 %v4823_v47 }
 0x111   : > { %v649_v49 = vpop.f32.mrb[0].mxu0 }
 0x112   : > { %v650_v50 = vadd.f32 %v6090_v48, %v649_v49  ;;  %v651_v51 = vpop.f32.mrb[1].mxu0 }
 0x113   : > { %v652_v52 = vpop.f32.mrb[2].mxu0 }
 0x114   : > { %v783_v53 = vmax.f32 %v650_v50, 0.0  ;;  %v653_v54 = vadd.f32 %v6090_v48, %v652_v52  ;;  %v654_v55 = vpop.f32.mrb[3].mxu0 }
 0x116   : > { %817 = vst.msk [vmem:[#allocation2] sm:$0xff] %vm816_vm1, %v783_v53  ;;  %v784_v56 = vmax.f32 %v653_v54, 0.0 }
 0x118   : > { %818 = vst.msk [vmem:[#allocation2 + $0x8] sm:$0xff] %vm816_vm1, %v784_v56 }
 0x119   : > { %v657_v57 = vpop.f32.mrb[4].mxu0 }
 0x11a   : > { %v658_v58 = vadd.f32 %v6090_v48, %v657_v57  ;;  %v659_v59 = vpop.f32.mrb[5].mxu0 }
 0x11b   : > { %v660_v60 = vpop.f32.mrb[6].mxu0 }
 0x11c   : > { %v785_v61 = vmax.f32 %v658_v58, 0.0  ;;  %v661_v62 = vadd.f32 %v6090_v48, %v660_v60  ;;  %v662_v63 = vpop.f32.mrb[7].mxu0 }
 0x11d   : > { %v851_v0 = vld [vmem:[#allocation2] sm:$0xff] }
 0x11e   : > { %819 = vst.msk [vmem:[#allocation2 + $0x10] sm:$0xff] %vm816_vm1, %v785_v61  ;;  %v786_v1 = vmax.f32 %v661_v62, 0.0  ;;  %858 = vst.msk [vmem:[#allocation3] sm:$0xff] %vm816_vm1, %v851_v0 }
 0x11f   : > { %v910_v2 = vld [vmem:[#allocation2 + $0x1] sm:$0xff] }
 0x120   : > { %v852_v3 = vld [vmem:[#allocation2 + $0x8] sm:$0xff]  ;;  %820 = vst.msk [vmem:[#allocation2 + $0x18] sm:$0xff] %vm816_vm1, %v786_v1  ;;  %924 = vrot.lane.b32.xlu0 %v910_v2, %s5899_s8 }
 0x121   : > { %859 = vst.msk [vmem:[#allocation3 + $0x20] sm:$0xff] %vm816_vm1, %v852_v3  ;;  %v665_v4 = vpop.f32.mrb[8].mxu0 }
 0x122   : > { %v666_v5 = vadd.f32 %v6090_v48, %v665_v4  ;;  %v667_v6 = vpop.f32.mrb[9].mxu0 }
 0x123   : > { %v668_v7 = vpop.f32.mrb[10].mxu0 }
 0x124   : > { %v787_v8 = vmax.f32 %v666_v5, 0.0  ;;  %v669_v9 = vadd.f32 %v6090_v48, %v668_v7  ;;  %v670_v10 = vpop.f32.mrb[11].mxu0 }
 0x125   : > { %v911_v11 = vld [vmem:[#allocation2 + $0x9] sm:$0xff] }
 0x126   : > { %v1194_v12 = vld [vmem:[#allocation2 + $0xc] sm:$0xff]  ;;  %821 = vst.msk [vmem:[#allocation2 + $0x20] sm:$0xff] %vm816_vm1, %v787_v8  ;;  %v788_v14 = vmax.f32 %v669_v9, 0.0  ;;  %926 = vrot.lane.b32.xlu1 %v911_v11, %s5899_s8 }
 0x127   : > { %v1138_v13 = vld [vmem:[#allocation2 + $0xb] sm:$0xff]  ;;  %1208 = vrot.lane.b32.xlu0 %v1194_v12, %s5899_s8  ;;  %v1139_v16 = vld [vmem:[#allocation2 + $0x13] sm:$0xff] }
 0x128   : > { %1145 = vst.msk [vmem:[#allocation3 + $0x10] sm:$0xff] %vm816_vm1, %v1138_v13  ;;  %v853_v15 = vld [vmem:[#allocation2 + $0x10] sm:$0xff]  ;;  %822 = vst.msk [vmem:[#allocation2 + $0x28] sm:$0xff] %vm816_vm1, %v788_v14  ;;  %v854_v17 = vld [vmem:[#allocation2 + $0x18] sm:$0xff] }
 0x129   : > { %860 = vst.msk [vmem:[#allocation3 + $0x40] sm:$0xff] %vm816_vm1, %v853_v15  ;;  %1146 = vst.msk [vmem:[#allocation3 + $0x30] sm:$0xff] %vm816_vm1, %v1139_v16  ;;  %v673_v18 = vpop.f32.mrb[12].mxu0  ;;  %v1195_v19 = vld [vmem:[#allocation2 + $0x14] sm:$0xff] }
 0x12a   : > { %v912_v20 = vld [vmem:[#allocation2 + $0x11] sm:$0xff]  ;;  %861 = vst.msk [vmem:[#allocation3 + $0x60] sm:$0xff] %vm816_vm1, %v854_v17  ;;  %v674_v21 = vadd.f32 %v6090_v48, %v673_v18  ;;  %v675_v22 = vpop.f32.mrb[13].mxu0  ;;  %1210 = vrot.lane.b32.xlu1 %v1195_v19, %s5899_s8 }
 0x12b   : > { %928 = vrot.lane.b32.xlu0 %v912_v20, %s5899_s8  ;;  %v676_v23 = vpop.f32.mrb[14].mxu0 }
 0x12c   : > { %v789_v24 = vmax.f32 %v674_v21, 0.0  ;;  %v677_v25 = vadd.f32 %v6090_v48, %v676_v23  ;;  %v678_v26 = vpop.f32.mrb[15].mxu0 }
 0x12d   : > { %v913_v27 = vld [vmem:[#allocation2 + $0x19] sm:$0xff] }
 0x12e   : > { %v855_v28 = vld [vmem:[#allocation2 + $0x20] sm:$0xff]  ;;  %823 = vst.msk [vmem:[#allocation2 + $0x30] sm:$0xff] %vm816_vm1, %v789_v24  ;;  %v790_v29 = vmax.f32 %v677_v25, 0.0  ;;  %930 = vrot.lane.b32.xlu1 %v913_v27, %s5899_s8 }
 0x12f   : > { %862 = vst.msk [vmem:[#allocation3 + $0x80] sm:$0xff] %vm816_vm1, %v855_v28  ;;  %v1140_v30 = vld [vmem:[#allocation2 + $0x1b] sm:$0xff]  ;;  %v856_v32 = vld [vmem:[#allocation2 + $0x28] sm:$0xff] }
 0x130   : > { %v914_v31 = vld [vmem:[#allocation2 + $0x21] sm:$0xff]  ;;  %1147 = vst.msk [vmem:[#allocation3 + $0x50] sm:$0xff] %vm816_vm1, %v1140_v30  ;;  %824 = vst.msk [vmem:[#allocation2 + $0x38] sm:$0xff] %vm816_vm1, %v790_v29 }
 0x131   : > { %932 = vrot.lane.b32.xlu0 %v914_v31, %s5899_s8  ;;  %863 = vst.msk [vmem:[#allocation3 + $0xa0] sm:$0xff] %vm816_vm1, %v856_v32  ;;  %v1141_v33 = vld [vmem:[#allocation2 + $0x23] sm:$0xff]  ;;  %v681_v34 = vpop.f32.mrb[16].mxu0 }
 0x132   : > { %1148 = vst.msk [vmem:[#allocation3 + $0x70] sm:$0xff] %vm816_vm1, %v1141_v33  ;;  %v682_v35 = vadd.f32 %v6090_v48, %v681_v34  ;;  %v683_v36 = vpop.f32.mrb[17].mxu0 }
 0x133   : > { %v684_v37 = vpop.f32.mrb[18].mxu0 }
 0x134   : > { %v791_v38 = vmax.f32 %v682_v35, 0.0  ;;  %v685_v39 = vadd.f32 %v6090_v48, %v684_v37  ;;  %v686_v40 = vpop.f32.mrb[19].mxu0 }
 0x135   : > { %v915_v41 = vld [vmem:[#allocation2 + $0x29] sm:$0xff]  ;;  %v916_v47 = vld [vmem:[#allocation2 + $0x31] sm:$0x7f] }
 0x136   : > { %825 = vst.msk [vmem:[#allocation2 + $0x40] sm:$0xff] %vm816_vm1, %v791_v38  ;;  %v792_v42 = vmax.f32 %v685_v39, 0.0  ;;  %934 = vrot.lane.b32.xlu1 %v915_v41, %s5899_s8  ;;  %v857_v43 = vld [vmem:[#allocation2 + $0x30] sm:$0x7f]  ;;  %v5902_v39 = vmov 0.0  }
 0x137   : > { %v1142_v44 = vld [vmem:[#allocation2 + $0x2b] sm:$0xff]  ;;  %865 = vst.msk [vmem:[#allocation3 + $0xc0] sm:$0x7f] %vm864_vm2, %v857_v43  ;;  %v1143_v45 = vld [vmem:[#allocation2 + $0x33] sm:$0xff] }
 0x138   : > { %1149 = vst.msk [vmem:[#allocation3 + $0x90] sm:$0xff] %vm816_vm1, %v1142_v44  ;;  %826 = vst.msk [vmem:[#allocation2 + $0x48] sm:$0xff] %vm816_vm1, %v792_v42 }
 0x139   : > { %1150 = vst.msk [vmem:[#allocation3 + $0xb0] sm:$0xff] %vm816_vm1, %v1143_v45  ;;  %v689_v46 = vpop.f32.mrb[20].mxu0  ;;  %850 = vst.msk [vmem:[#allocation2 + $0x108] sm:$0xff] %vm816_vm1, %v5902_v39 }
 0x13a   : > { %v690_v49 = vadd.f32 %v6090_v48, %v689_v46  ;;  %v691_v50 = vpop.f32.mrb[21].mxu0  ;;  %936 = vrot.lane.b32.xlu1 %v916_v47, %s5899_s8 }
 0x13b   : > { %v692_v51 = vpop.f32.mrb[22].mxu0 }
 0x13c   : > { %v793_v52 = vmax.f32 %v690_v49, 0.0  ;;  %v693_v53 = vadd.f32 %v6090_v48, %v692_v51  ;;  %v694_v54 = vpop.f32.mrb[23].mxu0 }
 0x13d   : > { %v1144_v55 = vld [vmem:[#allocation2 + $0x3b] sm:$0x7f] }
 0x13e   : > { %827 = vst.msk [vmem:[#allocation2 + $0x50] sm:$0xff] %vm816_vm1, %v793_v52  ;;  %v794_v56 = vmax.f32 %v693_v53, 0.0  ;;  %v5598_v52 = vld [vmem:[%s7429_s3 + $0x40] sm:$0xff]  }
 0x13f   : > { %1151 = vst.msk [vmem:[#allocation3 + $0xd0] sm:$0x7f] %vm864_vm2, %v1144_v55  ;;  %v866_v57 = vld [vmem:[#allocation2 + $0x42] sm:$0xff]  ;;  %5116 = vmatprep.subr.bf16.mxu1 %v5598_v52 }
 0x140   : > { %v954_v58 = vld [vmem:[#allocation2 + $0x43] sm:$0xff]  ;;  %828 = vst.msk [vmem:[#allocation2 + $0x58] sm:$0xff] %vm816_vm1, %v794_v56  ;;  %880 = vrot.lane.b32.xlu1 %v866_v57, %s5900_s17 }
 0x141   : > { %968 = vrot.lane.b32.xlu0 %v954_v58, %s5901_s18  ;;  %v697_v59 = vpop.f32.mrb[24].mxu0 }
 0x142   : > { %v698_v60 = vadd.f32 %v6090_v48, %v697_v59  ;;  %v699_v61 = vpop.f32.mrb[25].mxu0  ;;  %v5599_v59 = vld [vmem:[%s7429_s3] sm:$0xff]  }
 0x143   : > { %v700_v62 = vpop.f32.mrb[26].mxu0  ;;  %5117 = vmatpush3.bf16.msra.mxu1 %v5599_v59 }
 0x144   : > { %v795_v63 = vmax.f32 %v698_v60, 0.0  ;;  %v701_v0 = vadd.f32 %v6090_v48, %v700_v62  ;;  %v702_v1 = vpop.f32.mrb[27].mxu0 }
 0x145   : > { %v867_v2 = vld [vmem:[#allocation2 + $0x4a] sm:$0xff] }
 0x146   : > { %v1152_v3 = vld [vmem:[#allocation2 + $0x4d] sm:$0xff]  ;;  %829 = vst.msk [vmem:[#allocation2 + $0x60] sm:$0xff] %vm816_vm1, %v795_v63  ;;  %v796_v4 = vmax.f32 %v701_v0, 0.0  ;;  %882 = vrot.lane.b32.xlu1 %v867_v2, %s5900_s17 }
 0x147   : > { %1166 = vrot.lane.b32.xlu0 %v1152_v3, %s5900_s17  ;;  %v955_v6 = vld [vmem:[#allocation2 + $0x4b] sm:$0xff]  ;;  %v1153_v14 = vld [vmem:[#allocation2 + $0x55] sm:$0xff] }
 0x148   : > { %830 = vst.msk [vmem:[#allocation2 + $0x68] sm:$0xff] %vm816_vm1, %v796_v4  ;;  %v1236_v7 = vld [vmem:[#allocation2 + $0x4e] sm:$0xff] }
 0x149   : > { %v705_v5 = vpop.f32.mrb[28].mxu0  ;;  %v868_v15 = vld [vmem:[#allocation2 + $0x52] sm:$0xff]  ;;  %v5600_v2 = vld [vmem:[%s7429_s3 + $0x48] sm:$0xff]  }
 0x14a   : > { %v706_v8 = vadd.f32 %v6090_v48, %v705_v5  ;;  %v707_v9 = vpop.f32.mrb[29].mxu0  ;;  %970 = vrot.lane.b32.xlu1 %v955_v6, %s5901_s18  ;;  %v956_v19 = vld [vmem:[#allocation2 + $0x53] sm:$0xff]  ;;  %v5601_v4 = vld [vmem:[%s7429_s3 + $0x8] sm:$0xff]   ;;  %5118 = vmatprep.subr.bf16.mxu1 %v5600_v2 }
 0x14b   : > { %1250 = vrot.lane.b32.xlu0 %v1236_v7, %s5901_s18  ;;  %v708_v10 = vpop.f32.mrb[30].mxu0  ;;  %5119 = vmatpush3.bf16.msra.mxu1 %v5601_v4 }
 0x14c   : > { %v797_v11 = vmax.f32 %v706_v8, 0.0  ;;  %v709_v12 = vadd.f32 %v6090_v48, %v708_v10  ;;  %v710_v13 = vpop.f32.mrb[31].mxu0  ;;  %v5602_v8 = vld [vmem:[%s7429_s3 + $0x50] sm:$0xff]  }
 0x14d   : > { %v869_v18 = vld [vmem:[#allocation2 + $0x5a] sm:$0xff]  ;;  %5120 = vmatprep.subr.bf16.mxu1 %v5602_v8 }
 0x14e   : > { %831 = vst.msk [vmem:[#allocation2 + $0x70] sm:$0xff] %vm816_vm1, %v797_v11  ;;  %v798_v16 = vmax.f32 %v709_v12, 0.0  ;;  %1168 = vrot.lane.b32.xlu1 %v1153_v14, %s5900_s17  ;;  %v957_v26 = vld [vmem:[#allocation2 + $0x5b] sm:$0xff]  ;;  %v5603_v14 = vld [vmem:[%s7429_s3 + $0x10] sm:$0xff]  }
 0x14f   : > { %884 = vrot.lane.b32.xlu0 %v868_v15, %s5900_s17  ;;  %v870_v27 = vld [vmem:[#allocation2 + $0x62] sm:$0xff]  ;;  %5121 = vmatpush3.bf16.msra.mxu1 %v5603_v14 }
 0x150   : > { %832 = vst.msk [vmem:[#allocation2 + $0x78] sm:$0xff] %vm816_vm1, %v798_v16  ;;  %v958_v31 = vld [vmem:[#allocation2 + $0x63] sm:$0xff] }
 0x151   : > { %v713_v17 = vpop.f32.mrb[32].mxu0  ;;  %v5614_v14 = vld [vmem:[%s7429_s3 + $0xc0] sm:$0xff]  }
 0x152   : > { %v714_v20 = vadd.f32 %v6090_v48, %v713_v17  ;;  %v715_v21 = vpop.f32.mrb[33].mxu0  ;;  %886 = vrot.lane.b32.xlu1 %v869_v18, %s5900_s17 }
 0x153   : > { %972 = vrot.lane.b32.xlu0 %v956_v19, %s5901_s18  ;;  %v716_v22 = vpop.f32.mrb[34].mxu0 }
 0x154   : > { %v799_v23 = vmax.f32 %v714_v20, 0.0  ;;  %v717_v24 = vadd.f32 %v6090_v48, %v716_v22  ;;  %v718_v25 = vpop.f32.mrb[35].mxu0  ;;  %v5604_v22 = vld [vmem:[%s7429_s3 + $0x58] sm:$0xff]  }
 0x155   : > { %v871_v30 = vld [vmem:[#allocation2 + $0x6a] sm:$0xff]  ;;  %5122 = vmatprep.subr.bf16.mxu1 %v5604_v22 }
 0x156   : > { %833 = vst.msk [vmem:[#allocation2 + $0x80] sm:$0xff] %vm816_vm1, %v799_v23  ;;  %v800_v28 = vmax.f32 %v717_v24, 0.0  ;;  %974 = vrot.lane.b32.xlu1 %v957_v26, %s5901_s18  ;;  %v959_v38 = vld [vmem:[#allocation2 + $0x6b] sm:$0xff]  ;;  %v5605_v26 = vld [vmem:[%s7429_s3 + $0x18] sm:$0xff]  }
 0x157   : > { %888 = vrot.lane.b32.xlu0 %v870_v27, %s5900_s17  ;;  %v872_v44 = vld [vmem:[#allocation2 + $0x72] sm:$0x7f]  ;;  %5123 = vmatpush3.bf16.msra.mxu1 %v5605_v26 }
 0x158   : > { %834 = vst.msk [vmem:[#allocation2 + $0x88] sm:$0xff] %vm816_vm1, %v800_v28  ;;  %v960_v53 = vld [vmem:[#allocation2 + $0x73] sm:$0x7f] }
 0x159   : > { %v721_v29 = vpop.f32.mrb[36].mxu0 }
 0x15a   : > { %v722_v32 = vadd.f32 %v6090_v48, %v721_v29  ;;  %v723_v33 = vpop.f32.mrb[37].mxu0  ;;  %890 = vrot.lane.b32.xlu1 %v871_v30, %s5900_s17 }
 0x15b   : > { %976 = vrot.lane.b32.xlu0 %v958_v31, %s5901_s18  ;;  %v724_v34 = vpop.f32.mrb[38].mxu0  ;;  %v5607_v33 = vld [vmem:[%s7429_s3 + $0x20] sm:$0xff]  }
 0x15c   : > { %v801_v35 = vmax.f32 %v722_v32, 0.0  ;;  %v725_v36 = vadd.f32 %v6090_v48, %v724_v34  ;;  %v726_v37 = vpop.f32.mrb[39].mxu0  ;;  %v5606_v32 = vld [vmem:[%s7429_s3 + $0x60] sm:$0xff]  }
 0x15d   : > { %5124 = vmatprep.subr.bf16.mxu1 %v5606_v32  ;;  %v1237_v32 = vld [vmem:[#allocation2 + $0x56] sm:$0xff] }
 0x15e   : > { %835 = vst.msk [vmem:[#allocation2 + $0x90] sm:$0xff] %vm816_vm1, %v801_v35  ;;  %v802_v40 = vmax.f32 %v725_v36, 0.0  ;;  %978 = vrot.lane.b32.xlu1 %v959_v38, %s5901_s18  ;;  %5125 = vmatpush3.bf16.msra.mxu1 %v5607_v33 }
 0x15f   : > { %v1054_v41 = vld [vmem:[#allocation2 + $0x85] sm:$0xff] }
 0x160   : > { %v998_v42 = vld [vmem:[#allocation2 + $0x84] sm:$0xff]  ;;  %836 = vst.msk [vmem:[#allocation2 + $0x98] sm:$0xff] %vm816_vm1, %v802_v40  ;;  %1068 = vrot.lane.b32.xlu0 %v1054_v41, %s5899_s8 }
 0x161   : > { %1005 = vst.msk [vmem:[#allocation3 + $0x8] sm:$0xff] %vm816_vm1, %v998_v42  ;;  %v729_v43 = vpop.f32.mrb[40].mxu0  ;;  %v5608_v41 = vld [vmem:[%s7429_s3 + $0x68] sm:$0xff]  }
 0x162   : > { %v730_v45 = vadd.f32 %v6090_v48, %v729_v43  ;;  %v731_v46 = vpop.f32.mrb[41].mxu0  ;;  %892 = vrot.lane.b32.xlu1 %v872_v44, %s5900_s17  ;;  %5126 = vmatprep.subr.bf16.mxu1 %v5608_v41 }
 0x163   : > { %v732_v47 = vpop.f32.mrb[42].mxu0 }
 0x164   : > { %v803_v49 = vmax.f32 %v730_v45, 0.0  ;;  %v733_v50 = vadd.f32 %v6090_v48, %v732_v47  ;;  %v734_v51 = vpop.f32.mrb[43].mxu0  ;;  %v5609_v45 = vld [vmem:[%s7429_s3 + $0x28] sm:$0xff]  }
 0x165   : > { %v1334_v54 = vld [vmem:[#allocation2 + $0x90] sm:$0xff]  ;;  %5127 = vmatpush3.bf16.msra.mxu1 %v5609_v45 }
 0x166   : > { %v999_v55 = vld [vmem:[#allocation2 + $0x8c] sm:$0xff]  ;;  %837 = vst.msk [vmem:[#allocation2 + $0xa0] sm:$0xff] %vm816_vm1, %v803_v49  ;;  %v804_v56 = vmax.f32 %v733_v50, 0.0  ;;  %980 = vrot.lane.b32.xlu1 %v960_v53, %s5901_s18  ;;  %1348 = vrot.lane.b32.xlu0 %v1334_v54, %s5899_s8 }
 0x167   : > { %1006 = vst.msk [vmem:[#allocation3 + $0x28] sm:$0xff] %vm816_vm1, %v999_v55  ;;  %v1278_v57 = vld [vmem:[#allocation2 + $0x8f] sm:$0xff]  ;;  %v1279_v60 = vld [vmem:[#allocation2 + $0x97] sm:$0xff] }
 0x168   : > { %v1000_v58 = vld [vmem:[#allocation2 + $0x94] sm:$0xff]  ;;  %1285 = vst.msk [vmem:[#allocation3 + $0x18] sm:$0xff] %vm816_vm1, %v1278_v57  ;;  %838 = vst.msk [vmem:[#allocation2 + $0xa8] sm:$0xff] %vm816_vm1, %v804_v56 }
 0x169   : > { %1007 = vst.msk [vmem:[#allocation3 + $0x48] sm:$0xff] %vm816_vm1, %v1000_v58  ;;  %v737_v61 = vpop.f32.mrb[44].mxu0  ;;  %v1055_v62 = vld [vmem:[#allocation2 + $0x8d] sm:$0xff]  ;;  %v1056_v63 = vld [vmem:[#allocation2 + $0x95] sm:$0xff]  ;;  %1286 = vst.msk [vmem:[#allocation3 + $0x38] sm:$0xff] %vm816_vm1, %v1279_v60 }
 0x16a   : > { %v738_v0 = vadd.f32 %v6090_v48, %v737_v61  ;;  %v739_v1 = vpop.f32.mrb[45].mxu0  ;;  %1070 = vrot.lane.b32.xlu1 %v1055_v62, %s5899_s8  ;;  %1072 = vrot.lane.b32.xlu0 %v1056_v63, %s5899_s8  ;;  %v1335_v9 = vld [vmem:[#allocation2 + $0x98] sm:$0xff]  ;;  %v5610_v50 = vld [vmem:[%s7429_s3 + $0x70] sm:$0xff]  }
 0x16b   : > { %v740_v3 = vpop.f32.mrb[46].mxu0  ;;  %v5611_v51 = vld [vmem:[%s7429_s3 + $0x30] sm:$0xff]   ;;  %5128 = vmatprep.subr.bf16.mxu1 %v5610_v50  ;;  %v5612_v57 = vld [vmem:[%s7429_s3 + $0x78] sm:$0xff]  }
 0x16c   : > { %v805_v5 = vmax.f32 %v738_v0, 0.0  ;;  %v741_v6 = vadd.f32 %v6090_v48, %v740_v3  ;;  %v742_v7 = vpop.f32.mrb[47].mxu0  ;;  %5129 = vmatpush3.bf16.msra.mxu1 %v5611_v51  ;;  %v5613_v61 = vld [vmem:[%s7429_s3 + $0x38] sm:$0xff]  }
 0x16d   : > { %v1001_v10 = vld [vmem:[#allocation2 + $0x9c] sm:$0xff]  ;;  %5130 = vmatprep.subr.bf16.mxu1 %v5612_v57  ;;  %v1239_v57 = vld [vmem:[#allocation2 + $0x66] sm:$0xff] }
 0x16e   : > { %839 = vst.msk [vmem:[#allocation2 + $0xb0] sm:$0xff] %vm816_vm1, %v805_v5  ;;  %v806_v11 = vmax.f32 %v741_v6, 0.0  ;;  %1350 = vrot.lane.b32.xlu1 %v1335_v9, %s5899_s8  ;;  %1008 = vst.msk [vmem:[#allocation3 + $0x68] sm:$0xff] %vm816_vm1, %v1001_v10  ;;  %v1280_v12 = vld [vmem:[#allocation2 + $0x9f] sm:$0xff] }
 0x16f   : > { %v1058_v13 = vld [vmem:[#allocation2 + $0xa5] sm:$0xff]  ;;  %1287 = vst.msk [vmem:[#allocation3 + $0x58] sm:$0xff] %vm816_vm1, %v1280_v12  ;;  %v1057_v18 = vld [vmem:[#allocation2 + $0x9d] sm:$0xff] }
 0x170   : > { %v1002_v15 = vld [vmem:[#allocation2 + $0xa4] sm:$0xff]  ;;  %840 = vst.msk [vmem:[#allocation2 + $0xb8] sm:$0xff] %vm816_vm1, %v806_v11  ;;  %1076 = vrot.lane.b32.xlu0 %v1058_v13, %s5899_s8  ;;  %5131 = vmatpush3.bf16.msra.mxu1 %v5613_v61  ;;  %v1196_v50 = vld [vmem:[#allocation2 + $0x1c] sm:$0xff] }
 0x171   : > { %1009 = vst.msk [vmem:[#allocation3 + $0x88] sm:$0xff] %vm816_vm1, %v1002_v15  ;;  %v1281_v16 = vld [vmem:[#allocation2 + $0xa7] sm:$0xff]  ;;  %v745_v17 = vpop.f32.mrb[48].mxu0  ;;  %5156 = vmatprep.subr.bf16.mxu1 %v5614_v14  ;;  %v1157_v61 = vld [vmem:[#allocation2 + $0x75] sm:$0xff] }
 0x172   : > { %1288 = vst.msk [vmem:[#allocation3 + $0x78] sm:$0xff] %vm816_vm1, %v1281_v16  ;;  %v746_v19 = vadd.f32 %v6090_v48, %v745_v17  ;;  %v747_v20 = vpop.f32.mrb[49].mxu0  ;;  %1074 = vrot.lane.b32.xlu1 %v1057_v18, %s5899_s8 }
 0x173   : > { %v748_v21 = vpop.f32.mrb[50].mxu0 }
 0x174   : > { %v807_v23 = vmax.f32 %v746_v19, 0.0  ;;  %v749_v24 = vadd.f32 %v6090_v48, %v748_v21  ;;  %v750_v25 = vpop.f32.mrb[51].mxu0 }
 0x175   : > { %v1059_v27 = vld [vmem:[#allocation2 + $0xad] sm:$0xff] }
 0x176   : > { %v1003_v28 = vld [vmem:[#allocation2 + $0xac] sm:$0xff]  ;;  %841 = vst.msk [vmem:[#allocation2 + $0xc0] sm:$0xff] %vm816_vm1, %v807_v23  ;;  %v808_v29 = vmax.f32 %v749_v24, 0.0  ;;  %1078 = vrot.lane.b32.xlu1 %v1059_v27, %s5899_s8 }
 0x177   : > { %1010 = vst.msk [vmem:[#allocation3 + $0xa8] sm:$0xff] %vm816_vm1, %v1003_v28  ;;  %v1282_v30 = vld [vmem:[#allocation2 + $0xaf] sm:$0xff]  ;;  %v1283_v35 = vld [vmem:[#allocation2 + $0xb7] sm:$0xff] }
 0x178   : > { %v1060_v31 = vld [vmem:[#allocation2 + $0xb5] sm:$0x7f]  ;;  %1289 = vst.msk [vmem:[#allocation3 + $0x98] sm:$0xff] %vm816_vm1, %v1282_v30  ;;  %842 = vst.msk [vmem:[#allocation2 + $0xc8] sm:$0xff] %vm816_vm1, %v808_v29 }
 0x179   : > { %1080 = vrot.lane.b32.xlu0 %v1060_v31, %s5899_s8  ;;  %v1004_v34 = vld [vmem:[#allocation2 + $0xb4] sm:$0x7f]  ;;  %v753_v36 = vpop.f32.mrb[52].mxu0  ;;  %1290 = vst.msk [vmem:[#allocation3 + $0xb8] sm:$0xff] %vm816_vm1, %v1283_v35 }
 0x17a   : > { %1011 = vst.msk [vmem:[#allocation3 + $0xc8] sm:$0x7f] %vm864_vm2, %v1004_v34  ;;  %v754_v37 = vadd.f32 %v6090_v48, %v753_v36  ;;  %v755_v38 = vpop.f32.mrb[53].mxu0 }
 0x17b   : > { %v756_v40 = vpop.f32.mrb[54].mxu0 }
 0x17c   : > { %v809_v42 = vmax.f32 %v754_v37, 0.0  ;;  %v757_v43 = vadd.f32 %v6090_v48, %v756_v40  ;;  %v758_v44 = vpop.f32.mrb[55].mxu0  ;;  %v1155_v40 = vld [vmem:[#allocation2 + $0x65] sm:$0xff] }
 0x17d   : > { %v1284_v46 = vld [vmem:[#allocation2 + $0xbf] sm:$0x7f]  ;;  %v1337_v44 = vld [vmem:[#allocation2 + $0xa8] sm:$0xff] }
 0x17e   : > { %843 = vst.msk [vmem:[#allocation2 + $0xd0] sm:$0xff] %vm816_vm1, %v809_v42  ;;  %v810_v47 = vmax.f32 %v757_v43, 0.0  ;;  %v1154_v42 = vld [vmem:[#allocation2 + $0x5d] sm:$0xff] }
 0x17f   : > { %1291 = vst.msk [vmem:[#allocation3 + $0xd8] sm:$0x7f] %vm864_vm2, %v1284_v46  ;;  %v1012_v49 = vld [vmem:[#allocation2 + $0xc6] sm:$0xff] }
 0x180   : > { %844 = vst.msk [vmem:[#allocation2 + $0xd8] sm:$0xff] %vm816_vm1, %v810_v47  ;;  %1026 = vrot.lane.b32.xlu0 %v1012_v49, %s5900_s17  ;;  %v1096_v56 = vld [vmem:[#allocation2 + $0xc7] sm:$0xff] }
 0x181   : > { %v761_v52 = vpop.f32.mrb[56].mxu0  ;;  %v1336_v46 = vld [vmem:[#allocation2 + $0xa0] sm:$0xff] }
 0x182   : > { %v762_v53 = vadd.f32 %v6090_v48, %v761_v52  ;;  %v763_v54 = vpop.f32.mrb[57].mxu0  ;;  %v1197_v49 = vld [vmem:[#allocation2 + $0x24] sm:$0xff] }
 0x183   : > { %v764_v55 = vpop.f32.mrb[58].mxu0 }
 0x184   : > { %v811_v58 = vmax.f32 %v762_v53, 0.0  ;;  %v765_v59 = vadd.f32 %v6090_v48, %v764_v55  ;;  %v766_v60 = vpop.f32.mrb[59].mxu0  ;;  %1110 = vrot.lane.b32.xlu0 %v1096_v56, %s5901_s18 }
 0x185   : > { %v1097_v62 = vld [vmem:[#allocation2 + $0xcf] sm:$0xff] }
 0x186   : > { %845 = vst.msk [vmem:[#allocation2 + $0xe0] sm:$0xff] %vm816_vm1, %v811_v58  ;;  %v812_v63 = vmax.f32 %v765_v59, 0.0  ;;  %1112 = vrot.lane.b32.xlu1 %v1097_v62, %s5901_s18  ;;  %v1013_v0 = vld [vmem:[#allocation2 + $0xce] sm:$0xff]  ;;  %v1238_v58 = vld [vmem:[#allocation2 + $0x5e] sm:$0xff] }
 0x187   : > { %v1014_v4 = vld [vmem:[#allocation2 + $0xd6] sm:$0xff]  ;;  %v1156_v62 = vld [vmem:[#allocation2 + $0x6d] sm:$0xff] }
 0x188   : > { %846 = vst.msk [vmem:[#allocation2 + $0xe8] sm:$0xff] %vm816_vm1, %v812_v63  ;;  %1028 = vrot.lane.b32.xlu0 %v1013_v0, %s5900_s17  ;;  %v1098_v11 = vld [vmem:[#allocation2 + $0xd7] sm:$0xff] }
 0x189   : > { %v769_v1 = vpop.f32.mrb[60].mxu0  ;;  %v1292_v17 = vld [vmem:[#allocation2 + $0xd1] sm:$0xff] }
 0x18a   : > { %v770_v2 = vadd.f32 %v6090_v48, %v769_v1  ;;  %v771_v3 = vpop.f32.mrb[61].mxu0  ;;  %v1376_v22 = vld [vmem:[#allocation2 + $0xd2] sm:$0xff] }
 0x18b   : > { %v772_v5 = vpop.f32.mrb[62].mxu0  ;;  %v1339_v1 = vld [vmem:[#allocation2 + $0xb8] sm:$0xff] }
 0x18c   : > { %v813_v6 = vmax.f32 %v770_v2, 0.0  ;;  %1030 = vrot.lane.b32.xlu0 %v1014_v4, %s5900_s17  ;;  %v773_v7 = vadd.f32 %v6090_v48, %v772_v5  ;;  %v774_v8 = vpop.f32.mrb[63].mxu0  ;;  %v1338_v2 = vld [vmem:[#allocation2 + $0xb0] sm:$0xff] }
 0x18d   : > { %v1015_v9 = vld [vmem:[#allocation2 + $0xde] sm:$0xff]  ;;  %v1199_v5 = vld [vmem:[#allocation2 + $0x34] sm:$0xff] }
 0x18e   : > { %847 = vst.msk [vmem:[#allocation2 + $0xf0] sm:$0xff] %vm816_vm1, %v813_v6  ;;  %1032 = vrot.lane.b32.xlu1 %v1015_v9, %s5900_s17  ;;  %v814_v10 = vmax.f32 %v773_v7, 0.0  ;;  %v1099_v12 = vld [vmem:[#allocation2 + $0xdf] sm:$0xff]  ;;  %v1198_v6 = vld [vmem:[#allocation2 + $0x2c] sm:$0xff] }
 0x18f   : > { %v1293_v21 = vld [vmem:[#allocation2 + $0xd9] sm:$0xff]  ;;  %v1100_v27 = vld [vmem:[#allocation2 + $0xe7] sm:$0xff] }
 0x190   : > { %1114 = vrot.lane.b32.xlu0 %v1098_v11, %s5901_s18  ;;  %848 = vst.msk [vmem:[#allocation2 + $0xf8] sm:$0xff] %vm816_vm1, %v814_v10  ;;  %v1377_v24 = vld [vmem:[#allocation2 + $0xda] sm:$0xff]  ;;  %v1378_v54 = vld [vmem:[#allocation2 + $0xe2] sm:$0xff] }
 0x191   : > { %v777_v13 = vpop.f32.mrb[64].mxu0  ;;  %v1294_v30 = vld [vmem:[#allocation2 + $0xe1] sm:$0xff] }
 0x192   : > { %1116 = vrot.lane.b32.xlu1 %v1099_v12, %s5901_s18  ;;  %v778_v15 = vadd.f32 %v6090_v48, %v777_v13  ;;  %v779_v16 = vpop.f32.mrb[65].mxu0  ;;  %v1016_v48 = vld [vmem:[#allocation2 + $0xe6] sm:$0xff]  ;;  %v925_v29 = vpop.permute.xlu0 %924 }
 0x193   : > { %v780_v18 = vpop.f32.mrb[66].mxu0  ;;  %v1240_v16 = vld [vmem:[#allocation2 + $0x6e] sm:$0xff] }
 0x194   : > { %v815_v19 = vmax.f32 %v778_v15, 0.0  ;;  %1306 = vrot.lane.b32.xlu0 %v1292_v17, %s5900_s17  ;;  %v781_v20 = vpop.f32.mrb[67].mxu0  ;;  %v1241_v15 = vld [vmem:[#allocation2 + $0x76] sm:$0xff] }
 0x195   : > { %v1017_v25 = vld [vmem:[#allocation2 + $0xee] sm:$0xff]  ;;  %v1158_v18 = vld [vmem:[#allocation2 + $0x7d] sm:$0x7f] }
 0x196   : > { %849 = vst.msk [vmem:[#allocation2 + $0x100] sm:$0xff] %vm816_vm1, %v815_v19  ;;  %1308 = vrot.lane.b32.xlu1 %v1293_v21, %s5900_s17  ;;  %v1101_v28 = vld [vmem:[#allocation2 + $0xef] sm:$0xff]  ;;  %v1340_v19 = vld [vmem:[#allocation2 + $0xc0] sm:$0x7f] }
 0x197   : > { %v1018_v34 = vld [vmem:[#allocation2 + $0xf6] sm:$0x7f]  ;;  %v1295_v36 = vld [vmem:[#allocation2 + $0xe9] sm:$0xff] }
 0x198   : > { %v927_v23 = vpop.permute.xlu1 %926  ;;  %1390 = vrot.lane.b32.xlu0 %v1376_v22, %s5901_s18  ;;  %v1102_v37 = vld [vmem:[#allocation2 + $0xf7] sm:$0x7f]  ;;  %v1379_v53 = vld [vmem:[#allocation2 + $0xea] sm:$0xff] }
 0x199   : > { %v1209_v33 = vpop.permute.xlu0 %1208  ;;  %v1296_v10 = vld [vmem:[#allocation2 + $0xf1] sm:$0xff]  ;;  %v1200_v21 = vld [vmem:[#allocation2 + $0x3c] sm:$0x7f] }
 0x19a   : > { %1392 = vrot.lane.b32.xlu1 %v1377_v24, %s5901_s18  ;;  %v1380_v13 = vld [vmem:[#allocation2 + $0xf2] sm:$0xff]  ;;  %v1242_v24 = vld [vmem:[#allocation2 + $0x7e] sm:$0x7f] }
 0x19c   : > { %1034 = vrot.lane.b32.xlu0 %v1016_v48, %s5900_s17  ;;  %v6287_v26 = vpop.permute.xlu1 %1210 }
 0x19d   : > { %v929_v38 = vpop.permute.xlu0 %928  ;;  %v1297_v9 = vld [vmem:[#allocation2 + $0xf9] sm:$0xff]  ;;  %v1298_v22 = vld [vmem:[#allocation2 + $0x101] sm:$0x7f] }
 0x19e   : > { %1036 = vrot.lane.b32.xlu1 %v1017_v25, %s5900_s17  ;;  %v1381_v12 = vld [vmem:[#allocation2 + $0xfa] sm:$0xff]  ;;  %v1382_v48 = vld [vmem:[#allocation2 + $0x102] sm:$0x7f] }
 0x1a0   : > { %1118 = vrot.lane.b32.xlu0 %v1100_v27, %s5901_s18  ;;  %v6292_v31 = vpop.permute.xlu1 %930 }
 0x1a2   : > { %1120 = vrot.lane.b32.xlu1 %v1101_v28, %s5901_s18 }
 0x1a3   : > { %v933_v43 = vpop.permute.xlu0 %932 }
 0x1a4   : > { %1310 = vrot.lane.b32.xlu0 %v1294_v30, %s5900_s17 }
 0x1a6   : > { %1252 = vrot.lane.b32.xlu1 %v1237_v32, %s5901_s18 }
 0x1a8   : > { %v6296_v35 = vpop.permute.xlu1 %934  ;;  %1038 = vrot.lane.b32.xlu0 %v1018_v34, %s5900_s17 }
 0x1aa   : > { %1312 = vrot.lane.b32.xlu1 %v1295_v36, %s5900_s17 }
 0x1ac   : > { %1122 = vrot.lane.b32.xlu0 %v1102_v37, %s5901_s18  ;;  %v6301_v41 = vpop.permute.xlu1 %936 }
 0x1ae   : > { %1172 = vrot.lane.b32.xlu1 %v1155_v40, %s5900_s17 }
 0x1b0   : > { %1170 = vrot.lane.b32.xlu0 %v1154_v42, %s5900_s17 }
 0x1b2   : > { %1354 = vrot.lane.b32.xlu1 %v1337_v44, %s5899_s8  ;;  %v881_v45 = vpop.permute.xlu1 %880 }
 0x1b3   : > { %902 = vst.msk [vmem:[#allocation3] sm:$0xff] %vm901_vm3, %v881_v45  ;;  %v969_v47 = vpop.permute.xlu0 %968 }
 0x1b4   : > { %946 = vst.msk [vmem:[#allocation3] sm:$0xff] %vm945_vm4, %v925_v29  ;;  %1352 = vrot.lane.b32.xlu0 %v1336_v46, %s5899_s8  ;;  %v5615_v46 = vld [vmem:[%s7429_s3 + $0x80] sm:$0xff]  }
 0x1b5   : > { %990 = vst.msk [vmem:[#allocation3] sm:$0xff] %vm989_vm5, %v969_v47 }
 0x1b6   : > { %1214 = vrot.lane.b32.xlu1 %v1197_v49, %s5899_s8 }
 0x1b8   : > { %v883_v51 = vpop.permute.xlu1 %882  ;;  %1212 = vrot.lane.b32.xlu0 %v1196_v50, %s5899_s8  ;;  %v5616_v50 = vld [vmem:[%s7429_s3 + $0xc8] sm:$0xff]  }
 0x1b9   : > { %v1167_v52 = vpop.permute.xlu0 %1166  ;;  %903 = vst.msk [vmem:[#allocation3 + $0x20] sm:$0xff] %vm901_vm3, %v883_v51 }
 0x1ba   : > { %1187 = vst.msk [vmem:[#allocation3 + $0x10] sm:$0xff] %vm901_vm3, %v1167_v52  ;;  %1396 = vrot.lane.b32.xlu1 %v1379_v53, %s5901_s18  ;;  %v5617_v52 = vld [vmem:[%s7429_s3 + $0x88] sm:$0xff]  }
 0x1bb   : > { %947 = vst.msk [vmem:[#allocation3 + $0x20] sm:$0xff] %vm945_vm4, %v927_v23  ;;  %1229 = vst.msk [vmem:[#allocation3 + $0x10] sm:$0xff] %vm945_vm4, %v1209_v33 }
 0x1bc   : > { %v971_v55 = vpop.permute.xlu1 %970  ;;  %1394 = vrot.lane.b32.xlu0 %v1378_v54, %s5901_s18  ;;  %v1418_v45 = vld [vmem:[#allocation3] sm:$0xff] }
 0x1bd   : > { %v1251_v56 = vpop.permute.xlu0 %1250  ;;  %991 = vst.msk [vmem:[#allocation3 + $0x20] sm:$0xff] %vm989_vm5, %v971_v55  ;;  %v5618_v54 = vld [vmem:[%s7429_s3 + $0xd0] sm:$0xff]  }
 0x1be   : > { %1271 = vst.msk [vmem:[#allocation3 + $0x10] sm:$0xff] %vm989_vm5, %v1251_v56  ;;  %1256 = vrot.lane.b32.xlu1 %v1239_v57, %s5901_s18 }
 0x1c0   : > { %v1169_v59 = vpop.permute.xlu1 %1168  ;;  %1254 = vrot.lane.b32.xlu0 %v1238_v58, %s5901_s18 }
 0x1c1   : > { %v885_v60 = vpop.permute.xlu0 %884  ;;  %1188 = vst.msk [vmem:[#allocation3 + $0x30] sm:$0xff] %vm901_vm3, %v1169_v59 }
 0x1c2   : > { %904 = vst.msk [vmem:[#allocation3 + $0x40] sm:$0xff] %vm901_vm3, %v885_v60  ;;  %1176 = vrot.lane.b32.xlu1 %v1157_v61, %s5900_s17  ;;  %v5619_v61 = vld [vmem:[%s7429_s3 + $0x90] sm:$0xff]  }
 0x1c3   : > { %1230 = vst.msk [vmem:[#allocation3 + $0x30] sm:$0xff] %vm945_vm4, %v6287_v26  ;;  %948 = vst.msk [vmem:[#allocation3 + $0x40] sm:$0xff] %vm945_vm4, %v929_v38 }
 0x1c4   : > { %v887_v63 = vpop.permute.xlu1 %886  ;;  %1174 = vrot.lane.b32.xlu0 %v1156_v62, %s5900_s17  ;;  %v1422_v40 = vld [vmem:[#allocation3 + $0x20] sm:$0xff] }
 0x1c5   : > { %v973_v0 = vpop.permute.xlu0 %972  ;;  %905 = vst.msk [vmem:[#allocation3 + $0x60] sm:$0xff] %vm901_vm3, %v887_v63  ;;  %v1446_v49 = vpack.c.bf16 %v1422_v40, %v1418_v45  ;;  %v1420_v40 = vld [vmem:[#allocation3 + $0x10] sm:$0xff] }
 0x1c6   : > { %992 = vst.msk [vmem:[#allocation3 + $0x40] sm:$0xff] %vm989_vm5, %v973_v0  ;;  %1358 = vrot.lane.b32.xlu1 %v1339_v1, %s5899_s8  ;;  %v5620_v0 = vld [vmem:[%s7429_s3 + $0xd8] sm:$0xff]  }
 0x1c7   : > { %949 = vst.msk [vmem:[#allocation3 + $0x60] sm:$0xff] %vm945_vm4, %v6292_v31 }
 0x1c8   : > { %v975_v3 = vpop.permute.xlu1 %974  ;;  %1356 = vrot.lane.b32.xlu0 %v1338_v2, %s5899_s8  ;;  %v5621_v2 = vld [vmem:[%s7429_s3 + $0x98] sm:$0xff]  }
 0x1c9   : > { %v889_v4 = vpop.permute.xlu0 %888  ;;  %993 = vst.msk [vmem:[#allocation3 + $0x60] sm:$0xff] %vm989_vm5, %v975_v3 }
 0x1ca   : > { %906 = vst.msk [vmem:[#allocation3 + $0x80] sm:$0xff] %vm901_vm3, %v889_v4  ;;  %1218 = vrot.lane.b32.xlu1 %v1199_v5, %s5899_s8  ;;  %v5622_v4 = vld [vmem:[%s7429_s3 + $0xe0] sm:$0xff]  }
 0x1cb   : > { %950 = vst.msk [vmem:[#allocation3 + $0x80] sm:$0xff] %vm945_vm4, %v933_v43 }
 0x1cc   : > { %v891_v7 = vpop.permute.xlu1 %890  ;;  %1216 = vrot.lane.b32.xlu0 %v1198_v6, %s5899_s8  ;;  %v5623_v6 = vld [vmem:[%s7429_s3 + $0xa0] sm:$0xff]  }
 0x1cd   : > { %v977_v8 = vpop.permute.xlu0 %976  ;;  %907 = vst.msk [vmem:[#allocation3 + $0xa0] sm:$0xff] %vm901_vm3, %v891_v7  ;;  %v1426_v60 = vld [vmem:[#allocation3 + $0x40] sm:$0xff] }
 0x1ce   : > { %994 = vst.msk [vmem:[#allocation3 + $0x80] sm:$0xff] %vm989_vm5, %v977_v8  ;;  %1316 = vrot.lane.b32.xlu1 %v1297_v9, %s5900_s17  ;;  %v5624_v8 = vld [vmem:[%s7429_s3 + $0xe8] sm:$0xff]  }
 0x1cf   : > { %951 = vst.msk [vmem:[#allocation3 + $0xa0] sm:$0xff] %vm945_vm4, %v6296_v35 }
 0x1d0   : > { %v979_v11 = vpop.permute.xlu1 %978  ;;  %1314 = vrot.lane.b32.xlu0 %v1296_v10, %s5900_s17  ;;  %v1430_v55 = vld [vmem:[#allocation3 + $0x60] sm:$0xff]  ;;  %v5625_v10 = vld [vmem:[%s7429_s3 + $0xa8] sm:$0xff]  }
 0x1d1   : > { %995 = vst.msk [vmem:[#allocation3 + $0xa0] sm:$0xff] %vm989_vm5, %v979_v11  ;;  %v1450_v63 = vpack.c.bf16 %v1430_v55, %v1426_v60 }
 0x1d2   : > { %1400 = vrot.lane.b32.xlu1 %v1381_v12, %s5901_s18  ;;  %v1069_v20 = vpop.permute.xlu0 %1068  ;;  %v5626_v12 = vld [vmem:[%s7429_s3 + $0xf0] sm:$0xff]  }
 0x1d4   : > { %v893_v14 = vpop.permute.xlu1 %892  ;;  %1398 = vrot.lane.b32.xlu0 %v1380_v13, %s5901_s18 }
 0x1d5   : > { %909 = vst.msk [vmem:[#allocation3 + $0xc0] sm:$0x7f] %vm908_vm6, %v893_v14 }
 0x1d6   : > { %1260 = vrot.lane.b32.xlu1 %v1241_v15, %s5901_s18  ;;  %953 = vst.msk [vmem:[#allocation3 + $0xc0] sm:$0x7f] %vm952_vm7, %v6301_v41 }
 0x1d8   : > { %v981_v17 = vpop.permute.xlu1 %980  ;;  %1258 = vrot.lane.b32.xlu0 %v1240_v16, %s5901_s18  ;;  %v1349_v23 = vpop.permute.xlu0 %1348  ;;  %v1438_v13 = vld [vmem:[#allocation3 + $0xa0] sm:$0xff] }
 0x1d9   : > { %997 = vst.msk [vmem:[#allocation3 + $0xc0] sm:$0x7f] %vm996_vm8, %v981_v17 }
 0x1da   : > { %1178 = vrot.lane.b32.xlu1 %v1158_v18, %s5900_s17  ;;  %v1434_v18 = vld [vmem:[#allocation3 + $0x80] sm:$0xff] }
 0x1dc   : > { %1360 = vrot.lane.b32.xlu0 %v1340_v19, %s5899_s8  ;;  %v1071_v25 = vpop.permute.xlu1 %1070  ;;  %v1073_v26 = vpop.permute.xlu0 %1072  ;;  %v5627_v19 = vld [vmem:[%s7429_s3 + $0xb0] sm:$0xff]  }
 0x1de   : > { %1220 = vrot.lane.b32.xlu1 %v1200_v21, %s5899_s8  ;;  %v1454_v21 = vpack.c.bf16 %v1438_v13, %v1434_v18  ;;  %v5633_v18 = vld [vmem:[%s7431_s5] sm:$0xff]  }
 0x1e0   : > { %1318 = vrot.lane.b32.xlu0 %v1298_v22, %s5900_s17  ;;  %v1351_v28 = vpop.permute.xlu1 %1350  ;;  %v5628_v22 = vld [vmem:[%s7429_s3 + $0xf8] sm:$0xff]   ;;  %s4718_s17 = scalar_lea.sflag [#allocation7], %s269_s9 }
 0x1e2   : > { %1262 = vrot.lane.b32.xlu1 %v1242_v24, %s5901_s18  ;;  %v1077_v27 = vpop.permute.xlu0 %1076  ;;  %v5629_v24 = vld [vmem:[%s7429_s3 + $0xb8] sm:$0xff]  }
 0x1e4   : > { %1402 = vrot.lane.b32.xlu0 %v1382_v48, %s5901_s18  ;;  %v1075_v30 = vpop.permute.xlu1 %1074 }
 0x1e8   : > { %v1079_v33 = vpop.permute.xlu1 %1078 }
 0x1eb   : > { %v6361_v29 = vpop.permute.xlu0 %1080 }
 0x1f2   : > { %v1027_v31 = vpop.permute.xlu0 %1026 }
 0x1f3   : > { %1047 = vst.msk [vmem:[#allocation3 + $0x8] sm:$0xff] %vm901_vm3, %v1027_v31 }
 0x1f4   : > { %1089 = vst.msk [vmem:[#allocation3 + $0x8] sm:$0xff] %vm945_vm4, %v1069_v20 }
 0x1f6   : > { %v1111_v32 = vpop.permute.xlu0 %1110 }
 0x1f7   : > { %1131 = vst.msk [vmem:[#allocation3 + $0x8] sm:$0xff] %vm989_vm5, %v1111_v32 }
 0x1f8   : > { %v1113_v35 = vpop.permute.xlu1 %1112 }
 0x1fa   : > { %v1029_v34 = vpop.permute.xlu0 %1028 }
 0x1fb   : > { %1048 = vst.msk [vmem:[#allocation3 + $0x28] sm:$0xff] %vm901_vm3, %v1029_v34 }
 0x1fc   : > { %1090 = vst.msk [vmem:[#allocation3 + $0x28] sm:$0xff] %vm945_vm4, %v1071_v25 }
 0x1fd   : > { %1132 = vst.msk [vmem:[#allocation3 + $0x28] sm:$0xff] %vm989_vm5, %v1113_v35 }
 0x1fe   : > { %v1031_v36 = vpop.permute.xlu0 %1030  ;;  %v1419_v42 = vld [vmem:[#allocation3 + $0x8] sm:$0xff] }
 0x1ff   : > { %1049 = vst.msk [vmem:[#allocation3 + $0x48] sm:$0xff] %vm901_vm3, %v1031_v36 }
 0x200   : > { %1091 = vst.msk [vmem:[#allocation3 + $0x48] sm:$0xff] %vm945_vm4, %v1073_v26  ;;  %v1033_v37 = vpop.permute.xlu1 %1032  ;;  %v1442_v26 = vld [vmem:[#allocation3 + $0xc0] sm:$0x7f] }
 0x201   : > { %1050 = vst.msk [vmem:[#allocation3 + $0x68] sm:$0xff] %vm901_vm3, %v1033_v37  ;;  %v1458_v32 = vpack.c.bf16 %v1442_v26, %v1442_v26 }
 0x202   : > { %1092 = vst.msk [vmem:[#allocation3 + $0x68] sm:$0xff] %vm945_vm4, %v1075_v30  ;;  %v1115_v38 = vpop.permute.xlu0 %1114 }
 0x203   : > { %1133 = vst.msk [vmem:[#allocation3 + $0x48] sm:$0xff] %vm989_vm5, %v1115_v38 }
 0x204   : > { %v1117_v41 = vpop.permute.xlu1 %1116  ;;  %v1423_v43 = vld [vmem:[#allocation3 + $0x28] sm:$0xff] }
 0x205   : > { %1134 = vst.msk [vmem:[#allocation3 + $0x68] sm:$0xff] %vm989_vm5, %v1117_v41  ;;  %v1447_v44 = vpack.c.bf16 %v1423_v43, %v1419_v42 }
 0x206   : > { %v1307_v47 = vpop.permute.xlu0 %1306 }
 0x207   : > { %1327 = vst.msk [vmem:[#allocation3 + $0x18] sm:$0xff] %vm901_vm3, %v1307_v47  ;;  %1757 = vmatprep.mubr.bf16.mxu1 %v1447_v44 }
 0x208   : > { %1369 = vst.msk [vmem:[#allocation3 + $0x18] sm:$0xff] %vm945_vm4, %v1349_v23  ;;  %v1309_v51 = vpop.permute.xlu1 %1308  ;;  %1758 = vmatmul.mubr.bf16.vlgmr.msra.gmra.mrb[0].mxu1 %v1446_v49 }
 0x209   : > { %1328 = vst.msk [vmem:[#allocation3 + $0x38] sm:$0xff] %vm901_vm3, %v1309_v51  ;;  %5157 = vmatpush3.bf16.msra.mxu1 %v5615_v46 }
 0x20a   : > { %1370 = vst.msk [vmem:[#allocation3 + $0x38] sm:$0xff] %vm945_vm4, %v1351_v28  ;;  %v1391_v53 = vpop.permute.xlu0 %1390  ;;  %5158 = vmatprep.subr.bf16.mxu1 %v5616_v50  ;;  %v1427_v57 = vld [vmem:[#allocation3 + $0x48] sm:$0xff] }
 0x20b   : > { %1411 = vst.msk [vmem:[#allocation3 + $0x18] sm:$0xff] %vm989_vm5, %v1391_v53 }
 0x20c   : > { %v1393_v56 = vpop.permute.xlu1 %1392  ;;  %v1431_v58 = vld [vmem:[#allocation3 + $0x68] sm:$0xff] }
 0x20d   : > { %1412 = vst.msk [vmem:[#allocation3 + $0x38] sm:$0xff] %vm989_vm5, %v1393_v56  ;;  %v1451_v59 = vpack.c.bf16 %v1431_v58, %v1427_v57  ;;  %5159 = vmatpush3.bf16.msra.mxu1 %v5617_v52 }
 0x20e   : > { %v1035_v62 = vpop.permute.xlu0 %1034  ;;  %5160 = vmatprep.subr.bf16.mxu1 %v5618_v54 }
 0x20f   : > { %1051 = vst.msk [vmem:[#allocation3 + $0x88] sm:$0xff] %vm901_vm3, %v1035_v62  ;;  %1765 = vmatprep.mubr.bf16.mxu1 %v1451_v59 }
 0x210   : > { %1093 = vst.msk [vmem:[#allocation3 + $0x88] sm:$0xff] %vm945_vm4, %v1077_v27  ;;  %v1037_v1 = vpop.permute.xlu1 %1036  ;;  %1766 = vmatmul.mubr.bf16.gmra.mrb[4].mxu1 %v1450_v63 }
 0x211   : > { %1052 = vst.msk [vmem:[#allocation3 + $0xa8] sm:$0xff] %vm901_vm3, %v1037_v1  ;;  %5161 = vmatpush3.bf16.msra.mxu1 %v5619_v61 }
 0x212   : > { %1094 = vst.msk [vmem:[#allocation3 + $0xa8] sm:$0xff] %vm945_vm4, %v1079_v33  ;;  %v1119_v3 = vpop.permute.xlu0 %1118  ;;  %5162 = vmatprep.subr.bf16.mxu1 %v5620_v0  ;;  %v1421_v33 = vld [vmem:[#allocation3 + $0x18] sm:$0xff] }
 0x213   : > { %1135 = vst.msk [vmem:[#allocation3 + $0x88] sm:$0xff] %vm989_vm5, %v1119_v3 }
 0x214   : > { %v1121_v5 = vpop.permute.xlu1 %1120 }
 0x215   : > { %1136 = vst.msk [vmem:[#allocation3 + $0xa8] sm:$0xff] %vm989_vm5, %v1121_v5  ;;  %5163 = vmatpush3.bf16.msra.mxu1 %v5621_v2 }
 0x216   : > { %v1311_v7 = vpop.permute.xlu0 %1310  ;;  %5164 = vmatprep.subr.bf16.mxu1 %v5622_v4 }
 0x217   : > { %1329 = vst.msk [vmem:[#allocation3 + $0x58] sm:$0xff] %vm901_vm3, %v1311_v7 }
 0x218   : > { %v1253_v9 = vpop.permute.xlu1 %1252 }
 0x219   : > { %1272 = vst.msk [vmem:[#allocation3 + $0x30] sm:$0xff] %vm989_vm5, %v1253_v9  ;;  %5165 = vmatpush3.bf16.msra.mxu1 %v5623_v6 }
 0x21a   : > { %v1039_v11 = vpop.permute.xlu0 %1038  ;;  %5166 = vmatprep.subr.bf16.mxu1 %v5624_v8  ;;  %v1435_v15 = vld [vmem:[#allocation3 + $0x88] sm:$0xff] }
 0x21b   : > { %1053 = vst.msk [vmem:[#allocation3 + $0xc8] sm:$0x7f] %vm908_vm6, %v1039_v11 }
 0x21c   : > { %1095 = vst.msk [vmem:[#allocation3 + $0xc8] sm:$0x7f] %vm952_vm7, %v6361_v29  ;;  %v1313_v14 = vpop.permute.xlu1 %1312  ;;  %v1439_v16 = vld [vmem:[#allocation3 + $0xa8] sm:$0xff]  ;;  %v1425_v29 = vld [vmem:[#allocation3 + $0x38] sm:$0xff] }
 0x21d   : > { %1330 = vst.msk [vmem:[#allocation3 + $0x78] sm:$0xff] %vm901_vm3, %v1313_v14  ;;  %v1455_v17 = vpack.c.bf16 %v1439_v16, %v1435_v15  ;;  %5167 = vmatpush3.bf16.msra.mxu1 %v5625_v10  ;;  %v1449_v34 = vpack.c.bf16 %v1425_v29, %v1421_v33  ;;  %v5630_v15 = vld [vmem:[%s7431_s5 + $0x1c0] sm:$0xff]  }
 0x21e   : > { %v1123_v20 = vpop.permute.xlu0 %1122  ;;  %5168 = vmatprep.subr.bf16.mxu1 %v5626_v12  ;;  %v5631_v16 = vld [vmem:[%s7431_s5 + $0x180] sm:$0xff]   ;;  %5262 = vmatprep.subr.bf16.mxu0 %v5630_v15 }
 0x21f   : > { %1137 = vst.msk [vmem:[#allocation3 + $0xc8] sm:$0x7f] %vm996_vm8, %v1123_v20  ;;  %1773 = vmatprep.mubr.bf16.mxu1 %v1455_v17  ;;  %v5632_v17 = vld [vmem:[%s7431_s5 + $0x40] sm:$0xff]   ;;  %v5635_v20 = vld [vmem:[%s7431_s5 + $0x1c8] sm:$0xff]   ;;  %5263 = vmatpush3.bf16.msra.mxu0 %v5631_v16 }
 0x220   : > { %v1173_v23 = vpop.permute.xlu1 %1172  ;;  %1774 = vmatmul.mubr.bf16.gmra.mrb[8].mxu1 %v1454_v21  ;;  %v1424_v37 = vld [vmem:[#allocation3 + $0x30] sm:$0xff]  ;;  %v5636_v21 = vld [vmem:[%s7431_s5 + $0x8] sm:$0xff]   ;;  %5264 = vmatprep.subr.bf16.mxu0 %v5635_v20 }
 0x221   : > { %1190 = vst.msk [vmem:[#allocation3 + $0x70] sm:$0xff] %vm901_vm3, %v1173_v23  ;;  %5169 = vmatpush3.bf16.msra.mxu1 %v5627_v19  ;;  %v1448_v42 = vpack.c.bf16 %v1424_v37, %v1420_v40  ;;  %v5634_v19 = vld [vmem:[%s7431_s5 + $0x48] sm:$0xff]  }
 0x222   : > { %v1171_v48 = vpop.permute.xlu0 %1170  ;;  %5170 = vmatprep.subr.bf16.mxu1 %v5628_v22  ;;  %v5637_v22 = vld [vmem:[%s7431_s5 + $0x188] sm:$0xff]  }
 0x223   : > { %1189 = vst.msk [vmem:[#allocation3 + $0x50] sm:$0xff] %vm901_vm3, %v1171_v48  ;;  %5265 = vmatpush3.bf16.msra.mxu0 %v5637_v22 }
 0x224   : > { %v1355_v25 = vpop.permute.xlu1 %1354 }
 0x225   : > { %1372 = vst.msk [vmem:[#allocation3 + $0x78] sm:$0xff] %vm945_vm4, %v1355_v25  ;;  %5171 = vmatpush3.bf16.msra.mxu1 %v5629_v24 }
 0x226   : > { %v1353_v27 = vpop.permute.xlu0 %1352  ;;  %v1443_v28 = vld [vmem:[#allocation3 + $0xc8] sm:$0x7f]  ;;  %5196 = vmatprep.subr.bf16.mxu1 %v5632_v17  ;;  %v5646_v17 = vld [vmem:[%s7431_s5 + $0x60] sm:$0xff]  }
 0x227   : > { %1371 = vst.msk [vmem:[#allocation3 + $0x58] sm:$0xff] %vm945_vm4, %v1353_v27  ;;  %v1459_v30 = vpack.c.bf16 %v1443_v28, %v1443_v28 }
 0x228   : > { %v1215_v31 = vpop.permute.xlu1 %1214 }
 0x229   : > { %1232 = vst.msk [vmem:[#allocation3 + $0x70] sm:$0xff] %vm945_vm4, %v1215_v31  ;;  %1781 = vmatprep.mubr.bf16.mxu1 %v1459_v30 }
 0x22a   : > { %v1213_v35 = vpop.permute.xlu0 %1212  ;;  %1782 = vmatmul.mubr.bf16.gmra.mrb[12].mxu1 %v1458_v32 }
 0x22b   : > { %1231 = vst.msk [vmem:[#allocation3 + $0x50] sm:$0xff] %vm945_vm4, %v1213_v35  ;;  %1821 = vmatprep.mubr.bf16.mxu1 %v1449_v34 }
 0x22c   : > { %v1397_v36 = vpop.permute.xlu1 %1396 }
 0x22d   : > { %1414 = vst.msk [vmem:[#allocation3 + $0x78] sm:$0xff] %vm989_vm5, %v1397_v36 }
 0x22e   : > { %v1395_v38 = vpop.permute.xlu0 %1394 }
 0x22f   : > { %1413 = vst.msk [vmem:[#allocation3 + $0x58] sm:$0xff] %vm989_vm5, %v1395_v38 }
 0x230   : > { %v1257_v41 = vpop.permute.xlu1 %1256 }
 0x231   : > { %1274 = vst.msk [vmem:[#allocation3 + $0x70] sm:$0xff] %vm989_vm5, %v1257_v41 }
 0x232   : > { %v1255_v43 = vpop.permute.xlu0 %1254  ;;  %1822 = vmatmul.mubr.bf16.vlgmr.msra.gmra.mrb[16].mxu1 %v1448_v42 }
 0x233   : > { %1273 = vst.msk [vmem:[#allocation3 + $0x50] sm:$0xff] %vm989_vm5, %v1255_v43  ;;  %5197 = vmatpush3.bf16.msra.mxu1 %v5633_v18  ;;  %v5647_v18 = vld [vmem:[%s7431_s5 + $0x1e0] sm:$0xff]  }
 0x234   : > { %v1177_v44 = vpop.permute.xlu1 %1176  ;;  %v1433_v47 = vld [vmem:[#allocation3 + $0x78] sm:$0xff]  ;;  %5198 = vmatprep.subr.bf16.mxu1 %v5634_v19  ;;  %v5648_v19 = vld [vmem:[%s7431_s5 + $0x20] sm:$0xff]  }
 0x235   : > { %1192 = vst.msk [vmem:[#allocation3 + $0xb0] sm:$0xff] %vm901_vm3, %v1177_v44 }
 0x236   : > { %v1175_v45 = vpop.permute.xlu0 %1174  ;;  %v1429_v46 = vld [vmem:[#allocation3 + $0x58] sm:$0xff] }
 0x237   : > { %1191 = vst.msk [vmem:[#allocation3 + $0x90] sm:$0xff] %vm901_vm3, %v1175_v45  ;;  %v1453_v49 = vpack.c.bf16 %v1433_v47, %v1429_v46  ;;  %5199 = vmatpush3.bf16.msra.mxu1 %v5636_v21  ;;  %v6500_v46 = vld [vmem:[%s7430_s4] ss:$0 sm:$0xff] }
 0x238   : > { %v1359_v50 = vpop.permute.xlu1 %1358  ;;  %v1432_v53 = vld [vmem:[#allocation3 + $0x70] sm:$0xff] }
 0x239   : > { %1829 = vmatprep.mubr.bf16.mxu1 %v1453_v49 }
 0x23a   : > { %v1357_v51 = vpop.permute.xlu0 %1356  ;;  %v1428_v52 = vld [vmem:[#allocation3 + $0x50] sm:$0xff] }
 0x23b   : > { %v1452_v54 = vpack.c.bf16 %v1432_v53, %v1428_v52 }
 0x23c   : > { %v1219_v55 = vpop.permute.xlu1 %1218 }
 0x23d   : > { %1234 = vst.msk [vmem:[#allocation3 + $0xb0] sm:$0xff] %vm945_vm4, %v1219_v55  ;;  %1830 = vmatmul.mubr.bf16.gmra.mrb[20].mxu1 %v1452_v54  ;;  %v1869_v54 = vlaneseq }
 0x23e   : > { %v1217_v56 = vpop.permute.xlu0 %1216 }
 0x23f   : > { %1233 = vst.msk [vmem:[#allocation3 + $0x90] sm:$0xff] %vm945_vm4, %v1217_v56  ;;  %vm6538_vm9 = vcmp.lt.s32.totalorder %v1869_v54, 64  ;;  %vm1893_vm11 = vcmp.ge.s32.totalorder %v1869_v54, 64  ;;  %vm1894_vm12 = vcmp.lt.s32.totalorder %v1869_v54, 128 }
 0x240   : > { %v1317_v57 = vpop.permute.xlu1 %1316  ;;  %vm6710_vm13 = vmand %vm1893_vm11, %vm1894_vm12 }
 0x241   : > { %1332 = vst.msk [vmem:[#allocation3 + $0xb8] sm:$0xff] %vm901_vm3, %v1317_v57 }
 0x242   : > { %1374 = vst.msk [vmem:[#allocation3 + $0xb8] sm:$0xff] %vm945_vm4, %v1359_v50  ;;  %v1315_v58 = vpop.permute.xlu0 %1314 }
 0x243   : > { %1331 = vst.msk [vmem:[#allocation3 + $0x98] sm:$0xff] %vm901_vm3, %v1315_v58  ;;  %v5903_v58 = vmov 1966171168  }
 0x244   : > { %1373 = vst.msk [vmem:[#allocation3 + $0x98] sm:$0xff] %vm945_vm4, %v1357_v51  ;;  %v1401_v59 = vpop.permute.xlu1 %1400 }
 0x245   : > { %1416 = vst.msk [vmem:[#allocation3 + $0xb8] sm:$0xff] %vm989_vm5, %v1401_v59  ;;  %v1884_v59 = vunpack.c.l.s4 %v5903_v58 }
 0x246   : > { %v1399_v60 = vpop.permute.xlu0 %1398 }
 0x247   : > { %1415 = vst.msk [vmem:[#allocation3 + $0x98] sm:$0xff] %vm989_vm5, %v1399_v60 }
 0x248   : > { %v1261_v61 = vpop.permute.xlu1 %1260 }
 0x249   : > { %1276 = vst.msk [vmem:[#allocation3 + $0xb0] sm:$0xff] %vm989_vm5, %v1261_v61 }
 0x24a   : > { %v1259_v62 = vpop.permute.xlu0 %1258 }
 0x24b   : > { %1275 = vst.msk [vmem:[#allocation3 + $0x90] sm:$0xff] %vm989_vm5, %v1259_v62  ;;  %v5638_v62 = vld [vmem:[%s7431_s5 + $0x50] sm:$0xff]  }
 0x24c   : > { %v1179_v63 = vpop.permute.xlu1 %1178  ;;  %v1441_v2 = vld [vmem:[#allocation3 + $0xb8] sm:$0xff]  ;;  %5200 = vmatprep.subr.bf16.mxu1 %v5638_v62 }
 0x24d   : > { %1193 = vst.msk [vmem:[#allocation3 + $0xd0] sm:$0x7f] %vm908_vm6, %v1179_v63  ;;  %v5639_v63 = vld [vmem:[%s7431_s5 + $0x1d0] sm:$0xff]  }
 0x24e   : > { %v1361_v0 = vpop.permute.xlu0 %1360  ;;  %v1437_v1 = vld [vmem:[#allocation3 + $0x98] sm:$0xff]  ;;  %5266 = vmatprep.subr.bf16.mxu0 %v5639_v63 }
 0x24f   : > { %v1457_v3 = vpack.c.bf16 %v1441_v2, %v1437_v1  ;;  %v5641_v1 = vld [vmem:[%s7431_s5 + $0x190] sm:$0xff]  }
 0x250   : > { %v1221_v4 = vpop.permute.xlu1 %1220  ;;  %v1440_v7 = vld [vmem:[#allocation3 + $0xb0] sm:$0xff]  ;;  %5267 = vmatpush3.bf16.msra.mxu0 %v5641_v1 }
 0x251   : > { %1235 = vst.msk [vmem:[#allocation3 + $0xd0] sm:$0x7f] %vm952_vm7, %v1221_v4  ;;  %1837 = vmatprep.mubr.bf16.mxu1 %v1457_v3  ;;  %v1885_v3 = vunpack.c.0.s8 %v1884_v59  ;;  %v6518_v4 = vshrl.u32 %v1869_v54, 7 }
 0x252   : > { %v1319_v5 = vpop.permute.xlu0 %1318  ;;  %v1436_v6 = vld [vmem:[#allocation3 + $0x90] sm:$0xff] }
 0x253   : > { %1333 = vst.msk [vmem:[#allocation3 + $0xd8] sm:$0x7f] %vm908_vm6, %v1319_v5  ;;  %v1456_v8 = vpack.c.bf16 %v1440_v7, %v1436_v6  ;;  %v5642_v5 = vld [vmem:[%s7431_s5 + $0x58] sm:$0xff]  }
 0x254   : > { %1375 = vst.msk [vmem:[#allocation3 + $0xd8] sm:$0x7f] %vm952_vm7, %v1361_v0  ;;  %v1263_v9 = vpop.permute.xlu1 %1262  ;;  %v5640_v0 = vld [vmem:[%s7431_s5 + $0x10] sm:$0xff]   ;;  %v5643_v6 = vld [vmem:[%s7431_s5 + $0x1d8] sm:$0xff]  }
 0x255   : > { %1277 = vst.msk [vmem:[#allocation3 + $0xd0] sm:$0x7f] %vm996_vm8, %v1263_v9  ;;  %1838 = vmatmul.mubr.bf16.gmra.mrb[24].mxu1 %v1456_v8  ;;  %v5644_v7 = vld [vmem:[%s7431_s5 + $0x18] sm:$0xff]   ;;  %5268 = vmatprep.subr.bf16.mxu0 %v5643_v6 }
 0x256   : > { %v1403_v10 = vpop.permute.xlu0 %1402  ;;  %5201 = vmatpush3.bf16.msra.mxu1 %v5640_v0  ;;  %v5645_v9 = vld [vmem:[%s7431_s5 + $0x198] sm:$0xff]  }
 0x257   : > { %1417 = vst.msk [vmem:[#allocation3 + $0xd8] sm:$0x7f] %vm996_vm8, %v1403_v10  ;;  %5202 = vmatprep.subr.bf16.mxu1 %v5642_v5  ;;  %5269 = vmatpush3.bf16.msra.mxu0 %v5645_v9  ;;  %v5659_v9 = vld [vmem:[%s7431_s5 + $0x1f8] sm:$0xff]  }
 0x258   : > { %5270 = vmatprep.subr.bf16.mxu0 %v5647_v18 }
 0x25a   : > { %5203 = vmatpush3.bf16.msra.mxu1 %v5644_v7 }
 0x25b   : > { %5204 = vmatprep.subr.bf16.mxu1 %v5646_v17 }
 0x25c   : > { %v1444_v11 = vld [vmem:[#allocation3 + $0xd0] sm:$0x7f] }
 0x25d   : > { %v1460_v14 = vpack.c.bf16 %v1444_v11, %v1444_v11  ;;  %v6534_v11 = vsub.s32 %v1885_v3, %v6518_v4 }
 0x25e   : > { %v1445_v12 = vld [vmem:[#allocation3 + $0xd8] sm:$0x7f]  ;;  %5205 = vmatpush3.bf16.msra.mxu1 %v5648_v19 }
 0x25f   : > { %v1461_v13 = vpack.c.bf16 %v1445_v12, %v1445_v12 }
 0x261   : > { %1845 = vmatprep.mubr.bf16.mxu1 %v1461_v13 }
 0x262   : > { %1846 = vmatmul.mubr.bf16.gmra.mrb[28].mxu1 %v1460_v14 }
 0x2db   : > { %v5132_v23 = vpop.f32.mrb[0].mxu1 }
 0x2dc   : > { %v5133_v24 = vpop.f32.mrb[1].mxu1 }
 0x2dd   : > { %v5134_v48 = vadd.f32 %v5133_v24, %v5132_v23  ;;  %v5135_v25 = vpop.f32.mrb[2].mxu1 }
 0x2de   : > { %v5136_v26 = vpop.f32.mrb[3].mxu1 }
 0x2df   : > { %v5137_v27 = vadd.f32 %v5136_v26, %v5135_v25  ;;  %v1760_v50 = vadd.f32 %v5134_v48, %v6500_v46 }
 0x2e1   : > { %v1763_v55 = vadd.f32 %v5137_v27, %v6500_v46 }
 0x2e3   : > { %v5138_v28 = vpop.f32.mrb[4].mxu1 }
 0x2e4   : > { %v5139_v29 = vpop.f32.mrb[5].mxu1 }
 0x2e5   : > { %v5140_v30 = vadd.f32 %v5139_v29, %v5138_v28  ;;  %v5141_v31 = vpop.f32.mrb[6].mxu1 }
 0x2e6   : > { %v5142_v32 = vpop.f32.mrb[7].mxu1 }
 0x2e7   : > { %v5143_v33 = vadd.f32 %v5142_v32, %v5141_v31  ;;  %v1768_v12 = vadd.f32 %v5140_v30, %v6500_v46  ;;  %v5649_v31 = vld [vmem:[%s7431_s5 + $0x1a0] sm:$0xff]  }
 0x2e8   : > { %5271 = vmatpush3.bf16.msra.mxu0 %v5649_v31 }
 0x2e9   : > { %v1771_v20 = vadd.f32 %v5143_v33, %v6500_v46 }
 0x2f3   : > { %v5144_v34 = vpop.f32.mrb[8].mxu1 }
 0x2f4   : > { %v5145_v35 = vpop.f32.mrb[9].mxu1 }
 0x2f5   : > { %v6491_v36 = vadd.f32 %v5145_v35, %v5144_v34  ;;  %v5147_v37 = vpop.f32.mrb[10].mxu1  ;;  %v5650_v35 = vld [vmem:[%s7431_s5 + $0x68] sm:$0xff]  }
 0x2f6   : > { %v5148_v38 = vpop.f32.mrb[11].mxu1  ;;  %5206 = vmatprep.subr.bf16.mxu1 %v5650_v35 }
 0x2f7   : > { %v6493_v40 = vadd.f32 %v5148_v38, %v5147_v37 }
 0x2fd   : > { %v5150_v41 = vpop.f32.mrb[12].mxu1 }
 0x2fe   : > { %v5151_v42 = vpop.f32.mrb[13].mxu1 }
 0x2ff   : > { %v6495_v43 = vadd.f32 %v5151_v42, %v5150_v41  ;;  %v5153_v44 = vpop.f32.mrb[14].mxu1 }
 0x300   : > { %v5154_v45 = vpop.f32.mrb[15].mxu1 }
 0x305   : > { %v5172_v47 = vpop.f32.mrb[16].mxu1 }
 0x306   : > { %v5173_v49 = vpop.f32.mrb[17].mxu1 }
 0x307   : > { %v5174_v51 = vadd.f32 %v5173_v49, %v5172_v47  ;;  %v5175_v52 = vpop.f32.mrb[18].mxu1 }
 0x308   : > { %v5176_v53 = vpop.f32.mrb[19].mxu1 }
 0x309   : > { %v1824_v56 = vadd.f32 %v5174_v51, %v1760_v50  ;;  %v5177_v57 = vadd.f32 %v5176_v53, %v5175_v52  ;;  %v5651_v51 = vld [vmem:[%s7431_s5 + $0x1e8] sm:$0xff]  }
 0x30a   : > { %v5652_v52 = vld [vmem:[%s7431_s5 + $0x28] sm:$0xff]   ;;  %5272 = vmatprep.subr.bf16.mxu0 %v5651_v51 }
 0x30b   : > { %v1853_v60 = vmax.f32 %v1824_v56, 0.0  ;;  %v1827_v61 = vadd.f32 %v5177_v57, %v1763_v55  ;;  %v5653_v53 = vld [vmem:[%s7431_s5 + $0x1a8] sm:$0xff]   ;;  %v5654_v56 = vld [vmem:[%s7431_s5 + $0x70] sm:$0xff]   ;;  %5207 = vmatpush3.bf16.msra.mxu1 %v5652_v52 }
 0x30c   : > { %v5655_v57 = vld [vmem:[%s7431_s5 + $0x1f0] sm:$0xff]   ;;  %5273 = vmatpush3.bf16.msra.mxu0 %v5653_v53  ;;  %5208 = vmatprep.subr.bf16.mxu1 %v5654_v56 }
 0x30d   : > { %1860 = vst.msk [vmem:[#allocation4] sm:$0xff] %vm563_vm0, %v1853_v60  ;;  %v1854_v2 = vmax.f32 %v1827_v61, 0.0  ;;  %v5656_v60 = vld [vmem:[%s7431_s5 + $0x30] sm:$0xff]   ;;  %5274 = vmatprep.subr.bf16.mxu0 %v5655_v57 }
 0x30e   : > { %v5657_v61 = vld [vmem:[%s7431_s5 + $0x1b0] sm:$0xff]  }
 0x30f   : > { %1861 = vst.msk [vmem:[#allocation4 + $0x8] sm:$0xff] %vm563_vm0, %v1854_v2  ;;  %5209 = vmatpush3.bf16.msra.mxu1 %v5656_v60 }
 0x310   : > { %v5178_v8 = vpop.f32.mrb[20].mxu1  ;;  %5275 = vmatpush3.bf16.msra.mxu0 %v5657_v61 }
 0x311   : > { %v5179_v10 = vpop.f32.mrb[21].mxu1  ;;  %5276 = vmatprep.subr.bf16.mxu0 %v5659_v9 }
 0x312   : > { %v5180_v13 = vadd.f32 %v5179_v10, %v5178_v8  ;;  %v5181_v14 = vpop.f32.mrb[22].mxu1  ;;  %v5658_v8 = vld [vmem:[%s7431_s5 + $0x78] sm:$0xff]  }
 0x313   : > { %v5182_v16 = vpop.f32.mrb[23].mxu1  ;;  %v5660_v10 = vld [vmem:[%s7431_s5 + $0x38] sm:$0xff]   ;;  %5210 = vmatprep.subr.bf16.mxu1 %v5658_v8 }
 0x314   : > { %v1832_v21 = vadd.f32 %v5180_v13, %v1768_v12  ;;  %v5183_v22 = vadd.f32 %v5182_v16, %v5181_v14  ;;  %v4888_v23 = vld.sshfl [vmem:[#allocation4 + $0x3] sm:$0x1 pattern:$0x75316420]  ;;  %v1897_v24 = vld [vmem:[#allocation4 + $0x2] sm:$0x1]  ;;  %5211 = vmatpush3.bf16.msra.mxu1 %v5660_v10 }
 0x315   : > { %v1914_v48 = vrot.slane %v4888_v23, %v6534_v11  ;;  %v4887_v25 = vld.sshfl [vmem:[#allocation4 + $0x1] sm:$0x1 pattern:$0x75316420]  ;;  %1898 = vst.msk [vmem:[#allocation5 + $0x1] sm:$0x1] %vm6538_vm9, %v1897_v24 }
 0x316   : > { %v1868_v26 = vld [vmem:[#allocation4] sm:$0x1]  ;;  %v1855_v27 = vmax.f32 %v1832_v21, 0.0  ;;  %v1835_v28 = vadd.f32 %v5183_v22, %v1771_v20  ;;  %v1889_v29 = vrot.slane %v4887_v25, %v6534_v11  ;;  %v1941_v33 = vld [vmem:[#allocation4 + $0x6] sm:$0x1]  ;;  %v5661_v12 = vld [vmem:[%s7431_s5 + $0x1b8] sm:$0xff]   ;;  %v1776_v25 = vadd.f32 %v6491_v36, %v6500_v46 }
 0x317   : > { %v4890_v30 = vld.sshfl [vmem:[#allocation4 + $0x7] sm:$0x1 pattern:$0x75316420]  ;;  %1873 = vst.msk [vmem:[#allocation5] sm:$0x1] %vm6538_vm9, %v1868_v26  ;;  %1915 = vrot.lane.b32.xlu1 %v1914_v48, %s5899_s8  ;;  %5277 = vmatpush3.bf16.msra.mxu0 %v5661_v12 }
 0x318   : > { %v4889_v32 = vld.sshfl [vmem:[#allocation4 + $0x5] sm:$0x1 pattern:$0x75316420]  ;;  %1862 = vst.msk [vmem:[#allocation4 + $0x10] sm:$0xff] %vm563_vm0, %v1855_v27  ;;  %v1856_v34 = vmax.f32 %v1835_v28, 0.0  ;;  %1890 = vrot.lane.b32.xlu0 %v1889_v29, %s5899_s8  ;;  %v1958_v37 = vrot.slane %v4890_v30, %v6534_v11 }
 0x319   : > { %1942 = vst.msk [vmem:[#allocation5 + $0x3] sm:$0x1] %vm6538_vm9, %v1941_v33  ;;  %v4892_v38 = vld.sshfl [vmem:[#allocation4 + $0xc] sm:$0x1 pattern:$0x75316420]  ;;  %v1936_v42 = vrot.slane %v4889_v32, %v6534_v11  ;;  %v1779_v32 = vadd.f32 %v6493_v40, %v6500_v46 }
 0x31a   : > { %v1919_v41 = vld [vmem:[#allocation4 + $0x4] sm:$0x1]  ;;  %1863 = vst.msk [vmem:[#allocation4 + $0x18] sm:$0xff] %vm563_vm0, %v1856_v34  ;;  %v1985_v45 = vld [vmem:[#allocation4 + $0xb] sm:$0x1]  ;;  %v2002_v55 = vrot.slane %v4892_v38, %v6534_v11  ;;  %v5662_v20 = vld [vmem:[%s7431_s5 + $0xc0] sm:$0xff]  }
 0x31b   : > { %v4891_v44 = vld.sshfl [vmem:[#allocation4 + $0x9] sm:$0x1 pattern:$0x75316420]  ;;  %1920 = vst.msk [vmem:[#allocation5 + $0x2] sm:$0x1] %vm6538_vm9, %v1919_v41  ;;  %1959 = vrot.lane.b32.xlu1 %v1958_v37, %s5899_s8  ;;  %5218 = vmatprep.subr.bf16.mxu1 %v5662_v20 }
 0x31c   : > { %1986 = vst.msk [vmem:[#allocation5 + $0x5] sm:$0x1] %vm6538_vm9, %v1985_v45  ;;  %v1963_v47 = vld [vmem:[#allocation4 + $0x8] sm:$0x1]  ;;  %v2029_v49 = vld [vmem:[#allocation4 + $0xf] sm:$0x1]  ;;  %1937 = vrot.lane.b32.xlu0 %v1936_v42, %s5899_s8  ;;  %v1980_v58 = vrot.slane %v4891_v44, %v6534_v11 }
 0x31d   : > { %v2007_v50 = vld [vmem:[#allocation4 + $0xd] sm:$0x1]  ;;  %1964 = vst.msk [vmem:[#allocation5 + $0x4] sm:$0x1] %vm6538_vm9, %v1963_v47  ;;  %2030 = vst.msk [vmem:[#allocation5 + $0x7] sm:$0x1] %vm6538_vm9, %v2029_v49  ;;  %v1784_v47 = vadd.f32 %v6495_v43, %v6500_v46 }
 0x31e   : > { %2008 = vst.msk [vmem:[#allocation5 + $0x6] sm:$0x1] %vm6538_vm9, %v2007_v50  ;;  %v4893_v59 = vld.sshfl [vmem:[#allocation4 + $0xe] sm:$0x1 pattern:$0x75316420] }
 0x31f   : > { %2003 = vrot.lane.b32.xlu1 %v2002_v55, %s5899_s8  ;;  %v4894_v62 = vld.sshfl [vmem:[#allocation4 + $0x10] sm:$0x1 pattern:$0x75316420]  ;;  %v2073_v63 = vld [vmem:[#allocation4 + $0x13] sm:$0x1]  ;;  %v2024_v3 = vrot.slane %v4893_v59, %v6534_v11 }
 0x320   : > { %1981 = vrot.lane.b32.xlu0 %v1980_v58, %s5899_s8  ;;  %v2046_v0 = vrot.slane %v4894_v62, %v6534_v11  ;;  %2074 = vst.msk [vmem:[#allocation5 + $0x9] sm:$0x1] %vm6538_vm9, %v2073_v63  ;;  %v2051_v1 = vld [vmem:[#allocation4 + $0x11] sm:$0x1]  ;;  %v2095_v6 = vld [vmem:[#allocation4 + $0x16] sm:$0x1] }
 0x321   : > { %2052 = vst.msk [vmem:[#allocation5 + $0x8] sm:$0x1] %vm6538_vm9, %v2051_v1  ;;  %v2117_v2 = vld [vmem:[#allocation4 + $0x18] sm:$0x1]  ;;  %2096 = vst.msk [vmem:[#allocation5 + $0xa] sm:$0x1] %vm6538_vm9, %v2095_v6 }
 0x322   : > { %v4896_v5 = vld.sshfl [vmem:[#allocation4 + $0x14] sm:$0x1 pattern:$0x75316420]  ;;  %2118 = vst.msk [vmem:[#allocation5 + $0xb] sm:$0x1] %vm6538_vm9, %v2117_v2 }
 0x323   : > { %2047 = vrot.lane.b32.xlu1 %v2046_v0, %s5899_s8  ;;  %v4895_v7 = vld.sshfl [vmem:[#allocation4 + $0x12] sm:$0x1 pattern:$0x75316420]  ;;  %v2090_v13 = vrot.slane %v4896_v5, %v6534_v11  ;;  %v2161_v14 = vld [vmem:[#allocation4 + $0x1c] sm:$0x1] }
 0x324   : > { %2025 = vrot.lane.b32.xlu0 %v2024_v3, %s5899_s8  ;;  %v2068_v16 = vrot.slane %v4895_v7, %v6534_v11  ;;  %v4898_v17 = vld.sshfl [vmem:[#allocation4 + $0x19] sm:$0x1 pattern:$0x75316420]  ;;  %2162 = vst.msk [vmem:[#allocation5 + $0xd] sm:$0x1] %vm6538_vm9, %v2161_v14 }
 0x325   : > { %v2139_v18 = vld [vmem:[#allocation4 + $0x1a] sm:$0x1]  ;;  %v4897_v19 = vld.sshfl [vmem:[#allocation4 + $0x17] sm:$0x1 pattern:$0x75316420]  ;;  %v2134_v48 = vrot.slane %v4898_v17, %v6534_v11 }
 0x326   : > { %2140 = vst.msk [vmem:[#allocation5 + $0xc] sm:$0x1] %vm6538_vm9, %v2139_v18  ;;  %v5663_v21 = vld [vmem:[%s7431_s5 + $0x2c0] sm:$0xff]   ;;  %v2183_v23 = vld [vmem:[#allocation4 + $0x1e] sm:$0x1]  ;;  %v2112_v28 = vrot.slane %v4897_v19, %v6534_v11 }
 0x327   : > { %2091 = vrot.lane.b32.xlu1 %v2090_v13, %s5899_s8  ;;  %5306 = vmatprep.subr.bf16.mxu0 %v5663_v21  ;;  %2184 = vst.msk [vmem:[#allocation5 + $0xe] sm:$0x1] %vm6538_vm9, %v2183_v23  ;;  %v4900_v29 = vld.sshfl [vmem:[#allocation4 + $0x1d] sm:$0x1 pattern:$0x75316420] }
 0x328   : > { %2069 = vrot.lane.b32.xlu0 %v2068_v16, %s5899_s8  ;;  %v5184_v22 = vpop.f32.mrb[24].mxu1  ;;  %v4899_v31 = vld.sshfl [vmem:[#allocation4 + $0x1b] sm:$0x1 pattern:$0x75316420]  ;;  %v2178_v35 = vrot.slane %v4900_v29, %v6534_v11  ;;  %v6735_v29 = vsub.s32 1, %v6518_v4 }
 0x329   : > { %v5185_v24 = vpop.f32.mrb[25].mxu1  ;;  %v2156_v38 = vrot.slane %v4899_v31, %v6534_v11  ;;  %v4901_v41 = vld.sshfl [vmem:[#allocation4 + $0x1f] sm:$0x1 pattern:$0x75316420]  ;;  %v6741_v31 = vsub.s32 0, %v6518_v4 }
 0x32a   : > { %v5186_v26 = vadd.f32 %v5185_v24, %v5184_v22  ;;  %v5187_v27 = vpop.f32.mrb[26].mxu1  ;;  %v2200_v40 = vrot.slane %v4901_v41, %v6534_v11 }
 0x32b   : > { %v5188_v30 = vpop.f32.mrb[27].mxu1  ;;  %2135 = vrot.lane.b32.xlu1 %v2134_v48, %s5899_s8 }
 0x32c   : > { %v1840_v33 = vadd.f32 %v5186_v26, %v1776_v25  ;;  %v5189_v34 = vadd.f32 %v5188_v30, %v5187_v27  ;;  %2113 = vrot.lane.b32.xlu0 %v2112_v28, %s5899_s8  ;;  %v6738_v30 = vsub.s32 7, %v6518_v4 }
 0x32e   : > { %v1857_v37 = vmax.f32 %v1840_v33, 0.0  ;;  %v1843_v36 = vadd.f32 %v5189_v34, %v1779_v32  ;;  %v6744_v32 = vsub.s32 6, %v6518_v4  ;;  %v6747_v33 = vsub.s32 3, %v6518_v4 }
 0x32f   : > { %2179 = vrot.lane.b32.xlu1 %v2178_v35, %s5899_s8 }
 0x330   : > { %1864 = vst.msk [vmem:[#allocation4 + $0x20] sm:$0xff] %vm563_vm0, %v1857_v37  ;;  %v1858_v42 = vmax.f32 %v1843_v36, 0.0  ;;  %2157 = vrot.lane.b32.xlu0 %v2156_v38, %s5899_s8 }
 0x332   : > { %1865 = vst.msk [vmem:[#allocation4 + $0x28] sm:$0xff] %vm563_vm0, %v1858_v42 }
 0x334   : > { %2201 = vrot.lane.b32.xlu0 %v2200_v40, %s5899_s8 }
 0x335   : > { %v5190_v44 = vpop.f32.mrb[28].mxu1 }
 0x336   : > { %v5191_v45 = vpop.f32.mrb[29].mxu1 }
 0x337   : > { %v5192_v49 = vadd.f32 %v5191_v45, %v5190_v44  ;;  %v5193_v50 = vpop.f32.mrb[30].mxu1  ;;  %v4902_v51 = vld.sshfl [vmem:[#allocation4 + $0x22] sm:$0x1 pattern:$0x75316420] }
 0x338   : > { %v5194_v52 = vpop.f32.mrb[31].mxu1  ;;  %v2222_v53 = vrot.slane %v4902_v51, %v6534_v11  ;;  %v4903_v55 = vld.sshfl [vmem:[#allocation4 + $0x24] sm:$0x1 pattern:$0x75316420]  ;;  %v5664_v50 = vld [vmem:[%s7431_s5 + $0x80] sm:$0xff]  }
 0x339   : > { %v1848_v56 = vadd.f32 %v5192_v49, %v1784_v47  ;;  %v2244_v57 = vrot.slane %v4903_v55, %v6534_v11  ;;  %v4904_v58 = vld.sshfl [vmem:[#allocation4 + $0x26] sm:$0x1 pattern:$0x75316420]  ;;  %v2205_v59 = vld [vmem:[#allocation4 + $0x21] sm:$0x1] }
 0x33a   : > { %2223 = vrot.lane.b32.xlu1 %v2222_v53, %s5899_s8  ;;  %v4905_v60 = vld.sshfl [vmem:[#allocation4 + $0x28] sm:$0x1 pattern:$0x75316420]  ;;  %2206 = vst.msk [vmem:[#allocation5 + $0xf] sm:$0x1] %vm6538_vm9, %v2205_v59  ;;  %v2266_v61 = vrot.slane %v4904_v58, %v6534_v11 }
 0x33b   : > { %v2227_v43 = vld [vmem:[#allocation4 + $0x23] sm:$0x1]  ;;  %v1859_v46 = vmax.f32 %v1848_v56, 0.0  ;;  %2245 = vrot.lane.b32.xlu0 %v2244_v57, %s5899_s8  ;;  %v2249_v63 = vld [vmem:[#allocation4 + $0x25] sm:$0x1]  ;;  %v2288_v0 = vrot.slane %v4905_v60, %v6534_v11  ;;  %v5665_v52 = vld [vmem:[%s7431_s5 + $0x280] sm:$0xff]  }
 0x33c   : > { %2228 = vst.msk [vmem:[#allocation5 + $0x10] sm:$0x1] %vm6538_vm9, %v2227_v43  ;;  %v4906_v62 = vld.sshfl [vmem:[#allocation4 + $0x2a] sm:$0x1 pattern:$0x75316420] }
 0x33d   : > { %1867 = vst.msk [vmem:[#allocation4 + $0x30] sm:$0x7f] %vm1866_vm10, %v1859_v46  ;;  %v4907_v1 = vld.sshfl [vmem:[#allocation4 + $0x2d] sm:$0x1 pattern:$0x75316420]  ;;  %v2310_v7 = vrot.slane %v4906_v62, %v6534_v11 }
 0x33e   : > { %2250 = vst.msk [vmem:[#allocation5 + $0x11] sm:$0x1] %vm6538_vm9, %v2249_v63  ;;  %v2271_v2 = vld [vmem:[#allocation4 + $0x27] sm:$0x1]  ;;  %2267 = vrot.lane.b32.xlu1 %v2266_v61, %s5899_s8  ;;  %v2293_v3 = vld [vmem:[#allocation4 + $0x29] sm:$0x1]  ;;  %v2332_v8 = vrot.slane %v4907_v1, %v6534_v11 }
 0x33f   : > { %2272 = vst.msk [vmem:[#allocation5 + $0x12] sm:$0x1] %vm6538_vm9, %v2271_v2  ;;  %v2315_v5 = vld [vmem:[#allocation4 + $0x2c] sm:$0x1]  ;;  %v2337_v6 = vld [vmem:[#allocation4 + $0x2e] sm:$0x1]  ;;  %2289 = vrot.lane.b32.xlu0 %v2288_v0, %s5899_s8 }
 0x340   : > { %2294 = vst.msk [vmem:[#allocation5 + $0x13] sm:$0x1] %vm6538_vm9, %v2293_v3  ;;  %2316 = vst.msk [vmem:[#allocation5 + $0x14] sm:$0x1] %vm6538_vm9, %v2315_v5  ;;  %v5666_v55 = vld [vmem:[%s7431_s5 + $0xc8] sm:$0xff]   ;;  %v5670_v43 = vld [vmem:[%s7431_s5 + $0xd0] sm:$0xff]  }
 0x341   : > { %2338 = vst.msk [vmem:[#allocation5 + $0x15] sm:$0x1] %vm6538_vm9, %v2337_v6  ;;  %v4908_v9 = vld.sshfl [vmem:[#allocation4 + $0x2f] sm:$0x1 pattern:$0x75316420] }
 0x342   : > { %2311 = vrot.lane.b32.xlu1 %v2310_v7, %s5899_s8  ;;  %v2354_v10 = vrot.slane %v4908_v9, %v6534_v11  ;;  %v5667_v56 = vld [vmem:[%s7431_s5 + $0x2c8] sm:$0xff]   ;;  %v5671_v46 = vld [vmem:[%s7431_s5 + $0x2d0] sm:$0xff]   ;;  %v5674_v63 = vld [vmem:[%s7431_s5 + $0xd8] sm:$0xff]  }
 0x343   : > { %2333 = vrot.lane.b32.xlu0 %v2332_v8, %s5899_s8  ;;  %v5668_v58 = vld [vmem:[%s7431_s5 + $0x88] sm:$0xff]   ;;  %v5672_v61 = vld [vmem:[%s7431_s5 + $0x90] sm:$0xff]   ;;  %v5675_v0 = vld [vmem:[%s7431_s5 + $0x2d8] sm:$0xff]  }
 0x344   : > { %v4909_v12 = vld.sshfl [vmem:[#allocation4 + $0x31] sm:$0x1 pattern:$0x75316420]  ;;  %v2359_v13 = vld [vmem:[#allocation4 + $0x30] sm:$0x1] }
 0x345   : > { %v2376_v14 = vrot.slane %v4909_v12, %v6534_v11  ;;  %v4910_v16 = vld.sshfl [vmem:[#allocation4 + $0x33] sm:$0x1 pattern:$0x75316420]  ;;  %2360 = vst.msk [vmem:[#allocation5 + $0x16] sm:$0x1] %vm6538_vm9, %v2359_v13 }
 0x346   : > { %v2381_v17 = vld [vmem:[#allocation4 + $0x32] sm:$0x1]  ;;  %2355 = vrot.lane.b32.xlu1 %v2354_v10, %s5899_s8  ;;  %v4911_v18 = vld.sshfl [vmem:[#allocation4 + $0x35] sm:$0x1 pattern:$0x75316420]  ;;  %v2398_v20 = vrot.slane %v4910_v16, %v6534_v11 }
 0x347   : > { %2382 = vst.msk [vmem:[#allocation5 + $0x17] sm:$0x1] %vm6538_vm9, %v2381_v17  ;;  %v2403_v19 = vld [vmem:[#allocation4 + $0x34] sm:$0x1]  ;;  %2377 = vrot.lane.b32.xlu0 %v2376_v14, %s5899_s8  ;;  %v2420_v21 = vrot.slane %v4911_v18, %v6534_v11  ;;  %v5669_v59 = vld [vmem:[%s7431_s5 + $0x288] sm:$0xff]   ;;  %v5673_v62 = vld [vmem:[%s7431_s5 + $0x290] sm:$0xff]  }
 0x348   : > { %2404 = vst.msk [vmem:[#allocation5 + $0x18] sm:$0x1] %vm6538_vm9, %v2403_v19  ;;  %v5676_v3 = vld [vmem:[%s7431_s5 + $0x98] sm:$0xff]   ;;  %v5678_v6 = vld [vmem:[%s7431_s5 + $0xe0] sm:$0xff]   ;;  %v5682_v13 = vld [vmem:[%s7431_s5 + $0xe8] sm:$0xff]  }
 0x349   : > { %v5677_v5 = vld [vmem:[%s7431_s5 + $0x298] sm:$0xff]   ;;  %v5679_v7 = vld [vmem:[%s7431_s5 + $0x2e0] sm:$0xff]   ;;  %v5683_v14 = vld [vmem:[%s7431_s5 + $0x2e8] sm:$0xff]  }
 0x34a   : > { %2399 = vrot.lane.b32.xlu1 %v2398_v20, %s5899_s8  ;;  %v5680_v10 = vld [vmem:[%s7431_s5 + $0xa0] sm:$0xff]   ;;  %v5684_v19 = vld [vmem:[%s7431_s5 + $0xa8] sm:$0xff]  }
 0x34b   : > { %2421 = vrot.lane.b32.xlu0 %v2420_v21, %s5899_s8  ;;  %v5681_v12 = vld [vmem:[%s7431_s5 + $0x2a0] sm:$0xff]   ;;  %v5685_v20 = vld [vmem:[%s7431_s5 + $0x2a8] sm:$0xff]   ;;  %s270_s8 = scalar_lea.vmem [#allocation6], %s269_s9 }
 0x34c   : > { %s4730_s14 = sshll.u32 %s270_s8, 4  ;;  %s7385_s14 = int_to_ptr.vmem [resolvable:$true] %s4730_s14 }
 0x34d   : > { %s5834_s18 = scalar_lea.vmem %s7385_s14, 16  ;;  %p5841_p0 = scmp.lt.s32.totalorder %s7385_s14, %s5839_s20 }
 0x34e   : > { %p5835_p11 = scmp.ne.s32.totalorder %s7385_s14, %s5834_s18  ;;  %p5842_p1 = scmp.lt.s32.totalorder %s5840_s21, %s5834_s18 }
 0x350   : > { %p5836_p12 = pnand %p5835_p11, %p5984_p5  ;;  %p5843_p2 = por %p5842_p1, %p5841_p0 }
 0x352   : > { %p5837_p13 = pneg %p5836_p12 }
 0x354   : > { %p5844_p3 = pnand %p5843_p2, %p5837_p13 }
 0x389   : > { %v1916_v23 = vpop.permute.xlu1 %1915 }
 0x38a   : > { %1918 = vst.msk [vmem:[#allocation5 + $0x1] sm:$0x1] %vm6710_vm13, %v1916_v23  ;;  %v1891_v15 = vpop.permute.xlu0 %1890  ;;  %v6852_v23 = vsub.s32 5, %v6518_v4 }
 0x38b   : > { %1896 = vst.msk [vmem:[#allocation5] sm:$0x1] %vm6710_vm13, %v1891_v15  ;;  %v5686_v15 = vld [vmem:[%s7431_s5 + $0xf0] sm:$0xff]  }
 0x38d   : > { %v1960_v11 = vpop.permute.xlu1 %1959 }
 0x38e   : > { %1962 = vst.msk [vmem:[#allocation5 + $0x3] sm:$0x1] %vm6710_vm13, %v1960_v11  ;;  %v1938_v24 = vpop.permute.xlu0 %1937  ;;  %v6860_v11 = vsub.s32 4, %v6518_v4 }
 0x38f   : > { %1940 = vst.msk [vmem:[#allocation5 + $0x2] sm:$0x1] %vm6710_vm13, %v1938_v24 }
 0x391   : > { %v2004_v54 = vpop.permute.xlu1 %2003 }
 0x392   : > { %2006 = vst.msk [vmem:[#allocation5 + $0x5] sm:$0x1] %vm6710_vm13, %v2004_v54  ;;  %v1982_v48 = vpop.permute.xlu0 %1981 }
 0x393   : > { %1984 = vst.msk [vmem:[#allocation5 + $0x4] sm:$0x1] %vm6710_vm13, %v1982_v48  ;;  %v5687_v48 = vld [vmem:[%s7431_s5 + $0x2f0] sm:$0xff]  }
 0x395   : > { %v2048_v25 = vpop.permute.xlu1 %2047 }
 0x396   : > { %2050 = vst.msk [vmem:[#allocation5 + $0x7] sm:$0x1] %vm6710_vm13, %v2048_v25  ;;  %v2026_v26 = vpop.permute.xlu0 %2025 }
 0x397   : > { %2028 = vst.msk [vmem:[#allocation5 + $0x6] sm:$0x1] %vm6710_vm13, %v2026_v26 }
 0x399   : > { %v2092_v27 = vpop.permute.xlu1 %2091 }
 0x39a   : > { %2094 = vst.msk [vmem:[#allocation5 + $0x9] sm:$0x1] %vm6710_vm13, %v2092_v27  ;;  %v2070_v28 = vpop.permute.xlu0 %2069 }
 0x39b   : > { %2072 = vst.msk [vmem:[#allocation5 + $0x8] sm:$0x1] %vm6710_vm13, %v2070_v28 }
 0x39d   : > { %v2136_v34 = vpop.permute.xlu1 %2135 }
 0x39e   : > { %2138 = vst.msk [vmem:[#allocation5 + $0xb] sm:$0x1] %vm6710_vm13, %v2136_v34  ;;  %v2114_v35 = vpop.permute.xlu0 %2113  ;;  %v6751_v37 = vld [vmem:[#allocation5] sm:$0xff]  ;;  %v5688_v34 = vld [vmem:[%s7431_s5 + $0xb0] sm:$0xff]  }
 0x39f   : > { %2116 = vst.msk [vmem:[#allocation5 + $0xa] sm:$0x1] %vm6710_vm13, %v2114_v35  ;;  %v2440_v36 = vrot.slane %v6751_v37, %v6735_v29  ;;  %v2464_v38 = vrot.slane %v6751_v37, %v6738_v30  ;;  %v2436_v41 = vrot.slane %v6751_v37, %v6741_v31  ;;  %v2460_v42 = vrot.slane %v6751_v37, %v6744_v32  ;;  %v5689_v35 = vld [vmem:[%s7431_s5 + $0x2b0] sm:$0xff]  }
 0x3a0   : > { %v2448_v40 = vrot.slane %v6751_v37, %v6747_v33  ;;  %v2456_v22 = vrot.slane %v6751_v37, %v6852_v23 }
 0x3a1   : > { %v2180_v44 = vpop.permute.xlu1 %2179  ;;  %v2559_v45 = vpack.c.bf16 %v2440_v36, %v2440_v36  ;;  %v2565_v47 = vpack.c.bf16 %v2464_v38, %v2464_v38  ;;  %v2558_v49 = vpack.c.bf16 %v2436_v41, %v2436_v41  ;;  %v2564_v51 = vpack.c.bf16 %v2460_v42, %v2460_v42  ;;  %v5690_v36 = vld [vmem:[%s7431_s5 + $0xf8] sm:$0xff]  }
 0x3a2   : > { %2182 = vst.msk [vmem:[#allocation5 + $0xd] sm:$0x1] %vm6710_vm13, %v2180_v44  ;;  %v2158_v53 = vpop.permute.xlu0 %2157  ;;  %v2561_v57 = vpack.c.bf16 %v2448_v40, %v2448_v40  ;;  %v5691_v38 = vld [vmem:[%s7431_s5 + $0x2f8] sm:$0xff]   ;;  %v6894_v41 = vsub.s32 2, %v6518_v4 }
 0x3a3   : > { %2160 = vst.msk [vmem:[#allocation5 + $0xc] sm:$0x1] %vm6710_vm13, %v2158_v53  ;;  %4216 = vmatprep.mubr.bf16.mxu1 %v2559_v45  ;;  %4336 = vmatprep.mubr.bf16.mxu0 %v2565_v47  ;;  %v5692_v44 = vld [vmem:[%s7431_s5 + $0xb8] sm:$0xff]   ;;  %v5694_v47 = vld [vmem:[%s7431_s5 + $0x140] sm:$0xff]  }
 0x3a4   : > { %4217 = vmatmul.mubr.bf16.vlgmr.msra.gmra.mrb[32].mxu1 %v2558_v49  ;;  %4337 = vmatmul.mubr.bf16.vlgmr.msra.gmra.mrb[68].mxu0 %v2564_v51  ;;  %v5693_v45 = vld [vmem:[%s7431_s5 + $0x2b8] sm:$0xff]   ;;  %v2444_v4 = vrot.slane %v6751_v37, %v6894_v41 }
 0x3a5   : > { %5219 = vmatpush3.bf16.msra.mxu1 %v5664_v50  ;;  %5307 = vmatpush3.bf16.msra.mxu0 %v5665_v52  ;;  %v5695_v50 = vld [vmem:[%s7431_s5 + $0x3c0] sm:$0xff]  }
 0x3a6   : > { %4256 = vmatprep.mubr.bf16.mxu1 %v2561_v57  ;;  %v2202_v60 = vpop.permute.xlu0 %2201  ;;  %5220 = vmatprep.subr.bf16.mxu1 %v5666_v55  ;;  %v5696_v52 = vld [vmem:[%s7431_s5 + $0x100] sm:$0xff]   ;;  %v2560_v53 = vpack.c.bf16 %v2444_v4, %v2444_v4  ;;  %v2563_v57 = vpack.c.bf16 %v2456_v22, %v2456_v22  ;;  %v5734_v22 = vld [vmem:[%s7431_s5 + $0x250] sm:$0xff]  }
 0x3a7   : > { %2204 = vst.msk [vmem:[#allocation5 + $0xe] sm:$0x1] %vm6710_vm13, %v2202_v60  ;;  %5308 = vmatprep.subr.bf16.mxu0 %v5667_v56  ;;  %v5697_v56 = vld [vmem:[%s7431_s5 + $0x380] sm:$0xff]  }
 0x3a9   : > { %5221 = vmatpush3.bf16.msra.mxu1 %v5668_v58  ;;  %5309 = vmatpush3.bf16.msra.mxu0 %v5669_v59  ;;  %v5698_v58 = vld [vmem:[%s7431_s5 + $0x148] sm:$0xff]  }
 0x3aa   : > { %5222 = vmatprep.subr.bf16.mxu1 %v5670_v43  ;;  %5310 = vmatprep.subr.bf16.mxu0 %v5671_v46  ;;  %v5699_v59 = vld [vmem:[%s7431_s5 + $0x3c8] sm:$0xff]  }
 0x3ab   : > { %v5700_v46 = vld [vmem:[%s7431_s5 + $0x108] sm:$0xff]  }
 0x3ac   : > { %v2224_v1 = vpop.permute.xlu1 %2223 }
 0x3ad   : > { %5223 = vmatpush3.bf16.msra.mxu1 %v5672_v61  ;;  %5311 = vmatpush3.bf16.msra.mxu0 %v5673_v62  ;;  %2226 = vst.msk [vmem:[#allocation5 + $0xf] sm:$0x1] %vm6710_vm13, %v2224_v1  ;;  %v2246_v2 = vpop.permute.xlu0 %2245  ;;  %v5701_v61 = vld [vmem:[%s7431_s5 + $0x388] sm:$0xff]   ;;  %v5702_v62 = vld [vmem:[%s7431_s5 + $0x150] sm:$0xff]  }
 0x3ae   : > { %2248 = vst.msk [vmem:[#allocation5 + $0x10] sm:$0x1] %vm6710_vm13, %v2246_v2  ;;  %5224 = vmatprep.subr.bf16.mxu1 %v5674_v63  ;;  %5312 = vmatprep.subr.bf16.mxu0 %v5675_v0  ;;  %v5703_v0 = vld [vmem:[%s7431_s5 + $0x3d0] sm:$0xff]  }
 0x3af   : > { %v5704_v2 = vld [vmem:[%s7431_s5 + $0x110] sm:$0xff]  }
 0x3b0   : > { %v2268_v8 = vpop.permute.xlu1 %2267 }
 0x3b1   : > { %5225 = vmatpush3.bf16.msra.mxu1 %v5676_v3  ;;  %5313 = vmatpush3.bf16.msra.mxu0 %v5677_v5  ;;  %2270 = vst.msk [vmem:[#allocation5 + $0x11] sm:$0x1] %vm6710_vm13, %v2268_v8  ;;  %v2290_v9 = vpop.permute.xlu0 %2289  ;;  %v5706_v5 = vld [vmem:[%s7431_s5 + $0x158] sm:$0xff]  }
 0x3b2   : > { %2292 = vst.msk [vmem:[#allocation5 + $0x12] sm:$0x1] %vm6710_vm13, %v2290_v9  ;;  %5226 = vmatprep.subr.bf16.mxu1 %v5678_v6  ;;  %5314 = vmatprep.subr.bf16.mxu0 %v5679_v7  ;;  %v5707_v6 = vld [vmem:[%s7431_s5 + $0x3d8] sm:$0xff]   ;;  %v5710_v9 = vld [vmem:[%s7431_s5 + $0x160] sm:$0xff]  }
 0x3b3   : > { %v5708_v7 = vld [vmem:[%s7431_s5 + $0x118] sm:$0xff]  }
 0x3b4   : > { %v2312_v16 = vpop.permute.xlu1 %2311  ;;  %v6839_v17 = vld [vmem:[#allocation5 + $0x8] sm:$0xff]  ;;  %v5709_v8 = vld [vmem:[%s7431_s5 + $0x398] sm:$0xff]  }
 0x3b5   : > { %5227 = vmatpush3.bf16.msra.mxu1 %v5680_v10  ;;  %5315 = vmatpush3.bf16.msra.mxu0 %v5681_v12  ;;  %2314 = vst.msk [vmem:[#allocation5 + $0x13] sm:$0x1] %vm6710_vm13, %v2312_v16  ;;  %v2334_v18 = vpop.permute.xlu0 %2333  ;;  %v2480_v21 = vrot.slane %v6839_v17, %v6747_v33  ;;  %v6864_v24 = vrot.slane %v6839_v17, %v6741_v31  ;;  %v5711_v10 = vld [vmem:[%s7431_s5 + $0x3e0] sm:$0xff]   ;;  %v5715_v16 = vld [vmem:[%s7431_s5 + $0x3e8] sm:$0xff]  }
 0x3b6   : > { %2336 = vst.msk [vmem:[#allocation5 + $0x14] sm:$0x1] %vm6710_vm13, %v2334_v18  ;;  %5228 = vmatprep.subr.bf16.mxu1 %v5682_v13  ;;  %5316 = vmatprep.subr.bf16.mxu0 %v5683_v14  ;;  %v6871_v25 = vrot.slane %v6839_v17, %v6852_v23  ;;  %v6875_v27 = vrot.slane %v6839_v17, %v6860_v11  ;;  %v5712_v12 = vld [vmem:[%s7431_s5 + $0x120] sm:$0xff]   ;;  %v5714_v14 = vld [vmem:[%s7431_s5 + $0x168] sm:$0xff]  }
 0x3b7   : > { %v2569_v54 = vpack.c.bf16 %v2480_v21, %v2480_v21  ;;  %v2476_v49 = vrot.slane %v6839_v17, %v6894_v41  ;;  %v2496_v51 = vrot.slane %v6839_v17, %v6738_v30  ;;  %v5713_v13 = vld [vmem:[%s7431_s5 + $0x3a0] sm:$0xff]   ;;  %v5716_v18 = vld [vmem:[%s7431_s5 + $0x128] sm:$0xff]   ;;  %v5719_v21 = vld [vmem:[%s7431_s5 + $0x3f0] sm:$0xff]  }
 0x3b8   : > { %v2356_v26 = vpop.permute.xlu1 %2355 }
 0x3b9   : > { %5229 = vmatpush3.bf16.msra.mxu1 %v5684_v19  ;;  %5317 = vmatpush3.bf16.msra.mxu0 %v5685_v20  ;;  %2358 = vst.msk [vmem:[#allocation5 + $0x15] sm:$0x1] %vm6710_vm13, %v2356_v26  ;;  %v2378_v28 = vpop.permute.xlu0 %2377  ;;  %v2568_v55 = vpack.c.bf16 %v2476_v49, %v2476_v49  ;;  %v2573_v60 = vpack.c.bf16 %v2496_v51, %v2496_v51  ;;  %v5717_v19 = vld [vmem:[%s7431_s5 + $0x3a8] sm:$0xff]   ;;  %v5718_v20 = vld [vmem:[%s7431_s5 + $0x170] sm:$0xff]   ;;  %v5724_v26 = vld [vmem:[%s7431_s5 + $0x138] sm:$0xff]  }
 0x3ba   : > { %2380 = vst.msk [vmem:[#allocation5 + $0x16] sm:$0x1] %vm6710_vm13, %v2378_v28  ;;  %4416 = vmatprep.mubr.bf16.mxu0 %v2569_v54  ;;  %5230 = vmatprep.subr.bf16.mxu1 %v5686_v15  ;;  %v5721_v15 = vld [vmem:[%s7431_s5 + $0x3b0] sm:$0xff]   ;;  %v5722_v54 = vld [vmem:[%s7431_s5 + $0x178] sm:$0xff]   ;;  %v5732_v49 = vld [vmem:[%s7431_s5 + $0x208] sm:$0xff]  }
 0x3bb   : > { %5318 = vmatprep.subr.bf16.mxu0 %v5687_v48  ;;  %v5723_v48 = vld [vmem:[%s7431_s5 + $0x3f8] sm:$0xff]   ;;  %v5735_v51 = vld [vmem:[%s7431_s5 + $0x4d0] sm:$0xff]  }
 0x3bc   : > { %v2400_v42 = vpop.permute.xlu1 %2399  ;;  %v5725_v28 = vld [vmem:[%s7431_s5 + $0x3b8] sm:$0xff]  }
 0x3bd   : > { %5231 = vmatpush3.bf16.msra.mxu1 %v5688_v34  ;;  %5319 = vmatpush3.bf16.msra.mxu0 %v5689_v35  ;;  %2402 = vst.msk [vmem:[#allocation5 + $0x17] sm:$0x1] %vm6710_vm13, %v2400_v42  ;;  %v2422_v40 = vpop.permute.xlu0 %2421  ;;  %v2452_v34 = vrot.slane %v6751_v37, %v6860_v11  ;;  %v5726_v35 = vld [vmem:[%s7431_s5 + $0x240] sm:$0xff]   ;;  %v2472_v42 = vrot.slane %v6839_v17, %v6735_v29 }
 0x3be   : > { %2424 = vst.msk [vmem:[#allocation5 + $0x18] sm:$0x1] %vm6710_vm13, %v2422_v40  ;;  %5232 = vmatprep.subr.bf16.mxu1 %v5690_v36  ;;  %5320 = vmatprep.subr.bf16.mxu0 %v5691_v38  ;;  %v2492_v36 = vrot.slane %v6839_v17, %v6744_v32  ;;  %v5727_v38 = vld [vmem:[%s7431_s5 + $0x4c0] sm:$0xff]   ;;  %v5730_v17 = vld [vmem:[%s7431_s5 + $0x248] sm:$0xff]  }
 0x3bf   : > { %v5728_v37 = vld [vmem:[%s7431_s5 + $0x200] sm:$0xff]   ;;  %v2562_v40 = vpack.c.bf16 %v2452_v34, %v2452_v34  ;;  %v2567_v4 = vpack.c.bf16 %v2472_v42, %v2472_v42  ;;  %v5768_v34 = vld [vmem:[%s7431_s5 + $0x310] sm:$0xff]   ;;  %v5772_v42 = vld [vmem:[%s7431_s5 + $0x318] sm:$0xff]  }
 0x3c1   : > { %5233 = vmatpush3.bf16.msra.mxu1 %v5692_v44  ;;  %5321 = vmatpush3.bf16.msra.mxu0 %v5693_v45  ;;  %v5729_v44 = vld [vmem:[%s7431_s5 + $0x480] sm:$0xff]   ;;  %v2572_v45 = vpack.c.bf16 %v2492_v36, %v2492_v36  ;;  %v5770_v36 = vld [vmem:[%s7431_s5 + $0x358] sm:$0xff]  }
 0x3c2   : > { %5240 = vmatprep.subr.bf16.mxu1 %v5694_v47  ;;  %5350 = vmatprep.subr.bf16.mxu0 %v5695_v50  ;;  %v5731_v47 = vld [vmem:[%s7431_s5 + $0x4c8] sm:$0xff]  }
 0x3c3   : > { %v5733_v50 = vld [vmem:[%s7431_s5 + $0x488] sm:$0xff]  }
 0x3c4   : > { %4257 = vmatmul.mubr.bf16.vlgmr.msra.gmra.mrb[36].mxu1 %v2560_v53  ;;  %4417 = vmatmul.mubr.bf16.vlgmr.msra.gmra.mrb[72].mxu0 %v2568_v55  ;;  %v6932_v43 = vld [vmem:[#allocation5 + $0x10] sm:$0xff]  ;;  %v5737_v53 = vld [vmem:[%s7431_s5 + $0x490] sm:$0xff]  }
 0x3c5   : > { %5241 = vmatpush3.bf16.msra.mxu1 %v5696_v52  ;;  %4296 = vmatprep.mubr.bf16.mxu1 %v2563_v57  ;;  %v6945_v63 = vrot.slane %v6932_v43, %v6741_v31  ;;  %v6952_v1 = vrot.slane %v6932_v43, %v6852_v23  ;;  %v6959_v3 = vrot.slane %v6932_v43, %v6860_v11  ;;  %v5705_v31 = vld [vmem:[%s7431_s5 + $0x390] sm:$0xff]   ;;  %v5738_v55 = vld [vmem:[%s7431_s5 + $0x258] sm:$0xff]  }
 0x3c6   : > { %5351 = vmatpush3.bf16.msra.mxu0 %v5697_v56  ;;  %4496 = vmatprep.mubr.bf16.mxu0 %v2573_v60  ;;  %v5720_v23 = vld [vmem:[%s7431_s5 + $0x130] sm:$0xff]   ;;  %v2512_v11 = vrot.slane %v6932_v43, %v6747_v33  ;;  %v5739_v56 = vld [vmem:[%s7431_s5 + $0x4d8] sm:$0xff]   ;;  %v5743_v60 = vld [vmem:[%s7431_s5 + $0x4e0] sm:$0xff]  }
 0x3c7   : > { %5242 = vmatprep.subr.bf16.mxu1 %v5698_v58  ;;  %5352 = vmatprep.subr.bf16.mxu0 %v5699_v59  ;;  %v5736_v52 = vld [vmem:[%s7431_s5 + $0x210] sm:$0xff]   ;;  %v5740_v57 = vld [vmem:[%s7431_s5 + $0x218] sm:$0xff]   ;;  %v5742_v59 = vld [vmem:[%s7431_s5 + $0x260] sm:$0xff]  }
 0x3c8   : > { %v2577_v33 = vpack.c.bf16 %v2512_v11, %v2512_v11  ;;  %v5741_v58 = vld [vmem:[%s7431_s5 + $0x498] sm:$0xff]   ;;  %v5774_v11 = vld [vmem:[%s7431_s5 + $0x360] sm:$0xff]  }
 0x3c9   : > { %5243 = vmatpush3.bf16.msra.mxu1 %v5700_v46  ;;  %v5744_v46 = vld [vmem:[%s7431_s5 + $0x220] sm:$0xff]  }
 0x3ca   : > { %5353 = vmatpush3.bf16.msra.mxu0 %v5701_v61  ;;  %5244 = vmatprep.subr.bf16.mxu1 %v5702_v62  ;;  %v5745_v61 = vld [vmem:[%s7431_s5 + $0x4a0] sm:$0xff]   ;;  %v5746_v62 = vld [vmem:[%s7431_s5 + $0x268] sm:$0xff]  }
 0x3cb   : > { %5354 = vmatprep.subr.bf16.mxu0 %v5703_v0  ;;  %v5747_v0 = vld [vmem:[%s7431_s5 + $0x4e8] sm:$0xff]  }
 0x3cd   : > { %5245 = vmatpush3.bf16.msra.mxu1 %v5704_v2  ;;  %v5748_v2 = vld [vmem:[%s7431_s5 + $0x228] sm:$0xff]  }
 0x3ce   : > { %5355 = vmatpush3.bf16.msra.mxu0 %v5705_v31  ;;  %5246 = vmatprep.subr.bf16.mxu1 %v5706_v5  ;;  %v5749_v31 = vld [vmem:[%s7431_s5 + $0x4a8] sm:$0xff]   ;;  %v5750_v5 = vld [vmem:[%s7431_s5 + $0x270] sm:$0xff]  }
 0x3cf   : > { %5356 = vmatprep.subr.bf16.mxu0 %v5707_v6  ;;  %v5751_v6 = vld [vmem:[%s7431_s5 + $0x4f0] sm:$0xff]  }
 0x3d1   : > { %5247 = vmatpush3.bf16.msra.mxu1 %v5708_v7  ;;  %v5752_v7 = vld [vmem:[%s7431_s5 + $0x230] sm:$0xff]  }
 0x3d2   : > { %5357 = vmatpush3.bf16.msra.mxu0 %v5709_v8  ;;  %5248 = vmatprep.subr.bf16.mxu1 %v5710_v9  ;;  %v5753_v8 = vld [vmem:[%s7431_s5 + $0x4b0] sm:$0xff]   ;;  %v5754_v9 = vld [vmem:[%s7431_s5 + $0x278] sm:$0xff]  }
 0x3d3   : > { %5358 = vmatprep.subr.bf16.mxu0 %v5711_v10  ;;  %v5755_v10 = vld [vmem:[%s7431_s5 + $0x4f8] sm:$0xff]  }
 0x3d5   : > { %5249 = vmatpush3.bf16.msra.mxu1 %v5712_v12  ;;  %v5756_v12 = vld [vmem:[%s7431_s5 + $0x238] sm:$0xff]  }
 0x3d6   : > { %5359 = vmatpush3.bf16.msra.mxu0 %v5713_v13  ;;  %5250 = vmatprep.subr.bf16.mxu1 %v5714_v14  ;;  %v5757_v13 = vld [vmem:[%s7431_s5 + $0x4b8] sm:$0xff]   ;;  %v5758_v14 = vld [vmem:[%s7431_s5 + $0x340] sm:$0xff]  }
 0x3d7   : > { %5360 = vmatprep.subr.bf16.mxu0 %v5715_v16  ;;  %v2508_v16 = vrot.slane %v6932_v43, %v6894_v41  ;;  %v5761_v41 = vld [vmem:[%s7431_s5 + $0x580] sm:$0xff]  }
 0x3d9   : > { %5251 = vmatpush3.bf16.msra.mxu1 %v5716_v18  ;;  %v5759_v18 = vld [vmem:[%s7431_s5 + $0x5c0] sm:$0xff]  }
 0x3da   : > { %5361 = vmatpush3.bf16.msra.mxu0 %v5717_v19  ;;  %5252 = vmatprep.subr.bf16.mxu1 %v5718_v20  ;;  %v5760_v19 = vld [vmem:[%s7431_s5 + $0x300] sm:$0xff]   ;;  %v2528_v20 = vrot.slane %v6932_v43, %v6738_v30  ;;  %v5763_v30 = vld [vmem:[%s7431_s5 + $0x5c8] sm:$0xff]  }
 0x3db   : > { %5362 = vmatprep.subr.bf16.mxu0 %v5719_v21  ;;  %v2566_v21 = vpack.c.bf16 %v6864_v24, %v6864_v24 }
 0x3dc   : > { %v2581_v24 = vpack.c.bf16 %v2528_v20, %v2528_v20  ;;  %v5809_v20 = vld [vmem:[%s7431_s5 + $0x508] sm:$0xff]  }
 0x3dd   : > { %5253 = vmatpush3.bf16.msra.mxu1 %v5720_v23  ;;  %v2576_v23 = vpack.c.bf16 %v2508_v16, %v2508_v16  ;;  %v2574_v16 = vpack.c.bf16 %v6945_v63, %v6945_v63  ;;  %v5810_v63 = vld [vmem:[%s7431_s5 + $0x550] sm:$0xff]  }
 0x3de   : > { %5363 = vmatpush3.bf16.msra.mxu0 %v5721_v15  ;;  %5254 = vmatprep.subr.bf16.mxu1 %v5722_v54  ;;  %v5762_v15 = vld [vmem:[%s7431_s5 + $0x348] sm:$0xff]   ;;  %v2571_v54 = vpack.c.bf16 %v6871_v25, %v6871_v25  ;;  %v5766_v25 = vld [vmem:[%s7431_s5 + $0x350] sm:$0xff]  }
 0x3df   : > { %5364 = vmatprep.subr.bf16.mxu0 %v5723_v48  ;;  %v5764_v48 = vld [vmem:[%s7431_s5 + $0x308] sm:$0xff]  }
 0x3e1   : > { %5255 = vmatpush3.bf16.msra.mxu1 %v5724_v26  ;;  %v5765_v26 = vld [vmem:[%s7431_s5 + $0x588] sm:$0xff]  }
 0x3e2   : > { %5365 = vmatpush3.bf16.msra.mxu0 %v5725_v28  ;;  %5284 = vmatprep.subr.bf16.mxu1 %v5726_v35  ;;  %v5767_v28 = vld [vmem:[%s7431_s5 + $0x5d0] sm:$0xff]  }
 0x3e3   : > { %5394 = vmatprep.subr.bf16.mxu0 %v5727_v38  ;;  %v5769_v35 = vld [vmem:[%s7431_s5 + $0x590] sm:$0xff]   ;;  %v5771_v38 = vld [vmem:[%s7431_s5 + $0x5d8] sm:$0xff]  }
 0x3e4   : > { %4297 = vmatmul.mubr.bf16.vlgmr.msra.gmra.mrb[40].mxu1 %v2562_v40  ;;  %v5775_v40 = vld [vmem:[%s7431_s5 + $0x5e0] sm:$0xff]  }
 0x3e5   : > { %4497 = vmatmul.mubr.bf16.vlgmr.msra.gmra.mrb[76].mxu0 %v2572_v45  ;;  %5285 = vmatpush3.bf16.msra.mxu1 %v5728_v37  ;;  %v5773_v37 = vld [vmem:[%s7431_s5 + $0x598] sm:$0xff]   ;;  %v5777_v45 = vld [vmem:[%s7431_s5 + $0x5a0] sm:$0xff]  }
 0x3e6   : > { %4376 = vmatprep.mubr.bf16.mxu1 %v2567_v4  ;;  %5395 = vmatpush3.bf16.msra.mxu0 %v5729_v44  ;;  %v5776_v44 = vld [vmem:[%s7431_s5 + $0x320] sm:$0xff]   ;;  %v5779_v4 = vld [vmem:[%s7431_s5 + $0x5e8] sm:$0xff]  }
 0x3e7   : > { %4576 = vmatprep.mubr.bf16.mxu0 %v2577_v33  ;;  %5286 = vmatprep.subr.bf16.mxu1 %v5730_v17  ;;  %v5778_v17 = vld [vmem:[%s7431_s5 + $0x368] sm:$0xff]  }
 0x3e8   : > { %5396 = vmatprep.subr.bf16.mxu0 %v5731_v47  ;;  %v5780_v47 = vld [vmem:[%s7431_s5 + $0x328] sm:$0xff]  }
 0x3e9   : > { %5287 = vmatpush3.bf16.msra.mxu1 %v5732_v49  ;;  %v5781_v33 = vld [vmem:[%s7431_s5 + $0x5a8] sm:$0xff]   ;;  %v5782_v49 = vld [vmem:[%s7431_s5 + $0x370] sm:$0xff]  }
 0x3ea   : > { %5397 = vmatpush3.bf16.msra.mxu0 %v5733_v50  ;;  %5288 = vmatprep.subr.bf16.mxu1 %v5734_v22  ;;  %v5783_v50 = vld [vmem:[%s7431_s5 + $0x5f0] sm:$0xff]  }
 0x3eb   : > { %5398 = vmatprep.subr.bf16.mxu0 %v5735_v51  ;;  %v5784_v22 = vld [vmem:[%s7431_s5 + $0x330] sm:$0xff]  }
 0x3ec   : > { %v5785_v51 = vld [vmem:[%s7431_s5 + $0x5b0] sm:$0xff]  }
 0x3ed   : > { %5289 = vmatpush3.bf16.msra.mxu1 %v5736_v52  ;;  %v5786_v52 = vld [vmem:[%s7431_s5 + $0x378] sm:$0xff]  }
 0x3ee   : > { %5399 = vmatpush3.bf16.msra.mxu0 %v5737_v53  ;;  %5290 = vmatprep.subr.bf16.mxu1 %v5738_v55  ;;  %v5787_v53 = vld [vmem:[%s7431_s5 + $0x5f8] sm:$0xff]  }
 0x3ef   : > { %5400 = vmatprep.subr.bf16.mxu0 %v5739_v56  ;;  %v5788_v55 = vld [vmem:[%s7431_s5 + $0x338] sm:$0xff]  }
 0x3f0   : > { %v5789_v56 = vld [vmem:[%s7431_s5 + $0x5b8] sm:$0xff]  }
 0x3f1   : > { %5291 = vmatpush3.bf16.msra.mxu1 %v5740_v57  ;;  %v5790_v57 = vld [vmem:[%s7431_s5 + $0x440] sm:$0xff]  }
 0x3f2   : > { %5401 = vmatpush3.bf16.msra.mxu0 %v5741_v58  ;;  %5292 = vmatprep.subr.bf16.mxu1 %v5742_v59  ;;  %v2524_v58 = vrot.slane %v6932_v43, %v6744_v32  ;;  %v2504_v59 = vrot.slane %v6932_v43, %v6735_v29  ;;  %v5793_v29 = vld [vmem:[%s7431_s5 + $0x408] sm:$0xff]   ;;  %v5795_v43 = vld [vmem:[%s7431_s5 + $0x410] sm:$0xff]  }
 0x3f3   : > { %5402 = vmatprep.subr.bf16.mxu0 %v5743_v60  ;;  %v5791_v60 = vld [vmem:[%s7431_s5 + $0x400] sm:$0xff]  }
 0x3f4   : > { %v2575_v32 = vpack.c.bf16 %v2504_v59, %v2504_v59 }
 0x3f5   : > { %5293 = vmatpush3.bf16.msra.mxu1 %v5744_v46  ;;  %v2570_v46 = vpack.c.bf16 %v6875_v27, %v6875_v27  ;;  %v5794_v27 = vld [vmem:[%s7431_s5 + $0x450] sm:$0xff]  }
 0x3f6   : > { %5403 = vmatpush3.bf16.msra.mxu0 %v5745_v61  ;;  %5294 = vmatprep.subr.bf16.mxu1 %v5746_v62  ;;  %v5792_v61 = vld [vmem:[%s7431_s5 + $0x448] sm:$0xff]   ;;  %v2580_v62 = vpack.c.bf16 %v2524_v58, %v2524_v58 }
 0x3f7   : > { %5404 = vmatprep.subr.bf16.mxu0 %v5747_v0  ;;  %v5796_v0 = vld [vmem:[%s7431_s5 + $0x458] sm:$0xff]  }
 0x3f9   : > { %5295 = vmatpush3.bf16.msra.mxu1 %v5748_v2  ;;  %v5797_v2 = vld [vmem:[%s7431_s5 + $0x418] sm:$0xff]  }
 0x3fa   : > { %5405 = vmatpush3.bf16.msra.mxu0 %v5749_v31  ;;  %5296 = vmatprep.subr.bf16.mxu1 %v5750_v5  ;;  %v5798_v31 = vld [vmem:[%s7431_s5 + $0x460] sm:$0xff]  }
 0x3fb   : > { %5406 = vmatprep.subr.bf16.mxu0 %v5751_v6  ;;  %v5799_v5 = vld [vmem:[%s7431_s5 + $0x420] sm:$0xff]   ;;  %v5800_v6 = vld [vmem:[%s7431_s5 + $0x468] sm:$0xff]  }
 0x3fd   : > { %5297 = vmatpush3.bf16.msra.mxu1 %v5752_v7  ;;  %v5801_v7 = vld [vmem:[%s7431_s5 + $0x428] sm:$0xff]  }
 0x3fe   : > { %5407 = vmatpush3.bf16.msra.mxu0 %v5753_v8  ;;  %5298 = vmatprep.subr.bf16.mxu1 %v5754_v9  ;;  %v5802_v8 = vld [vmem:[%s7431_s5 + $0x470] sm:$0xff]  }
 0x3ff   : > { %5408 = vmatprep.subr.bf16.mxu0 %v5755_v10  ;;  %v5803_v9 = vld [vmem:[%s7431_s5 + $0x430] sm:$0xff]   ;;  %v5804_v10 = vld [vmem:[%s7431_s5 + $0x478] sm:$0xff]  }
 0x401   : > { %5299 = vmatpush3.bf16.msra.mxu1 %v5756_v12  ;;  %v5805_v12 = vld [vmem:[%s7431_s5 + $0x438] sm:$0xff]  }
 0x402   : > { %5409 = vmatpush3.bf16.msra.mxu0 %v5757_v13  ;;  %5328 = vmatprep.subr.bf16.mxu1 %v5758_v14  ;;  %v5806_v13 = vld [vmem:[%s7431_s5 + $0x540] sm:$0xff]  }
 0x403   : > { %5438 = vmatprep.subr.bf16.mxu0 %v5759_v18  ;;  %v5807_v14 = vld [vmem:[%s7431_s5 + $0x500] sm:$0xff]   ;;  %v5808_v18 = vld [vmem:[%s7431_s5 + $0x548] sm:$0xff]  }
 0x404   : > { %4377 = vmatmul.mubr.bf16.vlgmr.msra.gmra.mrb[44].mxu1 %v2566_v21  ;;  %v5811_v21 = vld [vmem:[%s7431_s5 + $0x510] sm:$0xff]  }
 0x405   : > { %4577 = vmatmul.mubr.bf16.vlgmr.msra.gmra.mrb[80].mxu0 %v2576_v23  ;;  %5329 = vmatpush3.bf16.msra.mxu1 %v5760_v19  ;;  %v2579_v19 = vpack.c.bf16 %v6952_v1, %v6952_v1  ;;  %v5812_v1 = vld [vmem:[%s7431_s5 + $0x558] sm:$0xff]   ;;  %v5814_v23 = vld [vmem:[%s7431_s5 + $0x560] sm:$0xff]  }
 0x406   : > { %4456 = vmatprep.mubr.bf16.mxu1 %v2571_v54  ;;  %5439 = vmatpush3.bf16.msra.mxu0 %v5761_v41  ;;  %v5813_v41 = vld [vmem:[%s7431_s5 + $0x518] sm:$0xff]   ;;  %v5816_v54 = vld [vmem:[%s7431_s5 + $0x568] sm:$0xff]  }
 0x407   : > { %4656 = vmatprep.mubr.bf16.mxu0 %v2581_v24  ;;  %5330 = vmatprep.subr.bf16.mxu1 %v5762_v15  ;;  %v5815_v15 = vld [vmem:[%s7431_s5 + $0x520] sm:$0xff]   ;;  %v5818_v24 = vld [vmem:[%s7431_s5 + $0x570] sm:$0xff]  }
 0x408   : > { %5440 = vmatprep.subr.bf16.mxu0 %v5763_v30  ;;  %v5817_v30 = vld [vmem:[%s7431_s5 + $0x528] sm:$0xff]  }
 0x409   : > { %5331 = vmatpush3.bf16.msra.mxu1 %v5764_v48  ;;  %v5819_v48 = vld [vmem:[%s7431_s5 + $0x530] sm:$0xff]  }
 0x40a   : > { %5441 = vmatpush3.bf16.msra.mxu0 %v5765_v26  ;;  %5332 = vmatprep.subr.bf16.mxu1 %v5766_v25  ;;  %v5820_v26 = vld [vmem:[%s7431_s5 + $0x578] sm:$0xff]  }
 0x40b   : > { %5442 = vmatprep.subr.bf16.mxu0 %v5767_v28  ;;  %v5821_v25 = vld [vmem:[%s7431_s5 + $0x538] sm:$0xff]   ;;  %v5822_v28 = vld [vmem:[%s7431_s5 + $0x600] sm:$0xff]  }
 0x40d   : > { %5333 = vmatpush3.bf16.msra.mxu1 %v5768_v34  ;;  %v2578_v34 = vpack.c.bf16 %v6959_v3, %v6959_v3  ;;  %v5825_v3 = vld [vmem:[%s7431_s5 + $0x618] sm:$0xff]  }
 0x40e   : > { %5443 = vmatpush3.bf16.msra.mxu0 %v5769_v35  ;;  %5334 = vmatprep.subr.bf16.mxu1 %v5770_v36  ;;  %v5823_v35 = vld [vmem:[%s7431_s5 + $0x608] sm:$0xff]   ;;  %v5824_v36 = vld [vmem:[%s7431_s5 + $0x610] sm:$0xff]  }
 0x40f   : > { %5444 = vmatprep.subr.bf16.mxu0 %v5771_v38  ;;  %v5826_v38 = vld [vmem:[%s7431_s5 + $0x620] sm:$0xff]  }
 0x411   : > { %5335 = vmatpush3.bf16.msra.mxu1 %v5772_v42  ;;  %v5827_v42 = vld [vmem:[%s7431_s5 + $0x628] sm:$0xff]  }
 0x412   : > { %5445 = vmatpush3.bf16.msra.mxu0 %v5773_v37  ;;  %5336 = vmatprep.subr.bf16.mxu1 %v5774_v11 }
 0x413   : > { %5446 = vmatprep.subr.bf16.mxu0 %v5775_v40 }
 0x415   : > { %5337 = vmatpush3.bf16.msra.mxu1 %v5776_v44 }
 0x416   : > { %5447 = vmatpush3.bf16.msra.mxu0 %v5777_v45  ;;  %5338 = vmatprep.subr.bf16.mxu1 %v5778_v17 }
 0x417   : > { %5448 = vmatprep.subr.bf16.mxu0 %v5779_v4 }
 0x419   : > { %5339 = vmatpush3.bf16.msra.mxu1 %v5780_v47 }
 0x41a   : > { %5449 = vmatpush3.bf16.msra.mxu0 %v5781_v33  ;;  %5340 = vmatprep.subr.bf16.mxu1 %v5782_v49  ;;  %v5828_v33 = vld [vmem:[%s7431_s5 + $0x630] sm:$0xff]  }
 0x41b   : > { %5450 = vmatprep.subr.bf16.mxu0 %v5783_v50 }
 0x41d   : > { %5341 = vmatpush3.bf16.msra.mxu1 %v5784_v22  ;;  %v5829_v22 = vld [vmem:[%s7431_s5 + $0x638] sm:$0xff]  }
 0x41e   : > { %5451 = vmatpush3.bf16.msra.mxu0 %v5785_v51  ;;  %5342 = vmatprep.subr.bf16.mxu1 %v5786_v52  ;;  %v4912_v51 = vld [vmem:[#allocation5 + $0x18] ss:$0 sm:$0xff] }
 0x41f   : > { %5452 = vmatprep.subr.bf16.mxu0 %v5787_v53  ;;  %v2582_v52 = vpack.c.bf16 %v4912_v51, %v4912_v51  ;;  %v2983_v53 = vld [vmem:[%s7432_s6] sm:$0x1] }
 0x421   : > { %5343 = vmatpush3.bf16.msra.mxu1 %v5788_v55 }
 0x422   : > { %5453 = vmatpush3.bf16.msra.mxu0 %v5789_v56  ;;  %5372 = vmatprep.subr.bf16.mxu1 %v5790_v57 }
 0x424   : > { %4457 = vmatmul.mubr.bf16.vlgmr.msra.gmra.mrb[48].mxu1 %v2570_v46 }
 0x425   : > { %4657 = vmatmul.mubr.bf16.vlgmr.msra.gmra.mrb[84].mxu0 %v2580_v62  ;;  %5373 = vmatpush3.bf16.msra.mxu1 %v5791_v60 }
 0x426   : > { %4536 = vmatprep.mubr.bf16.mxu1 %v2575_v32  ;;  %5374 = vmatprep.subr.bf16.mxu1 %v5792_v61 }
 0x429   : > { %5375 = vmatpush3.bf16.msra.mxu1 %v5793_v29 }
 0x42a   : > { %5376 = vmatprep.subr.bf16.mxu1 %v5794_v27 }
 0x42d   : > { %5377 = vmatpush3.bf16.msra.mxu1 %v5795_v43 }
 0x42e   : > { %5378 = vmatprep.subr.bf16.mxu1 %v5796_v0 }
 0x431   : > { %5379 = vmatpush3.bf16.msra.mxu1 %v5797_v2 }
 0x432   : > { %5380 = vmatprep.subr.bf16.mxu1 %v5798_v31 }
 0x435   : > { %5381 = vmatpush3.bf16.msra.mxu1 %v5799_v5 }
 0x436   : > { %5382 = vmatprep.subr.bf16.mxu1 %v5800_v6 }
 0x439   : > { %5383 = vmatpush3.bf16.msra.mxu1 %v5801_v7 }
 0x43a   : > { %5384 = vmatprep.subr.bf16.mxu1 %v5802_v8 }
 0x43d   : > { %5385 = vmatpush3.bf16.msra.mxu1 %v5803_v9 }
 0x43e   : > { %5386 = vmatprep.subr.bf16.mxu1 %v5804_v10 }
 0x441   : > { %5387 = vmatpush3.bf16.msra.mxu1 %v5805_v12 }
 0x442   : > { %5416 = vmatprep.subr.bf16.mxu1 %v5806_v13 }
 0x444   : > { %4537 = vmatmul.mubr.bf16.vlgmr.msra.gmra.mrb[52].mxu1 %v2574_v16 }
 0x445   : > { %5417 = vmatpush3.bf16.msra.mxu1 %v5807_v14  ;;  %4616 = vmatprep.mubr.bf16.mxu1 %v2579_v19 }
 0x446   : > { %5418 = vmatprep.subr.bf16.mxu1 %v5808_v18 }
 0x449   : > { %5419 = vmatpush3.bf16.msra.mxu1 %v5809_v20 }
 0x44a   : > { %5420 = vmatprep.subr.bf16.mxu1 %v5810_v63 }
 0x44d   : > { %5421 = vmatpush3.bf16.msra.mxu1 %v5811_v21 }
 0x44e   : > { %5422 = vmatprep.subr.bf16.mxu1 %v5812_v1 }
 0x451   : > { %5423 = vmatpush3.bf16.msra.mxu1 %v5813_v41 }
 0x452   : > { %5424 = vmatprep.subr.bf16.mxu1 %v5814_v23 }
 0x455   : > { %5425 = vmatpush3.bf16.msra.mxu1 %v5815_v15 }
 0x456   : > { %5426 = vmatprep.subr.bf16.mxu1 %v5816_v54 }
 0x459   : > { %5427 = vmatpush3.bf16.msra.mxu1 %v5817_v30 }
 0x45a   : > { %5428 = vmatprep.subr.bf16.mxu1 %v5818_v24 }
 0x45d   : > { %5429 = vmatpush3.bf16.msra.mxu1 %v5819_v48 }
 0x45e   : > { %5430 = vmatprep.subr.bf16.mxu1 %v5820_v26 }
 0x461   : > { %5431 = vmatpush3.bf16.msra.mxu1 %v5821_v25 }
 0x462   : > { %5469 = vmatprep.subr.bf16.mxu1 %v5902_v39 }
 0x464   : > { %4617 = vmatmul.mubr.bf16.vlgmr.msra.gmra.mrb[56].mxu1 %v2578_v34 }
 0x465   : > { %5470 = vmatpush3.bf16.msra.mxu1 %v5822_v28  ;;  %5485 = vmatprep.mubr.msk.bf16.mxu1 %vm5904_vm14, %v5902_v39 }
 0x466   : > { %5471 = vmatprep.subr.bf16.mxu1 %v5902_v39 }
 0x469   : > { %5472 = vmatpush3.bf16.msra.mxu1 %v5823_v35 }
 0x46a   : > { %5473 = vmatprep.subr.bf16.mxu1 %v5902_v39 }
 0x46d   : > { %5474 = vmatpush3.bf16.msra.mxu1 %v5824_v36 }
 0x46e   : > { %5475 = vmatprep.subr.bf16.mxu1 %v5902_v39 }
 0x471   : > { %5476 = vmatpush3.bf16.msra.mxu1 %v5825_v3 }
 0x472   : > { %5477 = vmatprep.subr.bf16.mxu1 %v5902_v39 }
 0x475   : > { %5478 = vmatpush3.bf16.msra.mxu1 %v5826_v38 }
 0x476   : > { %5479 = vmatprep.subr.bf16.mxu1 %v5902_v39 }
 0x477   : > { %v5212_v37 = vpop.f32.mrb[32].mxu1  ;;  %v5278_v11 = vpop.f32.mrb[68].mxu0 }
 0x478   : > { %v5213_v40 = vpop.f32.mrb[33].mxu1  ;;  %v5279_v44 = vpop.f32.mrb[69].mxu0 }
 0x479   : > { %v5214_v45 = vadd.f32 %v5213_v40, %v5212_v37  ;;  %v5280_v17 = vadd.f32 %v5279_v44, %v5278_v11  ;;  %5480 = vmatpush3.bf16.msra.mxu1 %v5827_v42  ;;  %v5215_v4 = vpop.f32.mrb[34].mxu1  ;;  %v5281_v47 = vpop.f32.mrb[70].mxu0 }
 0x47a   : > { %v5216_v49 = vpop.f32.mrb[35].mxu1  ;;  %v5282_v50 = vpop.f32.mrb[71].mxu0  ;;  %5481 = vmatprep.subr.bf16.mxu1 %v5902_v39 }
 0x47b   : > { %v4219_v59 = vadd.f32 %v5214_v45, %v2983_v53 }
 0x47d   : > { %5482 = vmatpush3.bf16.msra.mxu1 %v5828_v33 }
 0x47e   : > { %5483 = vmatprep.subr.bf16.mxu1 %v5902_v39 }
 0x481   : > { %5484 = vmatpush3.bf16.msra.mxu1 %v5829_v22 }
 0x484   : > { %5486 = vmatmul.mubr.bf16.vlgmr.msra.gmra.mrb[60].mxu1 %v2582_v52 }
 0x497   : > { %v5234_v55 = vpop.f32.mrb[36].mxu1  ;;  %v5322_v56 = vpop.f32.mrb[72].mxu0 }
 0x498   : > { %v5235_v57 = vpop.f32.mrb[37].mxu1  ;;  %v5323_v58 = vpop.f32.mrb[73].mxu0 }
 0x499   : > { %v5236_v60 = vadd.f32 %v5235_v57, %v5234_v55  ;;  %v5324_v46 = vadd.f32 %v5323_v58, %v5322_v56  ;;  %v5237_v61 = vpop.f32.mrb[38].mxu1  ;;  %v5325_v62 = vpop.f32.mrb[74].mxu0 }
 0x49a   : > { %v5238_v32 = vpop.f32.mrb[39].mxu1  ;;  %v5326_v29 = vpop.f32.mrb[75].mxu0 }
 0x49b   : > { %v4259_v39 = vadd.f32 %v5236_v60, %v4219_v59 }
 0x4b7   : > { %v5256_v27 = vpop.f32.mrb[40].mxu1 }
 0x4b8   : > { %v5366_v43 = vpop.f32.mrb[76].mxu0  ;;  %v5257_v0 = vpop.f32.mrb[41].mxu1 }
 0x4b9   : > { %v5258_v2 = vadd.f32 %v5257_v0, %v5256_v27  ;;  %v5367_v31 = vpop.f32.mrb[77].mxu0  ;;  %v5259_v5 = vpop.f32.mrb[42].mxu1 }
 0x4ba   : > { %v5368_v6 = vadd.f32 %v5367_v31, %v5366_v43  ;;  %v5369_v7 = vpop.f32.mrb[78].mxu0  ;;  %v5260_v8 = vpop.f32.mrb[43].mxu1 }
 0x4bb   : > { %v4299_v9 = vadd.f32 %v5258_v2, %v4259_v39  ;;  %v5370_v10 = vpop.f32.mrb[79].mxu0 }
 0x4bd   : > { %v4339_v12 = vadd.f32 %v5280_v17, %v4299_v9 }
 0x4d7   : > { %v5300_v13 = vpop.f32.mrb[44].mxu1 }
 0x4d8   : > { %v5410_v14 = vpop.f32.mrb[80].mxu0  ;;  %v5301_v16 = vpop.f32.mrb[45].mxu1 }
 0x4d9   : > { %v5302_v18 = vadd.f32 %v5301_v16, %v5300_v13  ;;  %v5411_v19 = vpop.f32.mrb[81].mxu0  ;;  %v5303_v20 = vpop.f32.mrb[46].mxu1 }
 0x4da   : > { %v5412_v63 = vadd.f32 %v5411_v19, %v5410_v14  ;;  %v5413_v21 = vpop.f32.mrb[82].mxu0  ;;  %v5304_v1 = vpop.f32.mrb[47].mxu1 }
 0x4db   : > { %v4379_v41 = vadd.f32 %v5302_v18, %v4339_v12  ;;  %v5414_v23 = vpop.f32.mrb[83].mxu0 }
 0x4dd   : > { %v4419_v15 = vadd.f32 %v5324_v46, %v4379_v41 }
 0x4f7   : > { %v5344_v54 = vpop.f32.mrb[48].mxu1 }
 0x4f8   : > { %v5454_v30 = vpop.f32.mrb[84].mxu0  ;;  %v5345_v24 = vpop.f32.mrb[49].mxu1 }
 0x4f9   : > { %v5346_v48 = vadd.f32 %v5345_v24, %v5344_v54  ;;  %v5455_v26 = vpop.f32.mrb[85].mxu0  ;;  %v5347_v25 = vpop.f32.mrb[50].mxu1 }
 0x4fa   : > { %v5456_v28 = vadd.f32 %v5455_v26, %v5454_v30  ;;  %v5457_v34 = vpop.f32.mrb[86].mxu0  ;;  %v5348_v35 = vpop.f32.mrb[51].mxu1 }
 0x4fb   : > { %v4459_v36 = vadd.f32 %v5346_v48, %v4419_v15  ;;  %v5458_v3 = vpop.f32.mrb[87].mxu0 }
 0x4fd   : > { %v4499_v38 = vadd.f32 %v5368_v6, %v4459_v36 }
 0x517   : > { %v5388_v42 = vpop.f32.mrb[52].mxu1 }
 0x518   : > { %v5389_v37 = vpop.f32.mrb[53].mxu1 }
 0x519   : > { %v5390_v11 = vadd.f32 %v5389_v37, %v5388_v42  ;;  %v5391_v40 = vpop.f32.mrb[54].mxu1 }
 0x51a   : > { %v5392_v44 = vpop.f32.mrb[55].mxu1 }
 0x51b   : > { %v4539_v45 = vadd.f32 %v5390_v11, %v4499_v38 }
 0x51d   : > { %v4579_v17 = vadd.f32 %v5412_v63, %v4539_v45 }
 0x537   : > { %v5432_v4 = vpop.f32.mrb[56].mxu1 }
 0x538   : > { %v5433_v47 = vpop.f32.mrb[57].mxu1 }
 0x539   : > { %v5434_v33 = vadd.f32 %v5433_v47, %v5432_v4  ;;  %v5435_v49 = vpop.f32.mrb[58].mxu1 }
 0x53a   : > { %v5436_v50 = vpop.f32.mrb[59].mxu1 }
 0x53b   : > { %v4619_v22 = vadd.f32 %v5434_v33, %v4579_v17 }
 0x53d   : > { %v4659_v51 = vadd.f32 %v5456_v28, %v4619_v22 }
 0x557   : > { %v4698_v52 = vpop.f32.mrb[60].mxu1 }
 0x558   : > { %v4699_v53 = vadd.f32 %v4698_v52, %v4659_v51  ;;  %v5487_v55 = vpop.f32.mrb[61].mxu1 }
 0x559   : > { %v4701_v56 = vpop.f32.mrb[62].mxu1 }
 0x55a   : > { %v5488_v57 = vpop.f32.mrb[63].mxu1  ;;  %v4705_v58 = vsel %vm4704_vm15, %v4699_v53, -inf }
 0x55b   : > { %4706 = vmax.xlane.f32.xlu1 %v4705_v58 }
 0x5e8   : > { %v4707_v59 = vpop.xlane.xlu1 %4706 }
 0x5e9   : > { %v4708_v60 = vsub.f32 %v4699_v53, %v4707_v59 }
 0x5eb   : > { %v4709_v46 = vmul.f32 1.442695, %v4708_v60 }
 0x5ed   : > { %5830 = vpow2.f32 %v4709_v46 }
 0x5f7   : > { %v5831_v61 = vpop.eup %5830 }
 0x5f8   : > { %v4711_v62 = vsel %vm4704_vm15, %v5831_v61, 0.0 }
 0x5f9   : > { %4712 = vadd.xlane.f32.xlu0 %v4711_v62 }
 0x686   : > { %v4713_v32 = vpop.xlane.xlu0 %4712 }
 0x687   : > { %5832 = vrcp.f32 %v4713_v32 }
 0x691   : > { %v5833_v29 = vpop.eup %5832 }
 0x692   : > { %v4715_v39 = vmul.f32 %v5833_v29, %v5831_v61 }
 0x694   : > { %4716 = vst.msk [vmem:[%s270_s8] sm:$0x1] %vm4704_vm15, %v4715_v39 }
 0x695   : > { %5847 = shalt.err (!%p5844_p3)
}
 0x696   : > { %s5848_s22 = scalar_lea.hbm %s7383_s19, 16  ;;  %s5852_s9 = scalar_lea.hbm %s7433_s7, 32 }
 0x697   : > { %p5849_p4 = scmp.ne.s32.totalorder %s7383_s19, %s5848_s22  ;;  %p5853_p9 = scmp.lt.u32.totalorder %s7383_s19, %s7433_s7 }
 0x698   : > { %p5854_p10 = scmp.lt.u32.totalorder %s5852_s9, %s5848_s22  ;;  %p5856_p12 = scmp.lt.u32.totalorder %s5848_s22, %s7383_s19 }
 0x699   : > { %p5850_p7 = pnand %p5849_p4, %p5984_p5 }
 0x69a   : > { %p5855_p11 = por %p5854_p10, %p5853_p9 }
 0x69b   : > { %p5851_p8 = pneg %p5850_p7 }
 0x69c   : > { %p5857_p13 = por %p5856_p12, %p5855_p11 }
 0x69e   : > { %p5858_p0 = pnand %p5857_p13, %p5851_p8 }
 0x6a0   : > { %5861 = shalt.err (!%p5858_p0)
}
 0x6a1   : > { %5490 = dma.vmem_to_hbm [thread:$0]  (%p5984_p5), %s7385_s14, 16, %s7383_s19, %s4718_s17  }
 0x6a2 PF: > { %p5496_p1 = scmp.ge.s32.totalorder %s5896_s27, 2  ;;  %s4742_s15 = sand.u32 1, %s5884_s24  }
 0x6a3   : > { %s4743_s16 = scalar_lea.sflag [#allocation7], %s4742_s15 }
 0x6a4   : > { %p5493_p2 = pnand %p5496_p1, %p5988_p6 }
 0x6a6   : > { %5879 = dma.done.wait (!%p5493_p2), %s4743_s16, 16  }
 0x6a7   : > { %5881 = vsyncadd (!%p5493_p2), %s4743_s16, 4294967280  ;;  %p17_p3 = scmp.ge.s32.totalorder %s5971_s30, 4   ;;  %s7440_s24 = smov %s5888_s25 }
 0x6a8   : > { %s7441_s25 = smov %s5892_s26  ;;  %s7442_s26 = smov %s5982_s10 }
 0x6a9   : > { %s7443_s27 = smov %s5971_s30  ;;  %19 = sbr.rel (!%p17_p3) target bundleno = 3 (0x3), region = 83 }
 0x6b0   :  { %4747 = vsyncpa [#allocation7], 1 }
 0x6b1   :  { %4749 = vsyncpa [#allocation7 + $0x1], 1 }

</bundles_post_ra>
